<compile_context>
chip_gen: v7x
topology: tpu7x:2x2x1
jax: 0.10.0
libtpu: 0.0.40
codegen_flags: <defaults>
</compile_context>

<pallas_src>
import math

import numpy as np
import jax
import jax.numpy as jnp
from jax import lax
from jax.experimental import pallas as pl
from jax.experimental.pallas import tpu as pltpu


# ----------------------------- configuration ------------------------------
HIDDEN_DIM = 32
NUM_HEADS = 4
TOP_K_RATIO = 0.25
TEMPERATURE = 1.0
NUM_TOKENS = 64            # total tokens across all messages

_SCORE_W = 128             # lane-dense width of the attention-score output


# --------------------------- fused forward kernel --------------------------
def _make_fused_kernel(*, num_tokens, hidden, num_heads, head_dim,
                       num_msgs, num_sel, kmax, kt, temperature):
    T, H = num_tokens, hidden
    NH, HD = num_heads, head_dim
    Hh = H // 2
    B = num_sel
    NHB = NH * B
    scale = 1.0 / (math.sqrt(HD) * temperature)
    NEG = float("-inf")                     # plain Python float (no captured consts)

    # Packed-key argmax: low LB bits carry the complemented lane index so one
    # max-reduction per step yields a unique, lowest-index tie-broken argmax
    # (matches lax.top_k / torch.topk tie-breaking).  Requires T <= 2**LB.
    LB = max(1, (T - 1).bit_length())
    LMASK = (1 << LB) - 1
    DEAD_OFF = 2147483648 - (1 << LB)       # sentinel offset, fits in int32

    def packed_keys(scores, lane):
        b = lax.bitcast_convert_type(scores, jnp.int32)
        key = jnp.where(b < 0, b ^ 0x7fffffff, b)   # order-preserving f32 -> i32
        low = LMASK - lane
        return (key >> LB) * (1 << LB) + low, low

    def unpack_value(pmax):
        # recover the score value (low LB mantissa bits truncated, ~2**-(23-LB) rel).
        key = (pmax >> LB) * (1 << LB)
        bits = jnp.where(key < 0, key ^ 0x7fffffff, key)
        return lax.bitcast_convert_type(bits, jnp.float32)

    def kernel(x_ref, wkvi_ref, bkvi_ref, wi2_ref, wo_ref, bo_ref,
               selbias_ref, perm_ref, vbias_ref, hblk_ref,
               out_ref, score_ref):
        x = x_ref[...]                                            # [T, H]

        # ---- fused K / V / importance-hidden / Q projection: one MXU pass ---
        kvi = (jnp.dot(x, wkvi_ref[...], preferred_element_type=jnp.float32)
               + bkvi_ref[...])                                   # [T, 3H + H//2]
        keys = kvi[:, :H]                                         # [T, H]
        vals = kvi[:, H:2 * H]                                    # [T, H]
        h1 = jnp.maximum(kvi[:, 2 * H:2 * H + Hh], 0.0)           # [T, H//2]
        q_all = kvi[:, 2 * H + Hh:]                               # [T, H] (q of all tokens)

        # importance scores, lane-dense [1, T].  The scalar bias bi2 is dropped:
        # a uniform shift never changes the per-message argmax selection.
        imp = lax.dot_general(wi2_ref[...], h1, (((1,), (1,)), ((), ())),
                              preferred_element_type=jnp.float32)  # [1, T]

        # ---- per-message top-k token selection on [num_msgs, T] rows --------
        lane_m = lax.broadcasted_iota(jnp.int32, (num_msgs, T), 1)
        pk_m, low_m = packed_keys(imp + selbias_ref[...], lane_m)
        dead_m = low_m - DEAD_OFF
        oh_rows = []
        for _ in range(kmax):
            pmax = jnp.max(pk_m, axis=-1, keepdims=True)          # 1 reduce / step
            oh = pk_m == pmax                                     # unique one-hot
            oh_rows.append(oh.astype(jnp.float32))
            pk_m = jnp.where(oh, dead_m, pk_m)
        sel_rm = jnp.concatenate(oh_rows, axis=0)                 # [kmax*msgs, T]
        sel = jnp.dot(perm_ref[...], sel_rm,
                      preferred_element_type=jnp.float32)         # [B, T] one-hot

        # ---- queries for the selected tokens: one-hot gather of q_all --------
        q = jnp.dot(sel, q_all, preferred_element_type=jnp.float32)   # [B, H]

        # ---- head-stacked block-diagonal q -> one score matmul ---------------
        hblk = hblk_ref[...]                                      # [NHB, H] 0/1
        q_blk = jnp.concatenate([q] * NH, axis=0) * hblk          # [NHB, H]
        scores = lax.dot_general(q_blk, keys, (((1,), (1,)), ((), ())),
                                 preferred_element_type=jnp.float32) * scale
        scores = scores + jnp.concatenate([vbias_ref[...]] * NH, axis=0)

        # ---- top-kt per (head, query) row: one packed-key reduce per step ----
        lane_t = lax.broadcasted_iota(jnp.int32, (NHB, T), 1)
        pk, low_t = packed_keys(scores, lane_t)
        dead_t = low_t - DEAD_OFF
        topk_mask = jnp.zeros((NHB, T), jnp.bool_)
        cols = []
        for _ in range(kt):
            pmax = jnp.max(pk, axis=-1, keepdims=True)
            oh = pk == pmax
            topk_mask = jnp.logical_or(topk_mask, oh)
            cols.append(unpack_value(pmax))                       # [NHB, 1]
            pk = jnp.where(oh, dead_t, pk)

        # ---- softmax restricted to the selected positions (exact f32 scores) -
        w = jnp.where(topk_mask, scores, NEG)
        wmax = jnp.max(w, axis=-1, keepdims=True)
        e = jnp.where(topk_mask, jnp.exp(w - wmax), 0.0)
        wsoft = e / jnp.sum(e, axis=-1, keepdims=True)            # [NHB, T]

        # ---- value aggregation + head recombination + output projection ------
        agg = jnp.dot(wsoft, vals, preferred_element_type=jnp.float32) * hblk
        attended = agg[0:B, :]
        for h in range(1, NH):
            attended = attended + agg[h * B:(h + 1) * B, :]       # [B, H]
        updates = (jnp.dot(attended, wo_ref[...],
                           preferred_element_type=jnp.float32) + bo_ref[...])

        # ---- scatter-add updates back into the token stream ------------------
        delta = lax.dot_general(sel, updates, (((0,), (0,)), ((), ())),
                                preferred_element_type=jnp.float32)   # [T, H]
        out_ref[...] = x + delta

        # ---- per-query top-k scores averaged over heads (lane-dense store) ---
        topv = jnp.concatenate(cols, axis=1)                      # [NHB, kt]
        acc = topv[0:B, :]
        for h in range(1, NH):
            acc = acc + topv[h * B:(h + 1) * B, :]
        acc = acc * (1.0 / NH)                                    # [B, kt]
        if kt < _SCORE_W:
            acc = jnp.concatenate(
                [acc, jnp.zeros((B, _SCORE_W - kt), jnp.float32)], axis=1)
        score_ref[...] = acc                                      # [B, 128]

    return kernel


# ------------------------------ full forward -------------------------------
def fast_cross_message_token_attention(x, message_boundaries, batch_indices,
                                        params, *,
                                        num_heads=NUM_HEADS,
                                        top_k_ratio=TOP_K_RATIO,
                                        temperature=TEMPERATURE):
    T, H = x.shape
    hd = H // num_heads
    Hh = H // 2
    boundaries = np.asarray(message_boundaries)
    n_msgs_all = boundaries.shape[0]

    # ---- host-side (static) selection bookkeeping -------------------------
    msgs = []
    for m in range(n_msgs_all):
        s, e = int(boundaries[m, 0]), int(boundaries[m, 1])
        n = e - s
        if n <= 0:
            continue
        k = min(max(1, int(n * top_k_ratio)), n)
        msgs.append((m, s, e, k))
    if not msgs:
        return x, jnp.zeros((0, 0), jnp.float32)

    msel = len(msgs)
    kmax = max(k for _, _, _, k in msgs)
    B = sum(k for _, _, _, k in msgs)
    kt = min(10, T)
    MR = kmax * msel

    tok_msg = np.zeros((T,), np.int64)
    for m in range(n_msgs_all):
        s, e = int(boundaries[m, 0]), int(boundaries[m, 1])
        tok_msg[s:e] = m

    # additive per-message selection bias [msel, T]
    sel_bias = np.full((msel, T), -np.inf, np.float32)
    for j, (m, s, e, k) in enumerate(msgs):
        sel_bias[j, s:e] = 0.0

    # rank-major -> reference (message-major) row permutation; query msg ids
    perm = np.zeros((B, MR), np.float32)
    qmsg = np.zeros((B,), np.int64)
    b = 0
    for j, (m, s, e, k) in enumerate(msgs):
        for r in range(k):
            perm[b, r * msel + j] = 1.0
            qmsg[b] = m
            b += 1

    # attention validity as an additive bias [B, T] (replicated per head in-kernel)
    diff_msg = qmsg[:, None] != tok_msg[None, :]
    if batch_indices is not None:
        bi = np.asarray(batch_indices)
        valid = diff_msg & (bi[qmsg][:, None] == bi[tok_msg][None, :])
    else:
        valid = diff_msg
    vbias = np.where(valid, 0.0, -np.inf).astype(np.float32)

    # static block-diagonal head mask [num_heads*B, H]
    head_blk = np.zeros((num_heads * B, H), np.float32)
    for h in range(num_heads):
        head_blk[h * B:(h + 1) * B, h * hd:(h + 1) * hd] = 1.0

    # fuse K / V / importance-hidden / Q projections into one matmul operand
    w_kvi = jnp.concatenate(
        [params["wk"], params["wv"], params["wi1"], params["wq"]], axis=1)
    b_kvi = jnp.concatenate(
        [params["bk"], params["bv"], params["bi1"], params["bq"]], axis=1)

    kernel = _make_fused_kernel(
        num_tokens=T, hidden=H, num_heads=num_heads, head_dim=hd,
        num_msgs=msel, num_sel=B, kmax=kmax, kt=kt, temperature=temperature)

    full = lambda shape: pl.BlockSpec(shape, lambda i: (0, 0))
    updated, scores_pad = pl.pallas_call(
        kernel,
        grid=(1,),
        in_specs=[
            full((T, H)),                       # x
            full((H, 3 * H + Hh)),              # fused K/V/imp/Q weights
            full((1, 3 * H + Hh)),              # fused K/V/imp/Q biases
            full((1, Hh)),                      # importance layer-2 weight
            full((H, H)), full((1, H)),         # output projection
            full((msel, T)),                    # selection bias
            full((B, MR)),                      # rank -> message-major permutation
            full((B, T)),                       # attention validity bias
            full((num_heads * B, H)),           # head block mask
        ],
        out_specs=[
            full((T, H)),
            full((B, _SCORE_W)),
        ],
        out_shape=[
            jax.ShapeDtypeStruct((T, H), jnp.float32),
            jax.ShapeDtypeStruct((B, _SCORE_W), jnp.float32),
        ],
        compiler_params=pltpu.CompilerParams(
            dimension_semantics=("arbitrary",)),
    )(x, w_kvi, b_kvi, params["wi2"], params["wo"], params["bo"],
      jnp.asarray(sel_bias), jnp.asarray(perm), jnp.asarray(vbias),
      jnp.asarray(head_blk))
    return updated, scores_pad[:, :kt]


# --------------------------- pure-JAX reference ----------------------------
def _select_tokens_ref(importance, boundaries_np, top_k_ratio, T):
    ar = jnp.arange(T)
    sel_list, msg_ids = [], []
    for m in range(boundaries_np.shape[0]):
        s, e = int(boundaries_np[m, 0]), int(boundaries_np[m, 1])
        n = e - s
        if n <= 0:
            continue
        k = min(max(1, int(n * top_k_ratio)), n)
        mask = (ar >= s) & (ar < e)
        masked = jnp.where(mask, importance, -jnp.inf)
        _, idx = lax.top_k(masked, k)
        sel_list.append(idx)
        msg_ids.extend([m] * k)
    return sel_list, np.asarray(msg_ids, np.int64)


def pure_jax_reference(x, boundaries_np, batch_indices_np, params,
                       *, num_heads=NUM_HEADS, top_k_ratio=TOP_K_RATIO,
                       temperature=TEMPERATURE):
    T, H = x.shape
    hd = H // num_heads
    hp = lax.Precision.HIGHEST
    h1 = jnp.maximum(jnp.dot(x, params["wi1"], precision=hp) + params["bi1"], 0.0)
    imp = jnp.sum(h1 * params["wi2"], axis=-1) + params["bi2"][0, 0]

    sel_list, msg_ids = _select_tokens_ref(imp, boundaries_np, top_k_ratio, T)
    selected = jnp.concatenate(sel_list).astype(jnp.int32)
    B = int(selected.shape[0])

    tok_msg = np.zeros((T,), np.int64)
    for m in range(boundaries_np.shape[0]):
        s, e = int(boundaries_np[m, 0]), int(boundaries_np[m, 1])
        tok_msg[s:e] = m

    q = (jnp.dot(x[selected], params["wq"], precision=hp) + params["bq"]).reshape(B, num_heads, hd)
    k = (jnp.dot(x, params["wk"], precision=hp) + params["bk"]).reshape(T, num_heads, hd)
    v = (jnp.dot(x, params["wv"], precision=hp) + params["bv"]).reshape(T, num_heads, hd)

    scores = jnp.einsum("bhd,thd->bht", q, k, precision=hp) / math.sqrt(hd) / temperature
    diff = msg_ids[:, None] != tok_msg[None, :]
    if batch_indices_np is not None:
        bi = np.asarray(batch_indices_np)
        same_b = bi[msg_ids][:, None] == bi[tok_msg][None, :]
        valid = diff & same_b
    else:
        valid = diff
    scores = jnp.where(jnp.asarray(valid)[:, None, :], scores, -jnp.inf)

    kt = min(10, T)
    topv, topi = lax.top_k(scores, kt)
    w = jax.nn.softmax(topv, axis=-1)
    gathered = v[topi, jnp.arange(num_heads)[None, :, None], :]       # [B, nh, kt, hd]
    attended = jnp.sum(w[..., None] * gathered, axis=2).reshape(B, H)
    updates = jnp.dot(attended, params["wo"], precision=hp) + params["bo"]
    updated = x.at[selected].add(updates)
    avg = jnp.mean(topv, axis=1)
    return updated, avg


# --------------------------------- main ------------------------------------
def init_params(key, H):
    Hh = H // 2
    ks = jax.random.split(key, 12)
    w = lambda k, s: 0.1 * jax.random.normal(k, s, jnp.float32)
    return dict(
        wq=w(ks[0], (H, H)),   bq=w(ks[1], (1, H)),
        wk=w(ks[2], (H, H)),   bk=w(ks[3], (1, H)),
        wv=w(ks[4], (H, H)),   bv=w(ks[5], (1, H)),
        wi1=w(ks[6], (H, Hh)), bi1=w(ks[7], (1, Hh)),
        wi2=w(ks[8], (1, Hh)), bi2=w(ks[9], (1, 1)),
        wo=w(ks[10], (H, H)),  bo=w(ks[11], (1, H)),
    )


if __name__ == "__main__":
    key = jax.random.PRNGKey(0)
    kp, kx = jax.random.split(key)
    params = init_params(kp, HIDDEN_DIM)

    x = jax.random.normal(kx, (NUM_TOKENS, HIDDEN_DIM), jnp.float32)
    message_boundaries = np.array([[0, 16], [16, 32], [32, 48], [48, 64]], np.int32)
    batch_indices = np.array([0, 0, 1, 1], np.int32)

    updated, avg_scores = fast_cross_message_token_attention(
        x, message_boundaries, batch_indices, params)
    jax.block_until_ready((updated, avg_scores))

    ref_updated, ref_avg = pure_jax_reference(
        x, message_boundaries, batch_indices, params)
    ref_updated, ref_avg = np.asarray(ref_updated), np.asarray(ref_avg)

    assert np.allclose(np.asarray(updated), ref_updated, atol=2e-3, rtol=2e-3), \
        "updated_features mismatch"
    assert np.allclose(np.asarray(avg_scores), ref_avg, atol=2e-3, rtol=2e-3), \
        "attention_scores mismatch"

    print("KERNEL_OK")
</pallas_src>

<mosaic_0001>
module attributes {stable_mosaic.version = 11 : i64} {
  func.func @kernel(%arg0: i32, %arg1: memref<64x32xf32, #tpu.memory_space<vmem>>, %arg2: memref<32x112xf32, #tpu.memory_space<vmem>>, %arg3: memref<1x112xf32, #tpu.memory_space<vmem>>, %arg4: memref<1x16xf32, #tpu.memory_space<vmem>>, %arg5: memref<32x32xf32, #tpu.memory_space<vmem>>, %arg6: memref<1x32xf32, #tpu.memory_space<vmem>>, %arg7: memref<4x64xf32, #tpu.memory_space<vmem>>, %arg8: memref<16x16xf32, #tpu.memory_space<vmem>>, %arg9: memref<16x64xf32, #tpu.memory_space<vmem>>, %arg10: memref<64x32xf32, #tpu.memory_space<vmem>>, %arg11: memref<64x32xf32, #tpu.memory_space<vmem>>, %arg12: memref<16x128xf32, #tpu.memory_space<vmem>>) attributes {dimension_semantics = [#tpu.dimension_semantics<arbitrary>], iteration_bounds = array<i64: 1>, scalar_prefetch = 0 : i64, scratch_operands = 0 : i64, tpu.core_type = #tpu.core_type<tc>, window_params = [{pipeline_mode = #tpu.pipeline_mode<synchronous>, transform_indices = @transform_0, window_bounds = array<i64: 64, 32>}, {pipeline_mode = #tpu.pipeline_mode<synchronous>, transform_indices = @transform_1, window_bounds = array<i64: 32, 112>}, {pipeline_mode = #tpu.pipeline_mode<synchronous>, transform_indices = @transform_2, window_bounds = array<i64: 1, 112>}, {pipeline_mode = #tpu.pipeline_mode<synchronous>, transform_indices = @transform_3, window_bounds = array<i64: 1, 16>}, {pipeline_mode = #tpu.pipeline_mode<synchronous>, transform_indices = @transform_4, window_bounds = array<i64: 32, 32>}, {pipeline_mode = #tpu.pipeline_mode<synchronous>, transform_indices = @transform_5, window_bounds = array<i64: 1, 32>}, {pipeline_mode = #tpu.pipeline_mode<synchronous>, transform_indices = @transform_6, window_bounds = array<i64: 4, 64>}, {pipeline_mode = #tpu.pipeline_mode<synchronous>, transform_indices = @transform_7, window_bounds = array<i64: 16, 16>}, {pipeline_mode = #tpu.pipeline_mode<synchronous>, transform_indices = @transform_8, window_bounds = array<i64: 16, 64>}, {pipeline_mode = #tpu.pipeline_mode<synchronous>, transform_indices = @transform_9, window_bounds = array<i64: 64, 32>}, {pipeline_mode = #tpu.pipeline_mode<synchronous>, transform_indices = @transform_10, window_bounds = array<i64: 64, 32>}, {pipeline_mode = #tpu.pipeline_mode<synchronous>, transform_indices = @transform_11, window_bounds = array<i64: 16, 128>}]} {
    %c0 = arith.constant 0 : index
    %c0_0 = arith.constant 0 : index
    %0 = vector.load %arg1[%c0, %c0_0] : memref<64x32xf32, #tpu.memory_space<vmem>>, vector<64x32xf32>
    %c0_1 = arith.constant 0 : index
    %c0_2 = arith.constant 0 : index
    %1 = vector.load %arg2[%c0_1, %c0_2] : memref<32x112xf32, #tpu.memory_space<vmem>>, vector<32x112xf32>
    %cst = arith.constant dense<0.000000e+00> : vector<64x112xf32>
    %2 = tpu.matmul %0, %1, %cst {dimension_numbers = #tpu.dot_dimension_numbers<[1], [0], [0], [1], [0, 0, 1, 1], [], []>} : vector<64x32xf32>, vector<32x112xf32>, vector<64x112xf32> -> vector<64x112xf32>
    %c0_3 = arith.constant 0 : index
    %c0_4 = arith.constant 0 : index
    %3 = vector.load %arg3[%c0_3, %c0_4] : memref<1x112xf32, #tpu.memory_space<vmem>>, vector<1x112xf32>
    %4 = vector.broadcast %3 : vector<1x112xf32> to vector<64x112xf32>
    %5 = arith.addf %2, %4 : vector<64x112xf32>
    %6 = vector.extract_strided_slice %5 {offsets = [0, 0], sizes = [64, 32], strides = [1, 1]} : vector<64x112xf32> to vector<64x32xf32>
    %7 = vector.extract_strided_slice %5 {offsets = [0, 32], sizes = [64, 32], strides = [1, 1]} : vector<64x112xf32> to vector<64x32xf32>
    %8 = vector.extract_strided_slice %5 {offsets = [0, 64], sizes = [64, 16], strides = [1, 1]} : vector<64x112xf32> to vector<64x16xf32>
    %cst_5 = arith.constant 0.000000e+00 : f32
    %9 = vector.broadcast %cst_5 : f32 to vector<64x16xf32>
    %10 = arith.maximumf %8, %9 : vector<64x16xf32>
    %11 = vector.extract_strided_slice %5 {offsets = [0, 80], sizes = [64, 32], strides = [1, 1]} : vector<64x112xf32> to vector<64x32xf32>
    %c0_6 = arith.constant 0 : index
    %c0_7 = arith.constant 0 : index
    %12 = vector.load %arg4[%c0_6, %c0_7] : memref<1x16xf32, #tpu.memory_space<vmem>>, vector<1x16xf32>
    %cst_8 = arith.constant dense<0.000000e+00> : vector<1x64xf32>
    %13 = tpu.matmul %12, %10, %cst_8 {dimension_numbers = #tpu.dot_dimension_numbers<[1], [1], [0], [0], [0, 0, 1, 0], [], []>} : vector<1x16xf32>, vector<64x16xf32>, vector<1x64xf32> -> vector<1x64xf32>
    %14 = tpu.iota {dimensions = array<i32: 1>} : vector<4x64xi32>
    %c0_9 = arith.constant 0 : index
    %c0_10 = arith.constant 0 : index
    %15 = vector.load %arg7[%c0_9, %c0_10] : memref<4x64xf32, #tpu.memory_space<vmem>>, vector<4x64xf32>
    %16 = vector.broadcast %13 : vector<1x64xf32> to vector<4x64xf32>
    %17 = arith.addf %16, %15 : vector<4x64xf32>
    %18 = tpu.bitcast %17 : vector<4x64xf32> -> vector<4x64xi32>
    %c0_i32 = arith.constant 0 : i32
    %19 = vector.broadcast %c0_i32 : i32 to vector<4x64xi32>
    %20 = arith.cmpi slt, %18, %19 : vector<4x64xi32>
    %c2147483647_i32 = arith.constant 2147483647 : i32
    %21 = vector.broadcast %c2147483647_i32 : i32 to vector<4x64xi32>
    %22 = arith.xori %18, %21 : vector<4x64xi32>
    %23 = arith.select %20, %22, %18 : vector<4x64xi1>, vector<4x64xi32>
    %c63_i32 = arith.constant 63 : i32
    %24 = vector.broadcast %c63_i32 : i32 to vector<4x64xi32>
    %25 = arith.subi %24, %14 : vector<4x64xi32>
    %c6_i32 = arith.constant 6 : i32
    %26 = vector.broadcast %c6_i32 : i32 to vector<4x64xi32>
    %27 = arith.shrsi %23, %26 : vector<4x64xi32>
    %c64_i32 = arith.constant 64 : i32
    %28 = vector.broadcast %c64_i32 : i32 to vector<4x64xi32>
    %29 = arith.muli %27, %28 : vector<4x64xi32>
    %30 = arith.addi %29, %25 : vector<4x64xi32>
    %c2147483584_i32 = arith.constant 2147483584 : i32
    %31 = vector.broadcast %c2147483584_i32 : i32 to vector<4x64xi32>
    %32 = arith.subi %25, %31 : vector<4x64xi32>
    %cst_11 = arith.constant dense<-2147483648> : vector<4xi32>
    %33 = vector.multi_reduction <maxsi>, %30, %cst_11 [1] : vector<4x64xi32> to vector<4xi32>
    %34 = vector.shape_cast %33 : vector<4xi32> to vector<4x1xi32>
    %35 = vector.broadcast %34 : vector<4x1xi32> to vector<4x64xi32>
    %36 = arith.cmpi eq, %30, %35 : vector<4x64xi32>
    %37 = arith.extui %36 : vector<4x64xi1> to vector<4x64xi32>
    %38 = arith.sitofp %37 : vector<4x64xi32> to vector<4x64xf32>
    %39 = arith.select %36, %32, %30 : vector<4x64xi1>, vector<4x64xi32>
    %cst_12 = arith.constant dense<-2147483648> : vector<4xi32>
    %40 = vector.multi_reduction <maxsi>, %39, %cst_12 [1] : vector<4x64xi32> to vector<4xi32>
    %41 = vector.shape_cast %40 : vector<4xi32> to vector<4x1xi32>
    %42 = vector.broadcast %41 : vector<4x1xi32> to vector<4x64xi32>
    %43 = arith.cmpi eq, %39, %42 : vector<4x64xi32>
    %44 = arith.extui %43 : vector<4x64xi1> to vector<4x64xi32>
    %45 = arith.sitofp %44 : vector<4x64xi32> to vector<4x64xf32>
    %46 = arith.select %43, %32, %39 : vector<4x64xi1>, vector<4x64xi32>
    %cst_13 = arith.constant dense<-2147483648> : vector<4xi32>
    %47 = vector.multi_reduction <maxsi>, %46, %cst_13 [1] : vector<4x64xi32> to vector<4xi32>
    %48 = vector.shape_cast %47 : vector<4xi32> to vector<4x1xi32>
    %49 = vector.broadcast %48 : vector<4x1xi32> to vector<4x64xi32>
    %50 = arith.cmpi eq, %46, %49 : vector<4x64xi32>
    %51 = arith.extui %50 : vector<4x64xi1> to vector<4x64xi32>
    %52 = arith.sitofp %51 : vector<4x64xi32> to vector<4x64xf32>
    %53 = arith.select %50, %32, %46 : vector<4x64xi1>, vector<4x64xi32>
    %cst_14 = arith.constant dense<-2147483648> : vector<4xi32>
    %54 = vector.multi_reduction <maxsi>, %53, %cst_14 [1] : vector<4x64xi32> to vector<4xi32>
    %55 = vector.shape_cast %54 : vector<4xi32> to vector<4x1xi32>
    %56 = vector.broadcast %55 : vector<4x1xi32> to vector<4x64xi32>
    %57 = arith.cmpi eq, %53, %56 : vector<4x64xi32>
    %58 = arith.extui %57 : vector<4x64xi1> to vector<4x64xi32>
    %59 = arith.sitofp %58 : vector<4x64xi32> to vector<4x64xf32>
    %60 = tpu.concatenate %38, %45, %52, %59 in 0 : vector<4x64xf32>, vector<4x64xf32>, vector<4x64xf32>, vector<4x64xf32> -> vector<16x64xf32>
    %c0_15 = arith.constant 0 : index
    %c0_16 = arith.constant 0 : index
    %61 = vector.load %arg8[%c0_15, %c0_16] : memref<16x16xf32, #tpu.memory_space<vmem>>, vector<16x16xf32>
    %cst_17 = arith.constant dense<0.000000e+00> : vector<16x64xf32>
    %62 = tpu.matmul %61, %60, %cst_17 {dimension_numbers = #tpu.dot_dimension_numbers<[1], [0], [0], [1], [0, 0, 1, 1], [], []>} : vector<16x16xf32>, vector<16x64xf32>, vector<16x64xf32> -> vector<16x64xf32>
    %cst_18 = arith.constant dense<0.000000e+00> : vector<16x32xf32>
    %63 = tpu.matmul %62, %11, %cst_18 {dimension_numbers = #tpu.dot_dimension_numbers<[1], [0], [0], [1], [0, 0, 1, 1], [], []>} : vector<16x64xf32>, vector<64x32xf32>, vector<16x32xf32> -> vector<16x32xf32>
    %c0_19 = arith.constant 0 : index
    %c0_20 = arith.constant 0 : index
    %64 = vector.load %arg10[%c0_19, %c0_20] : memref<64x32xf32, #tpu.memory_space<vmem>>, vector<64x32xf32>
    %65 = tpu.concatenate %63, %63, %63, %63 in 0 : vector<16x32xf32>, vector<16x32xf32>, vector<16x32xf32>, vector<16x32xf32> -> vector<64x32xf32>
    %66 = arith.mulf %65, %64 : vector<64x32xf32>
    %cst_21 = arith.constant dense<0.000000e+00> : vector<64x64xf32>
    %67 = tpu.matmul %66, %6, %cst_21 {dimension_numbers = #tpu.dot_dimension_numbers<[1], [1], [0], [0], [0, 0, 1, 0], [], []>} : vector<64x32xf32>, vector<64x32xf32>, vector<64x64xf32> -> vector<64x64xf32>
    %cst_22 = arith.constant 0.353553385 : f32
    %68 = vector.broadcast %cst_22 : f32 to vector<64x64xf32>
    %69 = arith.mulf %67, %68 : vector<64x64xf32>
    %c0_23 = arith.constant 0 : index
    %c0_24 = arith.constant 0 : index
    %70 = vector.load %arg9[%c0_23, %c0_24] : memref<16x64xf32, #tpu.memory_space<vmem>>, vector<16x64xf32>
    %71 = tpu.concatenate %70, %70, %70, %70 in 0 : vector<16x64xf32>, vector<16x64xf32>, vector<16x64xf32>, vector<16x64xf32> -> vector<64x64xf32>
    %72 = arith.addf %69, %71 : vector<64x64xf32>
    %73 = tpu.iota {dimensions = array<i32: 1>} : vector<64x64xi32>
    %74 = tpu.bitcast %72 : vector<64x64xf32> -> vector<64x64xi32>
    %c0_i32_25 = arith.constant 0 : i32
    %75 = vector.broadcast %c0_i32_25 : i32 to vector<64x64xi32>
    %76 = arith.cmpi slt, %74, %75 : vector<64x64xi32>
    %c2147483647_i32_26 = arith.constant 2147483647 : i32
    %77 = vector.broadcast %c2147483647_i32_26 : i32 to vector<64x64xi32>
    %78 = arith.xori %74, %77 : vector<64x64xi32>
    %79 = arith.select %76, %78, %74 : vector<64x64xi1>, vector<64x64xi32>
    %c63_i32_27 = arith.constant 63 : i32
    %80 = vector.broadcast %c63_i32_27 : i32 to vector<64x64xi32>
    %81 = arith.subi %80, %73 : vector<64x64xi32>
    %c6_i32_28 = arith.constant 6 : i32
    %82 = vector.broadcast %c6_i32_28 : i32 to vector<64x64xi32>
    %83 = arith.shrsi %79, %82 : vector<64x64xi32>
    %c64_i32_29 = arith.constant 64 : i32
    %84 = vector.broadcast %c64_i32_29 : i32 to vector<64x64xi32>
    %85 = arith.muli %83, %84 : vector<64x64xi32>
    %86 = arith.addi %85, %81 : vector<64x64xi32>
    %c2147483584_i32_30 = arith.constant 2147483584 : i32
    %87 = vector.broadcast %c2147483584_i32_30 : i32 to vector<64x64xi32>
    %88 = arith.subi %81, %87 : vector<64x64xi32>
    %false = arith.constant false
    %89 = vector.broadcast %false : i1 to vector<64x64xi1>
    %cst_31 = arith.constant dense<-2147483648> : vector<64xi32>
    %90 = vector.multi_reduction <maxsi>, %86, %cst_31 [1] : vector<64x64xi32> to vector<64xi32>
    %91 = vector.shape_cast %90 : vector<64xi32> to vector<64x1xi32>
    %92 = vector.broadcast %91 : vector<64x1xi32> to vector<64x64xi32>
    %93 = arith.cmpi eq, %86, %92 : vector<64x64xi32>
    %94 = arith.ori %89, %93 : vector<64x64xi1>
    %c6_i32_32 = arith.constant 6 : i32
    %95 = vector.broadcast %c6_i32_32 : i32 to vector<64x1xi32>
    %96 = arith.shrsi %91, %95 : vector<64x1xi32>
    %c64_i32_33 = arith.constant 64 : i32
    %97 = vector.broadcast %c64_i32_33 : i32 to vector<64x1xi32>
    %98 = arith.muli %96, %97 : vector<64x1xi32>
    %c0_i32_34 = arith.constant 0 : i32
    %99 = vector.broadcast %c0_i32_34 : i32 to vector<64x1xi32>
    %100 = arith.cmpi slt, %98, %99 : vector<64x1xi32>
    %c2147483647_i32_35 = arith.constant 2147483647 : i32
    %101 = vector.broadcast %c2147483647_i32_35 : i32 to vector<64x1xi32>
    %102 = arith.xori %98, %101 : vector<64x1xi32>
    %103 = arith.select %100, %102, %98 : vector<64x1xi1>, vector<64x1xi32>
    %104 = tpu.bitcast %103 : vector<64x1xi32> -> vector<64x1xf32>
    %105 = arith.select %93, %88, %86 : vector<64x64xi1>, vector<64x64xi32>
    %cst_36 = arith.constant dense<-2147483648> : vector<64xi32>
    %106 = vector.multi_reduction <maxsi>, %105, %cst_36 [1] : vector<64x64xi32> to vector<64xi32>
    %107 = vector.shape_cast %106 : vector<64xi32> to vector<64x1xi32>
    %108 = vector.broadcast %107 : vector<64x1xi32> to vector<64x64xi32>
    %109 = arith.cmpi eq, %105, %108 : vector<64x64xi32>
    %110 = arith.ori %94, %109 : vector<64x64xi1>
    %c6_i32_37 = arith.constant 6 : i32
    %111 = vector.broadcast %c6_i32_37 : i32 to vector<64x1xi32>
    %112 = arith.shrsi %107, %111 : vector<64x1xi32>
    %c64_i32_38 = arith.constant 64 : i32
    %113 = vector.broadcast %c64_i32_38 : i32 to vector<64x1xi32>
    %114 = arith.muli %112, %113 : vector<64x1xi32>
    %c0_i32_39 = arith.constant 0 : i32
    %115 = vector.broadcast %c0_i32_39 : i32 to vector<64x1xi32>
    %116 = arith.cmpi slt, %114, %115 : vector<64x1xi32>
    %c2147483647_i32_40 = arith.constant 2147483647 : i32
    %117 = vector.broadcast %c2147483647_i32_40 : i32 to vector<64x1xi32>
    %118 = arith.xori %114, %117 : vector<64x1xi32>
    %119 = arith.select %116, %118, %114 : vector<64x1xi1>, vector<64x1xi32>
    %120 = tpu.bitcast %119 : vector<64x1xi32> -> vector<64x1xf32>
    %121 = arith.select %109, %88, %105 : vector<64x64xi1>, vector<64x64xi32>
    %cst_41 = arith.constant dense<-2147483648> : vector<64xi32>
    %122 = vector.multi_reduction <maxsi>, %121, %cst_41 [1] : vector<64x64xi32> to vector<64xi32>
    %123 = vector.shape_cast %122 : vector<64xi32> to vector<64x1xi32>
    %124 = vector.broadcast %123 : vector<64x1xi32> to vector<64x64xi32>
    %125 = arith.cmpi eq, %121, %124 : vector<64x64xi32>
    %126 = arith.ori %110, %125 : vector<64x64xi1>
    %c6_i32_42 = arith.constant 6 : i32
    %127 = vector.broadcast %c6_i32_42 : i32 to vector<64x1xi32>
    %128 = arith.shrsi %123, %127 : vector<64x1xi32>
    %c64_i32_43 = arith.constant 64 : i32
    %129 = vector.broadcast %c64_i32_43 : i32 to vector<64x1xi32>
    %130 = arith.muli %128, %129 : vector<64x1xi32>
    %c0_i32_44 = arith.constant 0 : i32
    %131 = vector.broadcast %c0_i32_44 : i32 to vector<64x1xi32>
    %132 = arith.cmpi slt, %130, %131 : vector<64x1xi32>
    %c2147483647_i32_45 = arith.constant 2147483647 : i32
    %133 = vector.broadcast %c2147483647_i32_45 : i32 to vector<64x1xi32>
    %134 = arith.xori %130, %133 : vector<64x1xi32>
    %135 = arith.select %132, %134, %130 : vector<64x1xi1>, vector<64x1xi32>
    %136 = tpu.bitcast %135 : vector<64x1xi32> -> vector<64x1xf32>
    %137 = arith.select %125, %88, %121 : vector<64x64xi1>, vector<64x64xi32>
    %cst_46 = arith.constant dense<-2147483648> : vector<64xi32>
    %138 = vector.multi_reduction <maxsi>, %137, %cst_46 [1] : vector<64x64xi32> to vector<64xi32>
    %139 = vector.shape_cast %138 : vector<64xi32> to vector<64x1xi32>
    %140 = vector.broadcast %139 : vector<64x1xi32> to vector<64x64xi32>
    %141 = arith.cmpi eq, %137, %140 : vector<64x64xi32>
    %142 = arith.ori %126, %141 : vector<64x64xi1>
    %c6_i32_47 = arith.constant 6 : i32
    %143 = vector.broadcast %c6_i32_47 : i32 to vector<64x1xi32>
    %144 = arith.shrsi %139, %143 : vector<64x1xi32>
    %c64_i32_48 = arith.constant 64 : i32
    %145 = vector.broadcast %c64_i32_48 : i32 to vector<64x1xi32>
    %146 = arith.muli %144, %145 : vector<64x1xi32>
    %c0_i32_49 = arith.constant 0 : i32
    %147 = vector.broadcast %c0_i32_49 : i32 to vector<64x1xi32>
    %148 = arith.cmpi slt, %146, %147 : vector<64x1xi32>
    %c2147483647_i32_50 = arith.constant 2147483647 : i32
    %149 = vector.broadcast %c2147483647_i32_50 : i32 to vector<64x1xi32>
    %150 = arith.xori %146, %149 : vector<64x1xi32>
    %151 = arith.select %148, %150, %146 : vector<64x1xi1>, vector<64x1xi32>
    %152 = tpu.bitcast %151 : vector<64x1xi32> -> vector<64x1xf32>
    %153 = arith.select %141, %88, %137 : vector<64x64xi1>, vector<64x64xi32>
    %cst_51 = arith.constant dense<-2147483648> : vector<64xi32>
    %154 = vector.multi_reduction <maxsi>, %153, %cst_51 [1] : vector<64x64xi32> to vector<64xi32>
    %155 = vector.shape_cast %154 : vector<64xi32> to vector<64x1xi32>
    %156 = vector.broadcast %155 : vector<64x1xi32> to vector<64x64xi32>
    %157 = arith.cmpi eq, %153, %156 : vector<64x64xi32>
    %158 = arith.ori %142, %157 : vector<64x64xi1>
    %c6_i32_52 = arith.constant 6 : i32
    %159 = vector.broadcast %c6_i32_52 : i32 to vector<64x1xi32>
    %160 = arith.shrsi %155, %159 : vector<64x1xi32>
    %c64_i32_53 = arith.constant 64 : i32
    %161 = vector.broadcast %c64_i32_53 : i32 to vector<64x1xi32>
    %162 = arith.muli %160, %161 : vector<64x1xi32>
    %c0_i32_54 = arith.constant 0 : i32
    %163 = vector.broadcast %c0_i32_54 : i32 to vector<64x1xi32>
    %164 = arith.cmpi slt, %162, %163 : vector<64x1xi32>
    %c2147483647_i32_55 = arith.constant 2147483647 : i32
    %165 = vector.broadcast %c2147483647_i32_55 : i32 to vector<64x1xi32>
    %166 = arith.xori %162, %165 : vector<64x1xi32>
    %167 = arith.select %164, %166, %162 : vector<64x1xi1>, vector<64x1xi32>
    %168 = tpu.bitcast %167 : vector<64x1xi32> -> vector<64x1xf32>
    %169 = arith.select %157, %88, %153 : vector<64x64xi1>, vector<64x64xi32>
    %cst_56 = arith.constant dense<-2147483648> : vector<64xi32>
    %170 = vector.multi_reduction <maxsi>, %169, %cst_56 [1] : vector<64x64xi32> to vector<64xi32>
    %171 = vector.shape_cast %170 : vector<64xi32> to vector<64x1xi32>
    %172 = vector.broadcast %171 : vector<64x1xi32> to vector<64x64xi32>
    %173 = arith.cmpi eq, %169, %172 : vector<64x64xi32>
    %174 = arith.ori %158, %173 : vector<64x64xi1>
    %c6_i32_57 = arith.constant 6 : i32
    %175 = vector.broadcast %c6_i32_57 : i32 to vector<64x1xi32>
    %176 = arith.shrsi %171, %175 : vector<64x1xi32>
    %c64_i32_58 = arith.constant 64 : i32
    %177 = vector.broadcast %c64_i32_58 : i32 to vector<64x1xi32>
    %178 = arith.muli %176, %177 : vector<64x1xi32>
    %c0_i32_59 = arith.constant 0 : i32
    %179 = vector.broadcast %c0_i32_59 : i32 to vector<64x1xi32>
    %180 = arith.cmpi slt, %178, %179 : vector<64x1xi32>
    %c2147483647_i32_60 = arith.constant 2147483647 : i32
    %181 = vector.broadcast %c2147483647_i32_60 : i32 to vector<64x1xi32>
    %182 = arith.xori %178, %181 : vector<64x1xi32>
    %183 = arith.select %180, %182, %178 : vector<64x1xi1>, vector<64x1xi32>
    %184 = tpu.bitcast %183 : vector<64x1xi32> -> vector<64x1xf32>
    %185 = arith.select %173, %88, %169 : vector<64x64xi1>, vector<64x64xi32>
    %cst_61 = arith.constant dense<-2147483648> : vector<64xi32>
    %186 = vector.multi_reduction <maxsi>, %185, %cst_61 [1] : vector<64x64xi32> to vector<64xi32>
    %187 = vector.shape_cast %186 : vector<64xi32> to vector<64x1xi32>
    %188 = vector.broadcast %187 : vector<64x1xi32> to vector<64x64xi32>
    %189 = arith.cmpi eq, %185, %188 : vector<64x64xi32>
    %190 = arith.ori %174, %189 : vector<64x64xi1>
    %c6_i32_62 = arith.constant 6 : i32
    %191 = vector.broadcast %c6_i32_62 : i32 to vector<64x1xi32>
    %192 = arith.shrsi %187, %191 : vector<64x1xi32>
    %c64_i32_63 = arith.constant 64 : i32
    %193 = vector.broadcast %c64_i32_63 : i32 to vector<64x1xi32>
    %194 = arith.muli %192, %193 : vector<64x1xi32>
    %c0_i32_64 = arith.constant 0 : i32
    %195 = vector.broadcast %c0_i32_64 : i32 to vector<64x1xi32>
    %196 = arith.cmpi slt, %194, %195 : vector<64x1xi32>
    %c2147483647_i32_65 = arith.constant 2147483647 : i32
    %197 = vector.broadcast %c2147483647_i32_65 : i32 to vector<64x1xi32>
    %198 = arith.xori %194, %197 : vector<64x1xi32>
    %199 = arith.select %196, %198, %194 : vector<64x1xi1>, vector<64x1xi32>
    %200 = tpu.bitcast %199 : vector<64x1xi32> -> vector<64x1xf32>
    %201 = arith.select %189, %88, %185 : vector<64x64xi1>, vector<64x64xi32>
    %cst_66 = arith.constant dense<-2147483648> : vector<64xi32>
    %202 = vector.multi_reduction <maxsi>, %201, %cst_66 [1] : vector<64x64xi32> to vector<64xi32>
    %203 = vector.shape_cast %202 : vector<64xi32> to vector<64x1xi32>
    %204 = vector.broadcast %203 : vector<64x1xi32> to vector<64x64xi32>
    %205 = arith.cmpi eq, %201, %204 : vector<64x64xi32>
    %206 = arith.ori %190, %205 : vector<64x64xi1>
    %c6_i32_67 = arith.constant 6 : i32
    %207 = vector.broadcast %c6_i32_67 : i32 to vector<64x1xi32>
    %208 = arith.shrsi %203, %207 : vector<64x1xi32>
    %c64_i32_68 = arith.constant 64 : i32
    %209 = vector.broadcast %c64_i32_68 : i32 to vector<64x1xi32>
    %210 = arith.muli %208, %209 : vector<64x1xi32>
    %c0_i32_69 = arith.constant 0 : i32
    %211 = vector.broadcast %c0_i32_69 : i32 to vector<64x1xi32>
    %212 = arith.cmpi slt, %210, %211 : vector<64x1xi32>
    %c2147483647_i32_70 = arith.constant 2147483647 : i32
    %213 = vector.broadcast %c2147483647_i32_70 : i32 to vector<64x1xi32>
    %214 = arith.xori %210, %213 : vector<64x1xi32>
    %215 = arith.select %212, %214, %210 : vector<64x1xi1>, vector<64x1xi32>
    %216 = tpu.bitcast %215 : vector<64x1xi32> -> vector<64x1xf32>
    %217 = arith.select %205, %88, %201 : vector<64x64xi1>, vector<64x64xi32>
    %cst_71 = arith.constant dense<-2147483648> : vector<64xi32>
    %218 = vector.multi_reduction <maxsi>, %217, %cst_71 [1] : vector<64x64xi32> to vector<64xi32>
    %219 = vector.shape_cast %218 : vector<64xi32> to vector<64x1xi32>
    %220 = vector.broadcast %219 : vector<64x1xi32> to vector<64x64xi32>
    %221 = arith.cmpi eq, %217, %220 : vector<64x64xi32>
    %222 = arith.ori %206, %221 : vector<64x64xi1>
    %c6_i32_72 = arith.constant 6 : i32
    %223 = vector.broadcast %c6_i32_72 : i32 to vector<64x1xi32>
    %224 = arith.shrsi %219, %223 : vector<64x1xi32>
    %c64_i32_73 = arith.constant 64 : i32
    %225 = vector.broadcast %c64_i32_73 : i32 to vector<64x1xi32>
    %226 = arith.muli %224, %225 : vector<64x1xi32>
    %c0_i32_74 = arith.constant 0 : i32
    %227 = vector.broadcast %c0_i32_74 : i32 to vector<64x1xi32>
    %228 = arith.cmpi slt, %226, %227 : vector<64x1xi32>
    %c2147483647_i32_75 = arith.constant 2147483647 : i32
    %229 = vector.broadcast %c2147483647_i32_75 : i32 to vector<64x1xi32>
    %230 = arith.xori %226, %229 : vector<64x1xi32>
    %231 = arith.select %228, %230, %226 : vector<64x1xi1>, vector<64x1xi32>
    %232 = tpu.bitcast %231 : vector<64x1xi32> -> vector<64x1xf32>
    %233 = arith.select %221, %88, %217 : vector<64x64xi1>, vector<64x64xi32>
    %cst_76 = arith.constant dense<-2147483648> : vector<64xi32>
    %234 = vector.multi_reduction <maxsi>, %233, %cst_76 [1] : vector<64x64xi32> to vector<64xi32>
    %235 = vector.shape_cast %234 : vector<64xi32> to vector<64x1xi32>
    %236 = vector.broadcast %235 : vector<64x1xi32> to vector<64x64xi32>
    %237 = arith.cmpi eq, %233, %236 : vector<64x64xi32>
    %238 = arith.ori %222, %237 : vector<64x64xi1>
    %c6_i32_77 = arith.constant 6 : i32
    %239 = vector.broadcast %c6_i32_77 : i32 to vector<64x1xi32>
    %240 = arith.shrsi %235, %239 : vector<64x1xi32>
    %c64_i32_78 = arith.constant 64 : i32
    %241 = vector.broadcast %c64_i32_78 : i32 to vector<64x1xi32>
    %242 = arith.muli %240, %241 : vector<64x1xi32>
    %c0_i32_79 = arith.constant 0 : i32
    %243 = vector.broadcast %c0_i32_79 : i32 to vector<64x1xi32>
    %244 = arith.cmpi slt, %242, %243 : vector<64x1xi32>
    %c2147483647_i32_80 = arith.constant 2147483647 : i32
    %245 = vector.broadcast %c2147483647_i32_80 : i32 to vector<64x1xi32>
    %246 = arith.xori %242, %245 : vector<64x1xi32>
    %247 = arith.select %244, %246, %242 : vector<64x1xi1>, vector<64x1xi32>
    %248 = tpu.bitcast %247 : vector<64x1xi32> -> vector<64x1xf32>
    %cst_81 = arith.constant 0xFF800000 : f32
    %249 = vector.broadcast %cst_81 : f32 to vector<64x64xf32>
    %250 = arith.select %238, %72, %249 : vector<64x64xi1>, vector<64x64xf32>
    %cst_82 = arith.constant dense<0xFF800000> : vector<64xf32>
    %251 = vector.multi_reduction <maximumf>, %250, %cst_82 [1] : vector<64x64xf32> to vector<64xf32>
    %252 = vector.shape_cast %251 : vector<64xf32> to vector<64x1xf32>
    %253 = vector.broadcast %252 : vector<64x1xf32> to vector<64x64xf32>
    %254 = arith.subf %250, %253 : vector<64x64xf32>
    %255 = math.exp %254 : vector<64x64xf32>
    %cst_83 = arith.constant 0.000000e+00 : f32
    %256 = vector.broadcast %cst_83 : f32 to vector<64x64xf32>
    %257 = arith.select %238, %255, %256 : vector<64x64xi1>, vector<64x64xf32>
    %cst_84 = arith.constant dense<0.000000e+00> : vector<64xf32>
    %258 = vector.multi_reduction <add>, %257, %cst_84 [1] : vector<64x64xf32> to vector<64xf32>
    %259 = vector.shape_cast %258 : vector<64xf32> to vector<64x1xf32>
    %260 = vector.broadcast %259 : vector<64x1xf32> to vector<64x64xf32>
    %261 = arith.divf %257, %260 : vector<64x64xf32>
    %cst_85 = arith.constant dense<0.000000e+00> : vector<64x32xf32>
    %262 = tpu.matmul %261, %7, %cst_85 {dimension_numbers = #tpu.dot_dimension_numbers<[1], [0], [0], [1], [0, 0, 1, 1], [], []>} : vector<64x64xf32>, vector<64x32xf32>, vector<64x32xf32> -> vector<64x32xf32>
    %263 = arith.mulf %262, %64 : vector<64x32xf32>
    %264 = vector.extract_strided_slice %263 {offsets = [0, 0], sizes = [16, 32], strides = [1, 1]} : vector<64x32xf32> to vector<16x32xf32>
    %265 = vector.extract_strided_slice %263 {offsets = [16, 0], sizes = [16, 32], strides = [1, 1]} : vector<64x32xf32> to vector<16x32xf32>
    %266 = arith.addf %264, %265 : vector<16x32xf32>
    %267 = vector.extract_strided_slice %263 {offsets = [32, 0], sizes = [16, 32], strides = [1, 1]} : vector<64x32xf32> to vector<16x32xf32>
    %268 = arith.addf %266, %267 : vector<16x32xf32>
    %269 = vector.extract_strided_slice %263 {offsets = [48, 0], sizes = [16, 32], strides = [1, 1]} : vector<64x32xf32> to vector<16x32xf32>
    %270 = arith.addf %268, %269 : vector<16x32xf32>
    %c0_86 = arith.constant 0 : index
    %c0_87 = arith.constant 0 : index
    %271 = vector.load %arg5[%c0_86, %c0_87] : memref<32x32xf32, #tpu.memory_space<vmem>>, vector<32x32xf32>
    %cst_88 = arith.constant dense<0.000000e+00> : vector<16x32xf32>
    %272 = tpu.matmul %270, %271, %cst_88 {dimension_numbers = #tpu.dot_dimension_numbers<[1], [0], [0], [1], [0, 0, 1, 1], [], []>} : vector<16x32xf32>, vector<32x32xf32>, vector<16x32xf32> -> vector<16x32xf32>
    %c0_89 = arith.constant 0 : index
    %c0_90 = arith.constant 0 : index
    %273 = vector.load %arg6[%c0_89, %c0_90] : memref<1x32xf32, #tpu.memory_space<vmem>>, vector<1x32xf32>
    %274 = vector.broadcast %273 : vector<1x32xf32> to vector<16x32xf32>
    %275 = arith.addf %272, %274 : vector<16x32xf32>
    %cst_91 = arith.constant dense<0.000000e+00> : vector<64x32xf32>
    %276 = tpu.matmul %62, %275, %cst_91 {dimension_numbers = #tpu.dot_dimension_numbers<[0], [0], [1], [1], [0, 1, 1, 1], [], []>} : vector<16x64xf32>, vector<16x32xf32>, vector<64x32xf32> -> vector<64x32xf32>
    %277 = arith.addf %0, %276 : vector<64x32xf32>
    %c0_92 = arith.constant 0 : index
    %c0_93 = arith.constant 0 : index
    %278 = vector.load %arg11[%c0_92, %c0_93] : memref<64x32xf32, #tpu.memory_space<vmem>>, vector<64x32xf32>
    tpu.vector_store %arg11[%c0_92, %c0_93], %277 {strides = array<i32>} : memref<64x32xf32, #tpu.memory_space<vmem>>, vector<64x32xf32>,
    %279 = tpu.concatenate %104, %120, %136, %152, %168, %184, %200, %216, %232, %248 in 1 : vector<64x1xf32>, vector<64x1xf32>, vector<64x1xf32>, vector<64x1xf32>, vector<64x1xf32>, vector<64x1xf32>, vector<64x1xf32>, vector<64x1xf32>, vector<64x1xf32>, vector<64x1xf32> -> vector<64x10xf32>
    %280 = vector.extract_strided_slice %279 {offsets = [0, 0], sizes = [16, 10], strides = [1, 1]} : vector<64x10xf32> to vector<16x10xf32>
    %281 = vector.extract_strided_slice %279 {offsets = [16, 0], sizes = [16, 10], strides = [1, 1]} : vector<64x10xf32> to vector<16x10xf32>
    %282 = arith.addf %280, %281 : vector<16x10xf32>
    %283 = vector.extract_strided_slice %279 {offsets = [32, 0], sizes = [16, 10], strides = [1, 1]} : vector<64x10xf32> to vector<16x10xf32>
    %284 = arith.addf %282, %283 : vector<16x10xf32>
    %285 = vector.extract_strided_slice %279 {offsets = [48, 0], sizes = [16, 10], strides = [1, 1]} : vector<64x10xf32> to vector<16x10xf32>
    %286 = arith.addf %284, %285 : vector<16x10xf32>
    %cst_94 = arith.constant 2.500000e-01 : f32
    %287 = vector.broadcast %cst_94 : f32 to vector<16x10xf32>
    %288 = arith.mulf %286, %287 : vector<16x10xf32>
    %cst_95 = arith.constant 0.000000e+00 : f32
    %289 = vector.broadcast %cst_95 : f32 to vector<16x118xf32>
    %290 = tpu.concatenate %288, %289 in 1 : vector<16x10xf32>, vector<16x118xf32> -> vector<16x128xf32>
    %c0_96 = arith.constant 0 : index
    %c0_97 = arith.constant 0 : index
    %291 = vector.load %arg12[%c0_96, %c0_97] : memref<16x128xf32, #tpu.memory_space<vmem>>, vector<16x128xf32>
    tpu.vector_store %arg12[%c0_96, %c0_97], %290 {strides = array<i32>} : memref<16x128xf32, #tpu.memory_space<vmem>>, vector<16x128xf32>,
    return
  }
  func.func @transform_0(%arg0: i32) -> (i32, i32) {
    %c0_i32 = arith.constant 0 : i32
    %c0_i32_0 = arith.constant 0 : i32
    %c0_i32_1 = arith.constant 0 : i32
    return %c0_i32, %c0_i32_0 : i32, i32
  }
  func.func @transform_1(%arg0: i32) -> (i32, i32) {
    %c0_i32 = arith.constant 0 : i32
    %c0_i32_0 = arith.constant 0 : i32
    %c0_i32_1 = arith.constant 0 : i32
    return %c0_i32, %c0_i32_0 : i32, i32
  }
  func.func @transform_2(%arg0: i32) -> (i32, i32) {
    %c0_i32 = arith.constant 0 : i32
    %c0_i32_0 = arith.constant 0 : i32
    %c0_i32_1 = arith.constant 0 : i32
    return %c0_i32, %c0_i32_0 : i32, i32
  }
  func.func @transform_3(%arg0: i32) -> (i32, i32) {
    %c0_i32 = arith.constant 0 : i32
    %c0_i32_0 = arith.constant 0 : i32
    %c0_i32_1 = arith.constant 0 : i32
    return %c0_i32, %c0_i32_0 : i32, i32
  }
  func.func @transform_4(%arg0: i32) -> (i32, i32) {
    %c0_i32 = arith.constant 0 : i32
    %c0_i32_0 = arith.constant 0 : i32
    %c0_i32_1 = arith.constant 0 : i32
    return %c0_i32, %c0_i32_0 : i32, i32
  }
  func.func @transform_5(%arg0: i32) -> (i32, i32) {
    %c0_i32 = arith.constant 0 : i32
    %c0_i32_0 = arith.constant 0 : i32
    %c0_i32_1 = arith.constant 0 : i32
    return %c0_i32, %c0_i32_0 : i32, i32
  }
  func.func @transform_6(%arg0: i32) -> (i32, i32) {
    %c0_i32 = arith.constant 0 : i32
    %c0_i32_0 = arith.constant 0 : i32
    %c0_i32_1 = arith.constant 0 : i32
    return %c0_i32, %c0_i32_0 : i32, i32
  }
  func.func @transform_7(%arg0: i32) -> (i32, i32) {
    %c0_i32 = arith.constant 0 : i32
    %c0_i32_0 = arith.constant 0 : i32
    %c0_i32_1 = arith.constant 0 : i32
    return %c0_i32, %c0_i32_0 : i32, i32
  }
  func.func @transform_8(%arg0: i32) -> (i32, i32) {
    %c0_i32 = arith.constant 0 : i32
    %c0_i32_0 = arith.constant 0 : i32
    %c0_i32_1 = arith.constant 0 : i32
    return %c0_i32, %c0_i32_0 : i32, i32
  }
  func.func @transform_9(%arg0: i32) -> (i32, i32) {
    %c0_i32 = arith.constant 0 : i32
    %c0_i32_0 = arith.constant 0 : i32
    %c0_i32_1 = arith.constant 0 : i32
    return %c0_i32, %c0_i32_0 : i32, i32
  }
  func.func @transform_10(%arg0: i32) -> (i32, i32) {
    %c0_i32 = arith.constant 0 : i32
    %c0_i32_0 = arith.constant 0 : i32
    %c0_i32_1 = arith.constant 0 : i32
    return %c0_i32, %c0_i32_0 : i32, i32
  }
  func.func @transform_11(%arg0: i32) -> (i32, i32) {
    %c0_i32 = arith.constant 0 : i32
    %c0_i32_0 = arith.constant 0 : i32
    %c0_i32_1 = arith.constant 0 : i32
    return %c0_i32, %c0_i32_0 : i32, i32
  }
}

</mosaic_0001>

<bundles_post_ra>
// kernel: tpu_custom_call.1
= control target key start
LH: loop header
LB: loop body
LE: loop exit
PB: predicated region body
PF: predicated region fallthrough
CT: control target
= control target key end

     0   :  { %vm6471_vm0 = vcmask 261120   ;;  %s6452_s0 = inlined_call_operand.vmem [shape: f32[64,32], index: 0, kind: input, shape index: {}]   ;;  %s6453_s1 = inlined_call_operand.vmem [shape: f32[32,112], index: 1, kind: input, shape index: {}]   ;;  %s6454_s2 = inlined_call_operand.vmem [shape: f32[1,112], index: 2, kind: input, shape index: {}]   ;;  %s6455_s3 = inlined_call_operand.vmem [shape: f32[1,16], index: 3, kind: input, shape index: {}]   ;;  %s6456_s4 = inlined_call_operand.vmem [shape: f32[32,32], index: 4, kind: input, shape index: {}]   ;;  %s6457_s5 = inlined_call_operand.vmem [shape: f32[1,32], index: 5, kind: input, shape index: {}]   ;;  %s6458_s6 = inlined_call_operand.vmem [shape: f32[4,64], index: 6, kind: input, shape index: {}]   ;;  %s6459_s7 = inlined_call_operand.vmem [shape: f32[16,16], index: 7, kind: input, shape index: {}]   ;;  %s6460_s8 = inlined_call_operand.vmem [shape: f32[16,64], index: 8, kind: input, shape index: {}]   ;;  %s6461_s9 = inlined_call_operand.vmem [shape: f32[64,32], index: 9, kind: input, shape index: {}]   ;;  %s6462_s10 = inlined_call_operand.vmem [shape: f32[64,32], index: 10, kind: output, shape index: {0}]   ;;  %s6463_s11 = inlined_call_operand.hbm [shape: f32[16,128], index: 11, kind: output, shape index: {1}]  }
   0x1   :  { %v46_v0 = vld [vmem:[%s6453_s1] sm:$0xff]  ;;  %v47_v1 = vld [vmem:[%s6453_s1 + $0x8] sm:$0xff]  ;;  %v48_v2 = vld [vmem:[%s6453_s1 + $0x10] sm:$0xff] }
   0x2   :  { %v3695_v3 = vpack.c.bf16 %v47_v1, %v46_v0  ;;  %v49_v4 = vld [vmem:[%s6453_s1 + $0x18] sm:$0xff]  ;;  %v38_v5 = vld [vmem:[%s6452_s0] sm:$0xff] }
   0x3   :  { %v3699_v6 = vpack.c.bf16 %v49_v4, %v48_v2  ;;  %3555 = vmatprep.mubr.msk.f32.mxu0 %vm6471_vm0, %v38_v5 }
   0x4   :  { %3696 = vmatprep.subr.bf16.mxu0 %v3695_v3 }
   0x5   :  { %3698 = vmatpush3.bf16.msra.mxu0 %v3695_v3 }
   0x6   :  { %17 = vsyncpa [#allocation3], 0  ;;  %3700 = vmatprep.subr.bf16.mxu0 %v3699_v6  ;;  %v39_v7 = vld [vmem:[%s6452_s0 + $0x8] sm:$0xff]  ;;  %v40_v8 = vld [vmem:[%s6452_s0 + $0x10] sm:$0xff]  ;;  %v3932_v14 = vmov 0.0|0.0   ;;  %s3933_s23 = smov 64  }
   0x7   :  { %v41_v9 = vld [vmem:[%s6452_s0 + $0x18] sm:$0xff]  ;;  %v42_v10 = vld [vmem:[%s6452_s0 + $0x20] sm:$0xff]  ;;  %v43_v11 = vld [vmem:[%s6452_s0 + $0x28] sm:$0xff]  ;;  %3703 = vmatprep.subr.bf16.mxu1 %v3932_v14  ;;  %vm3934_vm1 = vmmov 0   ;;  %v3935_v52 = vmov 0.0   ;;  %vm6468_vm2 = vcmask 130048  }
   0x8   :  { %v44_v12 = vld [vmem:[%s6452_s0 + $0x30] sm:$0xff]  ;;  %v45_v13 = vld [vmem:[%s6452_s0 + $0x38] sm:$0xff]  ;;  %v3402_v15 = vld [vmem:[%s6454_s2] ss:$0 sm:$0xff]  ;;  %3583 = vmatprep.mubr.msk.f32.mxu1 %vm3934_vm1, %v3935_v52  ;;  %vm327_vm5 = vcmask 519168   ;;  %vm409_vm10 = vcmask 1043456  }
   0x9   :  { %3702 = vmatpush3.bf16.msra.mxu0 %v3699_v6  ;;  %vm4068_vm3 = vmpackc.low %vm6468_vm2, %vm6468_vm2  ;;  %v195_v6 = vld [vmem:[%s6455_s3] sm:$0x1]  ;;  %s3936_s3 = smov 48   ;;  %vm6499_vm1 = vcmask 523264  }
   0xa   :  { %vm4123_vm15 = vmpackc.low %vm6471_vm0, %vm6471_vm0 }
   0xc   :  { %3556 = vmatmul.mubr.msk.f32.vlgmr.msra.gmra.mrb[0].mxu0 %vm6471_vm0, %v39_v7  ;;  %v310_v7 = vlaneseq }
   0xd   :  { %3558 = vmatprep.mubr.msk.f32.mxu0 %vm6471_vm0, %v40_v8 }
   0xe   :  { %v314_v8 = vshrl.u32 %v310_v7, 7 }
  0x10   :  { %3559 = vmatmul.mubr.msk.f32.gmra.mrb[2].mxu0 %vm6471_vm0, %v41_v9  ;;  %v315_v9 = vsub.s32 0, %v314_v8 }
  0x11   :  { %3561 = vmatprep.mubr.msk.f32.mxu0 %vm6471_vm0, %v42_v10 }
  0x14   :  { %3562 = vmatmul.mubr.msk.f32.gmra.mrb[4].mxu0 %vm6471_vm0, %v43_v11  ;;  %v312_v11 = vld [vmem:[%s6458_s6] sm:$0xf] }
  0x15   :  { %3564 = vmatprep.mubr.msk.f32.mxu0 %vm6471_vm0, %v44_v12 }
  0x18   :  { %3565 = vmatmul.mubr.msk.f32.gmra.mrb[6].mxu0 %vm6471_vm0, %v45_v13 }
  0xdf   :  { %v3557_v16 = vpop.f32.mrb[0].mxu0 }
  0xe0   :  { %v154_v17 = vadd.f32 %v3557_v16, %v3402_v15  ;;  %v148_v18 = vpop.f32.mrb[1].mxu0 }
  0xe1   :  { %v149_v19 = vadd.f32 %v3402_v15, %v148_v18 }
  0xe2   :  { %v188_v20 = vmax.f32 %v154_v17, 0.0 }
  0xe3   :  { %v3560_v21 = vpop.f32.mrb[2].mxu0  ;;  %v187_v22 = vmax.f32 %v149_v19, 0.0  ;;  %v4049_v23 = vpack.i.bf16 %v154_v17, %v149_v19  ;;  %v4051_v24 = vpack.c.bf16 %v154_v17, %v149_v19 }
  0xe4   :  { %v164_v25 = vadd.f32 %v3560_v21, %v3402_v15  ;;  %v158_v26 = vpop.f32.mrb[3].mxu0 }
  0xe5   :  { %6501 = vst [vmem:[#allocation5_spill] sm:$0xff] %v4049_v23  ;;  %v159_v27 = vadd.f32 %v3402_v15, %v158_v26  ;;  %v3800_v28 = vpack.i.bf16 %v188_v20, %v187_v22 }
  0xe6   :  { %v190_v29 = vmax.f32 %v164_v25, 0.0 }
  0xe7   :  { %3801 = vrot.lane.b32.xlu0 %v3800_v28, %s3933_s23  ;;  %v3563_v30 = vpop.f32.mrb[4].mxu0  ;;  %v189_v31 = vmax.f32 %v159_v27, 0.0  ;;  %v4053_v32 = vpack.i.bf16 %v164_v25, %v159_v27  ;;  %v4055_v33 = vpack.c.bf16 %v164_v25, %v159_v27 }
  0xe8   :  { %v174_v34 = vadd.f32 %v3563_v30, %v3402_v15  ;;  %v168_v35 = vpop.f32.mrb[5].mxu0 }
  0xe9   :  { %6502 = vst [vmem:[#allocation6_spill] sm:$0xff] %v4053_v32  ;;  %v3805_v36 = vpack.i.bf16 %v190_v29, %v189_v31  ;;  %v169_v37 = vadd.f32 %v3402_v15, %v168_v35 }
  0xea   :  { %v192_v38 = vmax.f32 %v174_v34, 0.0 }
  0xeb   :  { %3806 = vrot.lane.b32.xlu0 %v3805_v36, %s3933_s23  ;;  %v3566_v39 = vpop.f32.mrb[6].mxu0  ;;  %v191_v40 = vmax.f32 %v169_v37, 0.0  ;;  %v4057_v41 = vpack.i.bf16 %v174_v34, %v169_v37  ;;  %v4059_v42 = vpack.c.bf16 %v174_v34, %v169_v37 }
  0xec   :  { %v184_v43 = vadd.f32 %v3566_v39, %v3402_v15  ;;  %v178_v44 = vpop.f32.mrb[7].mxu0 }
  0xed   :  { %6503 = vst [vmem:[#allocation7_spill] sm:$0xff] %v4057_v41  ;;  %v3810_v45 = vpack.i.bf16 %v192_v38, %v191_v40  ;;  %v179_v46 = vadd.f32 %v3402_v15, %v178_v44  ;;  %v311_v15 = vand.u32 127, %v310_v7 }
  0xee   :  { %v194_v47 = vmax.f32 %v184_v43, 0.0 }
  0xef   :  { %3811 = vrot.lane.b32.xlu1 %v3810_v45, %s3933_s23  ;;  %v193_v48 = vmax.f32 %v179_v46, 0.0  ;;  %v4061_v49 = vpack.i.bf16 %v184_v43, %v179_v46  ;;  %v4063_v50 = vpack.c.bf16 %v184_v43, %v179_v46  ;;  %v4090_v18 = vsub.s32 63, %v311_v15 }
  0xf1   :  { %6504 = vst [vmem:[#allocation8_spill] sm:$0xff] %v4061_v49  ;;  %v3815_v51 = vpack.i.bf16 %v194_v47, %v193_v48  ;;  %v4095_v37 = vadd.s32 2147483712, %v4090_v18 }
  0xf3   :  { %3816 = vrot.lane.b32.xlu1 %v3815_v51, %s3933_s23 }
 0x159   :  { %v3802_v53 = vpop.permute.xlu0 %3801 }
 0x15a   :  { %v3804_v54 = vunpack.i.h.bf16 %v3802_v53  ;;  %v3803_v55 = vunpack.i.l.bf16 %v3802_v53 }
 0x15c   :  { %v3704_v57 = vpack.c.bf16 %v3804_v54, %v3803_v55 }
 0x15d   :  { %v3807_v58 = vpop.permute.xlu0 %3806 }
 0x15e   :  { %3706 = vmatpush3.bf16.xpose.msk.msra.mxu1 %vm4068_vm3, %v3704_v57  ;;  %v3809_v59 = vunpack.i.h.bf16 %v3807_v58  ;;  %v3808_v60 = vunpack.i.l.bf16 %v3807_v58 }
 0x15f   :  { %3707 = vmatprep.subr.bf16.mxu1 %v3932_v14 }
 0x160   :  { %v3708_v61 = vpack.c.bf16 %v3809_v59, %v3808_v60 }
 0x161   :  { %v3812_v62 = vpop.permute.xlu1 %3811 }
 0x162   :  { %v3814_v63 = vunpack.i.h.bf16 %v3812_v62  ;;  %v3813_v0 = vunpack.i.l.bf16 %v3812_v62 }
 0x164   :  { %v3712_v1 = vpack.c.bf16 %v3814_v63, %v3813_v0 }
 0x165   :  { %v3817_v2 = vpop.permute.xlu1 %3816 }
 0x166   :  { %3710 = vmatpush3.bf16.xpose.msk.msra.mxu1 %vm4068_vm3, %v3708_v61  ;;  %v3819_v3 = vunpack.i.h.bf16 %v3817_v2  ;;  %v3818_v4 = vunpack.i.l.bf16 %v3817_v2 }
 0x167   :  { %3711 = vmatprep.subr.bf16.mxu1 %v3932_v14 }
 0x168   :  { %v3716_v5 = vpack.c.bf16 %v3819_v3, %v3818_v4 }
 0x16e   :  { %3714 = vmatpush3.bf16.xpose.msk.msra.mxu1 %vm4068_vm3, %v3712_v1 }
 0x16f   :  { %3715 = vmatprep.subr.bf16.mxu1 %v3932_v14 }
 0x176   :  { %3718 = vmatpush3.bf16.xpose.msk.msra.mxu1 %vm4068_vm3, %v3716_v5 }
 0x17d   :  { %3584 = vmatmul.mubr.msk.f32.vlgmr.msra.gmra.mrb[0].mxu1 %vm6468_vm2, %v195_v6 }
 0x250   :  { %v306_v10 = vpop.f32.mrb[0].mxu1 }
 0x251   :  { %v316_v12 = vrot.slane %v306_v10, %v315_v9  ;;  %v3585_v13 = vpop.f32.mrb[1].mxu1 }
 0x253   :  { %v317_v14 = vadd.f32 %v316_v12, %v312_v11 }
 0x255   :  { %vm319_vm4 = vcmp.lt.s32.totalorder %v317_v14, 0  ;;  %v320_v16 = vxor.u32 2147483647, %v317_v14 }
 0x257   :  { %v321_v17 = vsel %vm319_vm4, %v320_v16, %v317_v14 }
 0x258   :  { %v323_v19 = vshra.s32 %v321_v17, 6 }
 0x25a   :  { %v324_v20 = vmul.u32 64, %v323_v19 }
 0x25c   :  { %v325_v21 = vadd.s32 %v324_v20, %v4090_v18 }
 0x25e   :  { %v328_v22 = vsel %vm327_vm5, %v325_v21, 2147483648 }
 0x25f   :  { %v330_v25 = vshra.s32 %v328_v22, 16  ;;  %v329_v27 = vand.u32 65535, %v328_v22 }
 0x261   :  { %v332_v26 = vcvt.s32.f32 %v330_v25  ;;  %v331_v29 = vcvt.s32.f32 %v329_v27  ;;  %v412_v25 = vld [vmem:[%s6459_s7] sm:$0xff] }
 0x262   :  { %3590 = vmatprep.mubr.msk.f32.mxu1 %vm6468_vm2, %v412_v25 }
 0x263   :  { %333 = vmax.xlane.f32.xlu0 %v332_v26 }
 0x2f0   :  { %v334_v28 = vpop.xlane.xlu0 %333 }
 0x2f1   :  { %vm335_vm6 = vcmp.eq.f32.partialorder %v332_v26, %v334_v28  ;;  %v340_v31 = vcvt.f32.s32 %v334_v28 }
 0x2f2   :  { %v336_v30 = vsel %vm335_vm6, %v331_v29, -inf }
 0x2f3   :  { %337 = vmax.xlane.f32.xlu1 %v336_v30  ;;  %v341_v35 = vshll.u32 %v340_v31, 16 }
 0x380   :  { %v338_v34 = vpop.xlane.xlu1 %337 }
 0x381   :  { %v339_v36 = vcvt.f32.s32 %v338_v34 }
 0x383   :  { %v342_v38 = vadd.s32 %v341_v35, %v339_v36 }
 0x385   :  { %vm343_vm7 = vcmp.eq.s32.totalorder %v325_v21, %v342_v38 }
 0x386   :  { %v346_v39 = vsel %vm343_vm7, %v4095_v37, %v325_v21  ;;  %v3421_v61 = vsel %vm343_vm7, 1.0, %v3935_v52 }
 0x387   :  { %v347_v40 = vsel %vm327_vm5, %v346_v39, 2147483648 }
 0x388   :  { %v349_v43 = vshra.s32 %v347_v40, 16  ;;  %v348_v45 = vand.u32 65535, %v347_v40 }
 0x38a   :  { %v351_v44 = vcvt.s32.f32 %v349_v43  ;;  %v350_v47 = vcvt.s32.f32 %v348_v45 }
 0x38c   :  { %352 = vmax.xlane.f32.xlu0 %v351_v44 }
 0x419   :  { %v353_v46 = vpop.xlane.xlu0 %352 }
 0x41a   :  { %vm354_vm8 = vcmp.eq.f32.partialorder %v351_v44, %v353_v46  ;;  %v359_v51 = vcvt.f32.s32 %v353_v46 }
 0x41b   :  { %v355_v48 = vsel %vm354_vm8, %v350_v47, -inf }
 0x41c   :  { %356 = vmax.xlane.f32.xlu0 %v355_v48  ;;  %v360_v54 = vshll.u32 %v359_v51, 16 }
 0x4a9   :  { %v357_v53 = vpop.xlane.xlu0 %356 }
 0x4aa   :  { %v358_v55 = vcvt.f32.s32 %v357_v53 }
 0x4ac   :  { %v361_v56 = vadd.s32 %v360_v54, %v358_v55 }
 0x4ae   :  { %vm362_vm9 = vcmp.eq.s32.totalorder %v346_v39, %v361_v56 }
 0x4af   :  { %v3422_v57 = vsel %vm362_vm9, 1.0, %v3935_v52  ;;  %v365_v58 = vsel %vm362_vm9, %v4095_v37, %v346_v39 }
 0x4b0   :  { %v404_v59 = vrot.slane %v3422_v57, 4  ;;  %v366_v60 = vsel %vm327_vm5, %v365_v58, 2147483648 }
 0x4b1   :  { %v368_v62 = vshra.s32 %v366_v60, 16  ;;  %v367_v1 = vand.u32 65535, %v366_v60 }
 0x4b2   :  { %v410_v63 = vsel %vm409_vm10, %v3421_v61, %v404_v59  ;;  %v611_v59 = vld [vmem:[%s6461_s9 + $0x10] sm:$0xff] }
 0x4b3   :  { %v370_v0 = vcvt.s32.f32 %v368_v62  ;;  %v369_v3 = vcvt.s32.f32 %v367_v1  ;;  %v612_v62 = vld [vmem:[%s6461_s9 + $0x18] sm:$0xff] }
 0x4b5   :  { %371 = vmax.xlane.f32.xlu1 %v370_v0 }
 0x542   :  { %v372_v2 = vpop.xlane.xlu1 %371 }
 0x543   :  { %vm373_vm11 = vcmp.eq.f32.partialorder %v370_v0, %v372_v2  ;;  %v378_v5 = vcvt.f32.s32 %v372_v2  ;;  %v613_v0 = vld [vmem:[%s6461_s9 + $0x20] sm:$0xff]  ;;  %v614_v2 = vld [vmem:[%s6461_s9 + $0x28] sm:$0xff] }
 0x544   :  { %v374_v4 = vsel %vm373_vm11, %v369_v3, -inf }
 0x545   :  { %375 = vmax.xlane.f32.xlu0 %v374_v4  ;;  %v379_v7 = vshll.u32 %v378_v5, 16  ;;  %v615_v4 = vld [vmem:[%s6461_s9 + $0x30] sm:$0xff] }
 0x5d2   :  { %v376_v6 = vpop.xlane.xlu0 %375 }
 0x5d3   :  { %v377_v8 = vcvt.f32.s32 %v376_v6  ;;  %v616_v6 = vld [vmem:[%s6461_s9 + $0x38] sm:$0xff] }
 0x5d5   :  { %v380_v9 = vadd.s32 %v379_v7, %v377_v8 }
 0x5d7   :  { %vm381_vm12 = vcmp.eq.s32.totalorder %v365_v58, %v380_v9 }
 0x5d8   :  { %v384_v10 = vsel %vm381_vm12, %v4095_v37, %v365_v58  ;;  %v3423_v46 = vsel %vm381_vm12, 1.0, %v3935_v52 }
 0x5d9   :  { %v385_v11 = vsel %vm327_vm5, %v384_v10, 2147483648 }
 0x5da   :  { %v387_v12 = vshra.s32 %v385_v11, 16  ;;  %v386_v14 = vand.u32 65535, %v385_v11 }
 0x5dc   :  { %v389_v13 = vcvt.s32.f32 %v387_v12  ;;  %v388_v16 = vcvt.s32.f32 %v386_v14 }
 0x5de   :  { %390 = vmax.xlane.f32.xlu1 %v389_v13 }
 0x5ef   :  { %3821 = vrot.lane.b32.xlu1 %v4049_v23, %s3936_s3 }
 0x5f3   :  { %3831 = vrot.lane.b32.xlu1 %v4057_v41, %s3936_s3 }
 0x5f7   :  { %3836 = vrot.lane.b32.xlu1 %v4061_v49, %s3936_s3 }
 0x66b   :  { %v391_v15 = vpop.xlane.xlu1 %390 }
 0x66c   :  { %vm392_vm13 = vcmp.eq.f32.partialorder %v389_v13, %v391_v15  ;;  %v397_v26 = vcvt.f32.s32 %v391_v15  ;;  %v778_v13 = vld [vmem:[%s6460_s8] sm:$0xff] }
 0x66d   :  { %v393_v17 = vsel %vm392_vm13, %v388_v16, -inf }
 0x66e   :  { %394 = vmax.xlane.f32.xlu0 %v393_v17  ;;  %v398_v29 = vshll.u32 %v397_v26, 16 }
 0x66f   :  { %v3822_v19 = vpop.permute.xlu1 %3821 }
 0x670   :  { %v3824_v20 = vunpack.i.h.bf16 %v3822_v19  ;;  %v3823_v21 = vunpack.i.l.bf16 %v3822_v19 }
 0x672   :  { %v3723_v22 = vpack.c.bf16 %v3824_v20, %v3823_v21 }
 0x673   :  { %v3832_v27 = vpop.permute.xlu1 %3831 }
 0x674   :  { %3724 = vmatprep.subr.bf16.mxu0 %v3723_v22  ;;  %v3834_v34 = vunpack.i.h.bf16 %v3832_v27  ;;  %v3833_v36 = vunpack.i.l.bf16 %v3832_v27 }
 0x675   :  { %3726 = vmatpush3.bf16.msra.mxu0 %v3723_v22 }
 0x676   :  { %v3731_v51 = vpack.c.bf16 %v3834_v34, %v3833_v36 }
 0x677   :  { %v3837_v40 = vpop.permute.xlu1 %3836 }
 0x678   :  { %v3839_v47 = vunpack.i.h.bf16 %v3837_v40  ;;  %v3838_v48 = vunpack.i.l.bf16 %v3837_v40 }
 0x67a   :  { %v3735_v56 = vpack.c.bf16 %v3839_v47, %v3838_v48 }
 0x684   :  { %3826 = vrot.lane.b32.xlu0 %v4053_v32, %s3936_s3 }
 0x6fb   :  { %v395_v28 = vpop.xlane.xlu0 %394 }
 0x6fc   :  { %v396_v30 = vcvt.f32.s32 %v395_v28 }
 0x6fe   :  { %v399_v31 = vadd.s32 %v398_v29, %v396_v30 }
 0x6ff   :  { %v3827_v35 = vpop.permute.xlu0 %3826 }
 0x700   :  { %vm400_vm14 = vcmp.eq.s32.totalorder %v384_v10, %v399_v31  ;;  %v3829_v38 = vunpack.i.h.bf16 %v3827_v35  ;;  %v3828_v39 = vunpack.i.l.bf16 %v3827_v35  ;;  %v779_v10 = vld [vmem:[%s6460_s8 + $0x8] sm:$0xff]  ;;  %s3937_s8 = smov 96  }
 0x701   :  { %v3424_v43 = vsel %vm400_vm14, 1.0, %v3935_v52  ;;  %v413_v52 = vld [vmem:[%s6459_s7 + $0x8] sm:$0xff] }
 0x702   :  { %v407_v44 = vrot.slane %v3424_v43, 4  ;;  %v3727_v45 = vpack.c.bf16 %v3829_v38, %v3828_v39 }
 0x704   :  { %3728 = vmatprep.subr.bf16.mxu0 %v3727_v45  ;;  %v411_v53 = vsel %vm409_vm10, %v3423_v46, %v407_v44 }
 0x705   :  { %3730 = vmatpush3.bf16.msra.mxu0 %v3727_v45  ;;  %v3719_v54 = vpack.c.bf16 %v411_v53, %v410_v63 }
 0x706   :  { %3732 = vmatprep.subr.bf16.mxu0 %v3731_v51 }
 0x707   :  { %3720 = vmatprep.subr.bf16.mxu1 %v3719_v54 }
 0x708   :  { %3722 = vmatpush3.bf16.msra.mxu1 %v3719_v54 }
 0x709   :  { %3734 = vmatpush3.bf16.msra.mxu0 %v3731_v51  ;;  %3741 = vmatprep.subr.msk.bf16.mxu1 %vm4123_vm15, %v4051_v24 }
 0x70a   :  { %3736 = vmatprep.subr.bf16.mxu0 %v3735_v56 }
 0x70b   :  { %3591 = vmatmul.mubr.msk.f32.vlgmr.msra.gmra.mrb[2].mxu1 %vm6468_vm2, %v413_v52 }
 0x70d   :  { %3738 = vmatpush3.bf16.msra.mxu0 %v3735_v56 }
 0x711   :  { %3744 = vmatpush3.bf16.xpose.msk.msra.mxu1 %vm4123_vm15, %v4051_v24 }
 0x712   :  { %3747 = vmatprep.subr.msk.bf16.mxu1 %vm4123_vm15, %v4055_v33 }
 0x719   :  { %3750 = vmatpush3.bf16.xpose.msk.msra.mxu1 %vm4123_vm15, %v4055_v33 }
 0x71a   :  { %3753 = vmatprep.subr.msk.bf16.mxu1 %vm4123_vm15, %v4059_v42 }
 0x721   :  { %3756 = vmatpush3.bf16.xpose.msk.msra.mxu1 %vm4123_vm15, %v4059_v42  ;;  %v609_v42 = vld [vmem:[%s6461_s9] sm:$0xff] }
 0x722   :  { %3759 = vmatprep.subr.msk.bf16.mxu1 %vm4123_vm15, %v4063_v50 }
 0x729   :  { %3762 = vmatpush3.bf16.xpose.msk.msra.mxu1 %vm4123_vm15, %v4063_v50  ;;  %v610_v50 = vld [vmem:[%s6461_s9 + $0x8] sm:$0xff] }
 0x7de   :  { %v4155_v24 = vpop.f32.mrb[2].mxu1 }
 0x7df   :  { %6509 = vst [vmem:[#allocation9_spill] sm:$0xff] %v4155_v24  ;;  %v4157_v33 = vpop.f32.mrb[3].mxu1 }
 0x7e0   :  { %6510 = vst [vmem:[#allocation10_spill] sm:$0xff] %v4157_v33  ;;  %3609 = vmatprep.mubr.msk.f32.mxu0 %vm6499_vm1, %v4157_v33 }
 0x7e1   :  { %3610 = vmatmul.mubr.msk.f32.vlgmr.msra.gmra.mrb[8].mxu0 %vm6499_vm1, %v4155_v24 }
 0x8b4   :  { %v3611_v57 = vpop.f32.mrb[8].mxu0 }
 0x8b5   :  { %v600_v58 = vpop.f32.mrb[9].mxu0  ;;  %v618_v61 = vmul.f32 %v3611_v57, %v610_v50  ;;  %v620_v1 = vmul.f32 %v3611_v57, %v612_v62  ;;  %v622_v5 = vmul.f32 %v3611_v57, %v614_v2  ;;  %v624_v8 = vmul.f32 %v3611_v57, %v616_v6 }
 0x8b6   :  { %v617_v60 = vmul.f32 %v609_v42, %v600_v58  ;;  %v619_v63 = vmul.f32 %v611_v59, %v600_v58  ;;  %v621_v3 = vmul.f32 %v613_v0, %v600_v58  ;;  %v623_v7 = vmul.f32 %v615_v4, %v600_v58 }
 0x8b8   :  { %3628 = vmatprep.mubr.msk.f32.mxu1 %vm6471_vm0, %v617_v60 }
 0x8b9   :  { %3629 = vmatmul.mubr.msk.f32.vlgmr.msra.gmra.mrb[4].mxu1 %vm6471_vm0, %v618_v61 }
 0x8ba   :  { %3631 = vmatprep.mubr.msk.f32.mxu1 %vm6471_vm0, %v619_v63 }
 0x8bd   :  { %3632 = vmatmul.mubr.msk.f32.gmra.mrb[6].mxu1 %vm6471_vm0, %v620_v1 }
 0x8be   :  { %3634 = vmatprep.mubr.msk.f32.mxu1 %vm6471_vm0, %v621_v3 }
 0x8c1   :  { %3635 = vmatmul.mubr.msk.f32.gmra.mrb[8].mxu1 %vm6471_vm0, %v622_v5 }
 0x8c2   :  { %3637 = vmatprep.mubr.msk.f32.mxu1 %vm6471_vm0, %v623_v7 }
 0x8c5   :  { %3638 = vmatmul.mubr.msk.f32.gmra.mrb[10].mxu1 %vm6471_vm0, %v624_v8 }
 0x98c   :  { %v3630_v9 = vpop.f32.mrb[4].mxu1 }
 0x98d   :  { %v771_v11 = vmul.f32 0.35355338, %v3630_v9  ;;  %v731_v12 = vpop.f32.mrb[5].mxu1 }
 0x98e   :  { %v770_v14 = vmul.f32 0.35355338, %v731_v12 }
 0x98f   :  { %v4201_v15 = vadd.f32 %v779_v10, %v771_v11 }
 0x990   :  { %v4203_v16 = vadd.f32 %v778_v13, %v770_v14  ;;  %v3633_v17 = vpop.f32.mrb[6].mxu1 }
 0x991   :  { %6511 = vst [vmem:[#allocation11_spill] sm:$0xff] %v4201_v15  ;;  %vm797_vm3 = vcmp.lt.s32.totalorder %v4201_v15, 0  ;;  %v805_v19 = vxor.u32 2147483647, %v4201_v15  ;;  %v773_v20 = vmul.f32 0.35355338, %v3633_v17 }
 0x992   :  { %6512 = vst [vmem:[#allocation12_spill] sm:$0xff] %v4203_v16  ;;  %v741_v21 = vpop.f32.mrb[7].mxu1  ;;  %vm796_vm4 = vcmp.lt.s32.totalorder %v4203_v16, 0  ;;  %v804_v22 = vxor.u32 2147483647, %v4203_v16 }
 0x993   :  { %v772_v25 = vmul.f32 0.35355338, %v741_v21  ;;  %v4209_v26 = vadd.f32 %v779_v10, %v773_v20  ;;  %v813_v27 = vsel %vm797_vm3, %v805_v19, %v4201_v15 }
 0x994   :  { %v3636_v29 = vpop.f32.mrb[8].mxu1  ;;  %v821_v30 = vshra.s32 %v813_v27, 6  ;;  %v812_v31 = vsel %vm796_vm4, %v804_v22, %v4203_v16 }
 0x995   :  { %6513 = vst [vmem:[#allocation13_spill] sm:$0xff] %v4209_v26  ;;  %v4212_v28 = vadd.f32 %v778_v13, %v772_v25  ;;  %vm799_vm5 = vcmp.lt.s32.totalorder %v4209_v26, 0  ;;  %v807_v34 = vxor.u32 2147483647, %v4209_v26  ;;  %v775_v35 = vmul.f32 0.35355338, %v3636_v29 }
 0x996   :  { %v751_v36 = vpop.f32.mrb[9].mxu1  ;;  %v829_v40 = vmul.u32 64, %v821_v30  ;;  %v820_v44 = vshra.s32 %v812_v31, 6 }
 0x997   :  { %6514 = vst [vmem:[#allocation14_spill] sm:$0xff] %v4212_v28  ;;  %vm798_vm6 = vcmp.lt.s32.totalorder %v4212_v28, 0  ;;  %v806_v38 = vxor.u32 2147483647, %v4212_v28  ;;  %v774_v39 = vmul.f32 0.35355338, %v751_v36  ;;  %v4219_v43 = vadd.f32 %v779_v10, %v775_v35 }
 0x998   :  { %v815_v45 = vsel %vm799_vm5, %v807_v34, %v4209_v26  ;;  %v3639_v47 = vpop.f32.mrb[10].mxu1  ;;  %v4225_v48 = vadd.s32 %v829_v40, %v4090_v18  ;;  %v828_v59 = vmul.u32 64, %v820_v44 }
 0x999   :  { %6515 = vst [vmem:[#allocation15_spill] sm:$0xff] %v4219_v43  ;;  %v4222_v46 = vadd.f32 %v778_v13, %v774_v39  ;;  %v814_v51 = vsel %vm798_vm6, %v806_v38, %v4212_v28  ;;  %v823_v53 = vshra.s32 %v815_v45, 6  ;;  %vm801_vm7 = vcmp.lt.s32.totalorder %v4219_v43, 0  ;;  %v761_v56 = vpop.f32.mrb[11].mxu1 }
 0x99a   :  { %v809_v54 = vxor.u32 2147483647, %v4219_v43  ;;  %v777_v55 = vmul.f32 0.35355338, %v3639_v47  ;;  %v776_v42 = vmul.f32 0.35355338, %v761_v56  ;;  %v4246_v3 = vadd.s32 %v828_v59, %v4090_v18 }
 0x99b   :  { %6516 = vst [vmem:[#allocation16_spill] sm:$0xff] %v4222_v46  ;;  %vm800_vm8 = vcmp.lt.s32.totalorder %v4222_v46, 0  ;;  %v808_v52 = vxor.u32 2147483647, %v4222_v46  ;;  %v4234_v57 = vsel %vm6499_vm1, %v4225_v48, 2147483648  ;;  %v822_v60 = vshra.s32 %v814_v51, 6 }
 0x99c   :  { %v4236_v50 = vadd.f32 %v779_v10, %v777_v55  ;;  %v861_v58 = vshra.s32 %v4234_v57, 16  ;;  %v4239_v61 = vadd.f32 %v778_v13, %v776_v42  ;;  %v831_v62 = vmul.u32 64, %v823_v53 }
 0x99d   :  { %v816_v63 = vsel %vm800_vm8, %v808_v52, %v4222_v46  ;;  %v817_v0 = vsel %vm801_vm7, %v809_v54, %v4219_v43  ;;  %v830_v5 = vmul.u32 64, %v822_v60  ;;  %v844_v7 = vsel %vm6499_vm1, %v4246_v3, 2147483648 }
 0x99e   :  { %6517 = vst [vmem:[#allocation17_spill] sm:$0xff] %v4236_v50  ;;  %6518 = vst [vmem:[#allocation18_spill] sm:$0xff] %v4239_v61  ;;  %vm803_vm9 = vcmp.lt.s32.totalorder %v4236_v50, 0  ;;  %v811_v1 = vxor.u32 2147483647, %v4236_v50  ;;  %v863_v2 = vcvt.s32.f32 %v861_v58  ;;  %vm802_vm10 = vcmp.lt.s32.totalorder %v4239_v61, 0 }
 0x99f   :  { %v810_v4 = vxor.u32 2147483647, %v4239_v61  ;;  %v4251_v6 = vadd.s32 %v831_v62, %v4090_v18  ;;  %v824_v8 = vshra.s32 %v816_v63, 6  ;;  %v825_v9 = vshra.s32 %v817_v0, 6 }
 0x9a0   :  { %864 = vmax.xlane.f32.xlu1 %v863_v2  ;;  %v819_v10 = vsel %vm803_vm9, %v811_v1, %v4236_v50  ;;  %v846_v12 = vshra.s32 %v844_v7, 16  ;;  %v4258_v13 = vadd.s32 %v830_v5, %v4090_v18  ;;  %v860_v59 = vand.u32 65535, %v4234_v57 }
 0x9a1   :  { %v818_v11 = vsel %vm802_vm10, %v810_v4, %v4239_v61  ;;  %v832_v14 = vmul.u32 64, %v824_v8  ;;  %v833_v17 = vmul.u32 64, %v825_v9  ;;  %v827_v22 = vshra.s32 %v819_v10, 6 }
 0x9a2   :  { %v826_v19 = vshra.s32 %v818_v11, 6  ;;  %v848_v20 = vcvt.s32.f32 %v846_v12  ;;  %v874_v21 = vsel %vm6499_vm1, %v4258_v13, 2147483648  ;;  %v889_v27 = vsel %vm6499_vm1, %v4251_v6, 2147483648 }
 0x9a3   :  { %v876_v25 = vshra.s32 %v874_v21, 16  ;;  %v4265_v29 = vadd.s32 %v832_v14, %v4090_v18  ;;  %v4268_v30 = vadd.s32 %v833_v17, %v4090_v18  ;;  %v835_v34 = vmul.u32 64, %v827_v22 }
 0x9a4   :  { %849 = vmax.xlane.f32.xlu0 %v848_v20  ;;  %v834_v31 = vmul.u32 64, %v826_v19  ;;  %v891_v38 = vshra.s32 %v889_v27, 16  ;;  %v862_v62 = vcvt.s32.f32 %v860_v59  ;;  %v845_v63 = vand.u32 65535, %v844_v7 }
 0x9a5   :  { %v878_v35 = vcvt.s32.f32 %v876_v25  ;;  %v904_v36 = vsel %vm6499_vm1, %v4265_v29, 2147483648  ;;  %v919_v44 = vsel %vm6499_vm1, %v4268_v30, 2147483648  ;;  %v4278_v45 = vadd.s32 %v835_v34, %v4090_v18 }
 0x9a6   :  { %v906_v39 = vshra.s32 %v904_v36, 16  ;;  %v4273_v40 = vadd.s32 %v834_v31, %v4090_v18  ;;  %v893_v54 = vcvt.s32.f32 %v891_v38  ;;  %v921_v55 = vshra.s32 %v919_v44, 16 }
 0x9a7   :  { %6520 = vst [vmem:[#allocation20_spill] sm:$0xff] %v4278_v45  ;;  %v949_v52 = vsel %vm6499_vm1, %v4278_v45, 2147483648  ;;  %v847_v4 = vcvt.s32.f32 %v845_v63  ;;  %v875_v5 = vand.u32 65535, %v874_v21  ;;  %v905_v9 = vand.u32 65535, %v904_v36 }
 0x9a8   :  { %6519 = vst [vmem:[#allocation19_spill] sm:$0xff] %v4273_v40  ;;  %879 = vmax.xlane.f32.xlu0 %v878_v35  ;;  %v908_v47 = vcvt.s32.f32 %v906_v39  ;;  %v934_v51 = vsel %vm6499_vm1, %v4273_v40, 2147483648  ;;  %v923_v42 = vcvt.s32.f32 %v921_v55  ;;  %v951_v58 = vshra.s32 %v949_v52, 16 }
 0x9a9   :  { %v936_v53 = vshra.s32 %v934_v51, 16  ;;  %v877_v11 = vcvt.s32.f32 %v875_v5  ;;  %v890_v12 = vand.u32 65535, %v889_v27  ;;  %v907_v57 = vcvt.s32.f32 %v905_v9 }
 0x9aa   :  { %909 = vmax.xlane.f32.xlu1 %v908_v47  ;;  %v953_v18 = vcvt.s32.f32 %v951_v58  ;;  %v935_v19 = vand.u32 65535, %v934_v51  ;;  %v920_v25 = vand.u32 65535, %v919_v44  ;;  %v950_v36 = vand.u32 65535, %v949_v52 }
 0x9ab   :  { %v938_v56 = vcvt.s32.f32 %v936_v53  ;;  %v892_v7 = vcvt.s32.f32 %v890_v12 }
 0x9ac   :  { %894 = vmax.xlane.f32.xlu0 %v893_v54  ;;  %v937_v31 = vcvt.s32.f32 %v935_v19  ;;  %v922_v34 = vcvt.s32.f32 %v920_v25  ;;  %v952_v44 = vcvt.s32.f32 %v950_v36 }
 0x9ae   :  { %939 = vmax.xlane.f32.xlu1 %v938_v56 }
 0x9b0   :  { %924 = vmax.xlane.f32.xlu0 %v923_v42 }
 0x9b4   :  { %954 = vmax.xlane.f32.xlu0 %v953_v18 }
 0xa2d   :  { %v865_v60 = vpop.xlane.xlu1 %864 }
 0xa2e   :  { %vm866_vm11 = vcmp.eq.f32.partialorder %v863_v2, %v865_v60  ;;  %v871_v51 = vcvt.f32.s32 %v865_v60 }
 0xa2f   :  { %v867_v0 = vsel %vm866_vm11, %v862_v62, -inf }
 0xa30   :  { %868 = vmax.xlane.f32.xlu0 %v867_v0 }
 0xa31   :  { %v850_v1 = vpop.xlane.xlu0 %849 }
 0xa32   :  { %vm851_vm12 = vcmp.eq.f32.partialorder %v848_v20, %v850_v1 }
 0xa33   :  { %v852_v8 = vsel %vm851_vm12, %v847_v4, -inf }
 0xa34   :  { %853 = vmax.xlane.f32.xlu1 %v852_v8 }
 0xa35   :  { %v880_v10 = vpop.xlane.xlu0 %879 }
 0xa36   :  { %vm881_vm13 = vcmp.eq.f32.partialorder %v878_v35, %v880_v10  ;;  %v886_v59 = vcvt.f32.s32 %v880_v10 }
 0xa37   :  { %v882_v14 = vsel %vm881_vm13, %v877_v11, -inf  ;;  %v910_v17 = vpop.xlane.xlu1 %909 }
 0xa38   :  { %883 = vmax.xlane.f32.xlu1 %v882_v14  ;;  %vm911_vm14 = vcmp.eq.f32.partialorder %v908_v47, %v910_v17  ;;  %v916_v4 = vcvt.f32.s32 %v910_v17 }
 0xa39   :  { %v895_v2 = vpop.xlane.xlu0 %894  ;;  %v912_v22 = vsel %vm911_vm14, %v907_v57, -inf }
 0xa3a   :  { %vm896_vm15 = vcmp.eq.f32.partialorder %v893_v54, %v895_v2  ;;  %v872_v54 = vshll.u32 %v871_v51, 16  ;;  %v901_v8 = vcvt.f32.s32 %v895_v2  ;;  %v917_v17 = vshll.u32 %v916_v4, 16 }
 0xa3b   :  { %v897_v21 = vsel %vm896_vm15, %v892_v7, -inf  ;;  %v4285_v20 = vpop.xlane.xlu1 %939 }
 0xa3c   :  { %898 = vmax.xlane.f32.xlu0 %v897_v21  ;;  %913 = vmax.xlane.f32.xlu1 %v912_v22  ;;  %vm941_vm3 = vcmp.eq.f32.partialorder %v938_v56, %v4285_v20  ;;  %v856_v56 = vcvt.f32.s32 %v850_v1  ;;  %v887_v1 = vshll.u32 %v886_v59, 16  ;;  %v902_v7 = vshll.u32 %v901_v8, 16 }
 0xa3d   :  { %v925_v27 = vpop.xlane.xlu0 %924  ;;  %v942_v35 = vsel %vm941_vm3, %v937_v31, -inf  ;;  %v946_v25 = vcvt.f32.s32 %v4285_v20 }
 0xa3e   :  { %vm926_vm4 = vcmp.eq.f32.partialorder %v923_v42, %v925_v27  ;;  %v857_v42 = vshll.u32 %v856_v56, 16  ;;  %v931_v22 = vcvt.f32.s32 %v925_v27 }
 0xa3f   :  { %v927_v38 = vsel %vm926_vm4, %v922_v34, -inf }
 0xa40   :  { %928 = vmax.xlane.f32.xlu0 %v927_v38  ;;  %943 = vmax.xlane.f32.xlu1 %v942_v35  ;;  %v932_v51 = vshll.u32 %v931_v22, 16 }
 0xa41   :  { %v4288_v39 = vpop.xlane.xlu0 %954 }
 0xa42   :  { %vm956_vm5 = vcmp.eq.f32.partialorder %v953_v18, %v4288_v39 }
 0xa43   :  { %v957_v47 = vsel %vm956_vm5, %v952_v44, -inf }
 0xa44   :  { %958 = vmax.xlane.f32.xlu0 %v957_v47 }
 0xabd   :  { %v869_v53 = vpop.xlane.xlu0 %868 }
 0xabe   :  { %v870_v55 = vcvt.f32.s32 %v869_v53 }
 0xac0   :  { %v4291_v58 = vadd.s32 %v872_v54, %v870_v55  ;;  %v947_v55 = vshll.u32 %v946_v25, 16 }
 0xac1   :  { %v854_v52 = vpop.xlane.xlu1 %853 }
 0xac2   :  { %vm965_vm6 = vcmp.eq.s32.totalorder %v4225_v48, %v4291_v58  ;;  %v855_v62 = vcvt.f32.s32 %v854_v52  ;;  %v961_v52 = vcvt.f32.s32 %v4288_v39 }
 0xac3   :  { %v4300_v18 = vsel %vm965_vm6, %v4095_v37, %v4225_v48 }
 0xac4   :  { %v4304_v60 = vsel %vm6499_vm1, %v4300_v18, 2147483648  ;;  %v4306_v63 = vadd.s32 %v857_v42, %v855_v62 }
 0xac5   :  { %v1045_v0 = vshra.s32 %v4304_v60, 16  ;;  %v884_v5 = vpop.xlane.xlu1 %883 }
 0xac6   :  { %vm964_vm7 = vcmp.eq.s32.totalorder %v4246_v3, %v4306_v63  ;;  %v885_v9 = vcvt.f32.s32 %v884_v5  ;;  %v962_v5 = vshll.u32 %v961_v52, 16  ;;  %v1044_v52 = vand.u32 65535, %v4304_v60 }
 0xac7   :  { %v4311_v10 = vcvt.s32.f32 %v1045_v0  ;;  %v4318_v11 = vsel %vm964_vm7, %v4095_v37, %v4246_v3 }
 0xac8   :  { %v4320_v12 = vadd.s32 %v887_v1, %v885_v9  ;;  %v4325_v14 = vsel %vm6499_vm1, %v4318_v11, 2147483648 }
 0xac9   :  { %1048 = vmax.xlane.f32.xlu0 %v4311_v10  ;;  %v899_v57 = vpop.xlane.xlu0 %898  ;;  %v914_v19 = vpop.xlane.xlu1 %913  ;;  %v1030_v2 = vshra.s32 %v4325_v14, 16 }
 0xaca   :  { %vm966_vm8 = vcmp.eq.s32.totalorder %v4258_v13, %v4320_v12  ;;  %v900_v21 = vcvt.f32.s32 %v899_v57  ;;  %v915_v31 = vcvt.f32.s32 %v914_v19 }
 0xacb   :  { %v4331_v34 = vcvt.s32.f32 %v1030_v2  ;;  %v4338_v35 = vsel %vm966_vm8, %v4095_v37, %v4258_v13 }
 0xacc   :  { %v4342_v36 = vsel %vm6499_vm1, %v4338_v35, 2147483648  ;;  %v4344_v27 = vadd.s32 %v902_v7, %v900_v21  ;;  %v4346_v20 = vadd.s32 %v917_v17, %v915_v31 }
 0xacd   :  { %v929_v38 = vpop.xlane.xlu0 %928  ;;  %1033 = vmax.xlane.f32.xlu1 %v4331_v34  ;;  %v944_v44 = vpop.xlane.xlu1 %943  ;;  %v1060_v47 = vshra.s32 %v4342_v36, 16 }
 0xace   :  { %v930_v53 = vcvt.f32.s32 %v929_v38  ;;  %v945_v54 = vcvt.f32.s32 %v944_v44  ;;  %vm967_vm9 = vcmp.eq.s32.totalorder %v4251_v6, %v4344_v27  ;;  %vm6484_vm10 = vcmp.eq.s32.totalorder %v4265_v29, %v4346_v20 }
 0xacf   :  { %v1062_v59 = vcvt.s32.f32 %v1060_v47  ;;  %v4364_v0 = vsel %vm967_vm9, %v4095_v37, %v4251_v6  ;;  %v4371_v1 = vsel %vm6484_vm10, %v4095_v37, %v4265_v29 }
 0xad0   :  { %v4354_v56 = vadd.s32 %v932_v51, %v930_v53  ;;  %v4357_v42 = vadd.s32 %v947_v55, %v945_v54  ;;  %v1073_v4 = vsel %vm6499_vm1, %v4364_v0, 2147483648  ;;  %v1088_v9 = vsel %vm6499_vm1, %v4371_v1, 2147483648 }
 0xad1   :  { %v959_v62 = vpop.xlane.xlu0 %958  ;;  %1063 = vmax.xlane.f32.xlu1 %v1062_v59  ;;  %v1075_v8 = vshra.s32 %v1073_v4, 16  ;;  %v1090_v19 = vshra.s32 %v1088_v9, 16 }
 0xad2   :  { %6521 = vst [vmem:[#allocation21_spill] sm:$0xff] %v4357_v42  ;;  %vm6483_vm11 = vcmp.eq.s32.totalorder %v4268_v30, %v4354_v56  ;;  %v960_v39 = vcvt.f32.s32 %v959_v62  ;;  %vm6482_vm12 = vcmp.eq.s32.totalorder %v4273_v40, %v4357_v42  ;;  %v977_v33 = vshra.s32 %v4354_v56, 6 }
 0xad3   :  { %v1077_v57 = vcvt.s32.f32 %v1075_v8  ;;  %v4388_v2 = vsel %vm6483_vm11, %v4095_v37, %v4268_v30  ;;  %v4397_v22 = vsel %vm6482_vm12, %v4095_v37, %v4273_v40  ;;  %v1092_v25 = vcvt.s32.f32 %v1090_v19 }
 0xad4   :  { %v4381_v17 = vadd.s32 %v962_v5, %v960_v39  ;;  %v1103_v7 = vsel %vm6499_vm1, %v4388_v2, 2147483648  ;;  %v1118_v31 = vsel %vm6499_vm1, %v4397_v22, 2147483648  ;;  %v1046_v39 = vcvt.s32.f32 %v1044_v52 }
 0xad5   :  { %1078 = vmax.xlane.f32.xlu0 %v1077_v57  ;;  %v1105_v21 = vshra.s32 %v1103_v7, 16  ;;  %1093 = vmax.xlane.f32.xlu1 %v1092_v25  ;;  %v1120_v47 = vshra.s32 %v1118_v31, 16  ;;  %v1029_v5 = vand.u32 65535, %v4325_v14  ;;  %v1074_v14 = vand.u32 65535, %v1073_v4 }
 0xad6   :  { %6522 = vst [vmem:[#allocation22_spill] sm:$0xff] %v4381_v17  ;;  %vm6481_vm13 = vcmp.eq.s32.totalorder %v4278_v45, %v4381_v17  ;;  %v978_v32 = vshra.s32 %v4357_v42, 6 }
 0xad7   :  { %v4408_v38 = vsel %vm6481_vm13, %v4095_v37, %v4278_v45  ;;  %v1107_v44 = vcvt.s32.f32 %v1105_v21  ;;  %v1122_v54 = vcvt.s32.f32 %v1120_v47  ;;  %v1031_v21 = vcvt.s32.f32 %v1029_v5 }
 0xad8   :  { %6523 = vst [vmem:[#allocation23_spill] sm:$0xff] %v4408_v38  ;;  %v1133_v51 = vsel %vm6499_vm1, %v4408_v38, 2147483648  ;;  %v1059_v47 = vand.u32 65535, %v4342_v36  ;;  %v1076_v24 = vcvt.s32.f32 %v1074_v14  ;;  %v1104_v5 = vand.u32 65535, %v1103_v7 }
 0xad9   :  { %v1135_v53 = vshra.s32 %v1133_v51, 16  ;;  %1108 = vmax.xlane.f32.xlu0 %v1107_v44  ;;  %1123 = vmax.xlane.f32.xlu1 %v1122_v54  ;;  %v1134_v4 = vand.u32 65535, %v1133_v51  ;;  %v973_v51 = vshra.s32 %v4291_v58, 6  ;;  %v974_v14 = vshra.s32 %v4320_v12, 6 }
 0xada   :  { %v1061_v52 = vcvt.s32.f32 %v1059_v47 }
 0xadb   :  { %v1137_v55 = vcvt.s32.f32 %v1135_v53 }
 0xadd   :  { %1138 = vmax.xlane.f32.xlu0 %v1137_v55 }
 0xb56   :  { %v4413_v62 = vpop.xlane.xlu0 %1048 }
 0xb57   :  { %vm1050_vm14 = vcmp.eq.f32.partialorder %v4311_v10, %v4413_v62 }
 0xb58   :  { %v1051_v8 = vsel %vm1050_vm14, %v1046_v39, -inf  ;;  %v1089_v39 = vand.u32 65535, %v1088_v9 }
 0xb59   :  { %1052 = vmax.xlane.f32.xlu0 %v1051_v8 }
 0xb5a   :  { %v4418_v19 = vpop.xlane.xlu1 %1033 }
 0xb5b   :  { %vm1035_vm15 = vcmp.eq.f32.partialorder %v4331_v34, %v4418_v19 }
 0xb5c   :  { %v1036_v53 = vsel %vm1035_vm15, %v1031_v21, -inf  ;;  %v1091_v21 = vcvt.s32.f32 %v1089_v39  ;;  %v981_v39 = vmul.u32 64, %v973_v51 }
 0xb5d   :  { %1037 = vmax.xlane.f32.xlu1 %v1036_v53  ;;  %v1119_v53 = vand.u32 65535, %v1118_v31 }
 0xb5e   :  { %v4423_v60 = vpop.xlane.xlu1 %1063 }
 0xb5f   :  { %vm1065_vm3 = vcmp.eq.f32.partialorder %v1062_v59, %v4423_v60 }
 0xb60   :  { %v1066_v10 = vsel %vm1065_vm3, %v1061_v52, -inf  ;;  %v1106_v52 = vcvt.s32.f32 %v1104_v5 }
 0xb61   :  { %1067 = vmax.xlane.f32.xlu1 %v1066_v10  ;;  %v1136_v10 = vcvt.s32.f32 %v1134_v4 }
 0xb62   :  { %v4426_v8 = vpop.xlane.xlu0 %1078  ;;  %v4429_v34 = vpop.xlane.xlu1 %1093 }
 0xb63   :  { %vm1080_vm4 = vcmp.eq.f32.partialorder %v1077_v57, %v4426_v8  ;;  %vm1095_vm5 = vcmp.eq.f32.partialorder %v1092_v25, %v4429_v34  ;;  %v1121_v57 = vcvt.s32.f32 %v1119_v53  ;;  %v997_v53 = vxor.u32 2147483647, %v981_v39 }
 0xb64   :  { %v1081_v36 = vsel %vm1080_vm4, %v1076_v24, -inf  ;;  %v1096_v47 = vsel %vm1095_vm5, %v1091_v21, -inf  ;;  %v1055_v21 = vcvt.f32.s32 %v4413_v62  ;;  %vm989_vm4 = vcmp.lt.s32.totalorder %v981_v39, 0 }
 0xb65   :  { %1082 = vmax.xlane.f32.xlu0 %v1081_v36  ;;  %1097 = vmax.xlane.f32.xlu1 %v1096_v47  ;;  %v982_v36 = vmul.u32 64, %v974_v14  ;;  %v976_v47 = vshra.s32 %v4346_v20, 6  ;;  %v1100_v50 = vcvt.f32.s32 %v4429_v34 }
 0xb66   :  { %v4432_v59 = vpop.xlane.xlu0 %1108  ;;  %v4435_v9 = vpop.xlane.xlu1 %1123 }
 0xb67   :  { %vm1110_vm14 = vcmp.eq.f32.partialorder %v1107_v44, %v4432_v59  ;;  %vm1125_vm15 = vcmp.eq.f32.partialorder %v1122_v54, %v4435_v9  ;;  %v972_v44 = vshra.s32 %v4306_v63, 6  ;;  %v975_v54 = vshra.s32 %v4344_v27, 6 }
 0xb68   :  { %v1111_v7 = vsel %vm1110_vm14, %v1106_v52, -inf  ;;  %v1126_v24 = vsel %vm1125_vm15, %v1121_v57, -inf  ;;  %v998_v52 = vxor.u32 2147483647, %v982_v36  ;;  %vm990_vm14 = vcmp.lt.s32.totalorder %v982_v36, 0 }
 0xb69   :  { %1112 = vmax.xlane.f32.xlu0 %v1111_v7  ;;  %1127 = vmax.xlane.f32.xlu1 %v1126_v24  ;;  %v980_v5 = vmul.u32 64, %v972_v44  ;;  %v983_v7 = vmul.u32 64, %v975_v54  ;;  %v1056_v57 = vshll.u32 %v1055_v21, 16  ;;  %v1005_v44 = vsel %vm989_vm4, %v997_v53, %v981_v39 }
 0xb6a   :  { %v4438_v31 = vpop.xlane.xlu0 %1138  ;;  %v4450_v62 = vsel %vm990_vm14, %v998_v52, %v982_v36  ;;  %v985_v52 = vmul.u32 64, %v977_v33  ;;  %v1101_v28 = vshll.u32 %v1100_v50, 16 }
 0xb6b   :  { %vm1140_vm3 = vcmp.eq.f32.partialorder %v1137_v55, %v4438_v31  ;;  %vm988_vm5 = vcmp.lt.s32.totalorder %v980_v5, 0  ;;  %v996_v55 = vxor.u32 2147483647, %v980_v5  ;;  %vm991_vm15 = vcmp.lt.s32.totalorder %v983_v7, 0 }
 0xb6c   :  { %v1141_v25 = vsel %vm1140_vm3, %v1136_v10, -inf  ;;  %v1040_v10 = vcvt.f32.s32 %v4418_v19 }
 0xb6d   :  { %1142 = vmax.xlane.f32.xlu0 %v1141_v25  ;;  %v984_v25 = vmul.u32 64, %v976_v47  ;;  %v1004_v14 = vsel %vm988_vm5, %v996_v55, %v980_v5  ;;  %v1070_v5 = vcvt.f32.s32 %v4423_v60  ;;  %vm3288_vm5 = vcmask 7168  }
 0xb6e   :  { %v1041_v19 = vshll.u32 %v1040_v10, 16  ;;  %v986_v10 = vmul.u32 64, %v978_v32 }
 0xb6f   :  { %vm992_vm4 = vcmp.lt.s32.totalorder %v984_v25, 0  ;;  %v1000_v55 = vxor.u32 2147483647, %v984_v25  ;;  %v1071_v33 = vshll.u32 %v1070_v5, 16 }
 0xbe6   :  { %v1053_v4 = vpop.xlane.xlu0 %1052 }
 0xbe7   :  { %v1054_v24 = vcvt.f32.s32 %v1053_v4  ;;  %v999_v4 = vxor.u32 2147483647, %v983_v7 }
 0xbe9   :  { %v4448_v51 = vadd.s32 %v1056_v57, %v1054_v24  ;;  %v4473_v49 = vsel %vm991_vm15, %v999_v4, %v983_v7  ;;  %v4488_v7 = vsel %vm992_vm4, %v1000_v55, %v984_v25  ;;  %vm993_vm15 = vcmp.lt.s32.totalorder %v985_v52, 0 }
 0xbea   :  { %v1038_v21 = vpop.xlane.xlu1 %1037  ;;  %v1085_v25 = vcvt.f32.s32 %v4426_v8 }
 0xbeb   :  { %vm1149_vm3 = vcmp.eq.s32.totalorder %v4300_v18, %v4448_v51  ;;  %v1165_v54 = vshra.s32 %v4448_v51, 6  ;;  %v1039_v47 = vcvt.f32.s32 %v1038_v21 }
 0xbec   :  { %v4462_v39 = vsel %vm1149_vm3, %v4095_v37, %v4300_v18 }
 0xbed   :  { %v1173_v36 = vmul.u32 64, %v1165_v54  ;;  %v4467_v53 = vsel %vm6499_vm1, %v4462_v39, 2147483648  ;;  %v4469_v57 = vadd.s32 %v1041_v19, %v1039_v47 }
 0xbee   :  { %v1237_v24 = vshra.s32 %v4467_v53, 16  ;;  %v1068_v54 = vpop.xlane.xlu1 %1067 }
 0xbef   :  { %vm1181_vm14 = vcmp.lt.s32.totalorder %v1173_v36, 0  ;;  %v1189_v21 = vxor.u32 2147483647, %v1173_v36  ;;  %vm1148_vm2 = vcmp.eq.s32.totalorder %v4318_v11, %v4469_v57  ;;  %v1164_v60 = vshra.s32 %v4469_v57, 6 }
 0xbf0   :  { %v4478_v41 = vcvt.s32.f32 %v1237_v24  ;;  %v1069_v47 = vcvt.f32.s32 %v1068_v54  ;;  %v4485_v32 = vsel %vm1148_vm2, %v4095_v37, %v4318_v11  ;;  %v1001_v54 = vxor.u32 2147483647, %v985_v52 }
 0xbf1   :  { %v1197_v19 = vsel %vm1181_vm14, %v1189_v21, %v1173_v36  ;;  %v1172_v23 = vmul.u32 64, %v1164_v60  ;;  %v4496_v5 = vsel %vm6499_vm1, %v4485_v32, 2147483648  ;;  %v979_v36 = vshra.s32 %v4381_v17, 6 }
 0xbf2   :  { %v4491_v4 = vsel %vm3288_vm5, %v1005_v44, %v1197_v19  ;;  %1240 = vmax.xlane.f32.xlu0 %v4478_v41  ;;  %v4499_v24 = vadd.s32 %v1071_v33, %v1069_v47  ;;  %v1222_v21 = vshra.s32 %v4496_v5, 16  ;;  %vm994_vm14 = vcmp.lt.s32.totalorder %v986_v10, 0  ;;  %v1083_v46 = vpop.xlane.xlu0 %1082 }
 0xbf3   :  { %vm1180_vm4 = vcmp.lt.s32.totalorder %v1172_v23, 0  ;;  %v1188_v44 = vxor.u32 2147483647, %v1172_v23  ;;  %v1002_v19 = vxor.u32 2147483647, %v986_v10  ;;  %v4516_v47 = vmul.u32 64, %v979_v36 }
 0xbf4   :  { %vm1150_vm0 = vcmp.eq.s32.totalorder %v4338_v35, %v4499_v24  ;;  %v1166_v55 = vshra.s32 %v4499_v24, 6  ;;  %v4506_v60 = vcvt.s32.f32 %v1222_v21  ;;  %v1086_v21 = vshll.u32 %v1085_v25, 16 }
 0xbf5   :  { %v1196_v33 = vsel %vm1180_vm4, %v1188_v44, %v1172_v23  ;;  %v4514_v8 = vsel %vm1150_vm0, %v4095_v37, %v4338_v35  ;;  %v4527_v23 = vsel %vm993_vm15, %v1001_v54, %v985_v52  ;;  %v1084_v44 = vcvt.f32.s32 %v1083_v46 }
 0xbf6   :  { %v4519_v61 = vsel %vm3288_vm5, %v1004_v14, %v1196_v33  ;;  %v1174_v43 = vmul.u32 64, %v1166_v55  ;;  %1225 = vmax.xlane.f32.xlu1 %v4506_v60  ;;  %v4524_v34 = vsel %vm6499_vm1, %v4514_v8, 2147483648  ;;  %v1115_v36 = vcvt.f32.s32 %v4432_v59  ;;  %v1098_v33 = vpop.xlane.xlu1 %1097  ;;  %v1113_v59 = vpop.xlane.xlu0 %1112 }
 0xbf7   :  { %v1252_v26 = vshra.s32 %v4524_v34, 16  ;;  %v1130_v14 = vcvt.f32.s32 %v4435_v9  ;;  %v4532_v16 = vadd.s32 %v1086_v21, %v1084_v44  ;;  %v1099_v15 = vcvt.f32.s32 %v1098_v33 }
 0xbf8   :  { %vm1182_vm4 = vcmp.lt.s32.totalorder %v1174_v43, 0  ;;  %v1190_v55 = vxor.u32 2147483647, %v1174_v43  ;;  %v4537_v52 = vsel %vm994_vm14, %v1002_v19, %v986_v10  ;;  %v1145_v54 = vcvt.f32.s32 %v4438_v31 }
 0xbf9   :  { %v4534_v17 = vcvt.s32.f32 %v1252_v26  ;;  %vm1151_vm15 = vcmp.eq.s32.totalorder %v4364_v0, %v4532_v16  ;;  %v1167_v50 = vshra.s32 %v4532_v16, 6  ;;  %v4548_v26 = vadd.s32 %v1101_v28, %v1099_v15 }
 0xbfa   :  { %v1198_v25 = vsel %vm1182_vm4, %v1190_v55, %v1174_v43  ;;  %v1116_v10 = vshll.u32 %v1115_v36, 16  ;;  %v1131_v19 = vshll.u32 %v1130_v14, 16  ;;  %v1114_v21 = vcvt.f32.s32 %v1113_v59  ;;  %v1128_v44 = vpop.xlane.xlu1 %1127  ;;  %v1143_v36 = vpop.xlane.xlu0 %1142 }
 0xbfb   :  { %v4543_v9 = vsel %vm3288_vm5, %v4450_v62, %v1198_v25  ;;  %1255 = vmax.xlane.f32.xlu1 %v4534_v17  ;;  %v4556_v43 = vsel %vm1151_vm15, %v4095_v37, %v4364_v0  ;;  %v1175_v31 = vmul.u32 64, %v1167_v50  ;;  %vm1152_vm14 = vcmp.eq.s32.totalorder %v4371_v1, %v4548_v26 }
 0xbfc   :  { %v1168_v15 = vshra.s32 %v4548_v26, 6  ;;  %v1129_v28 = vcvt.f32.s32 %v1128_v44  ;;  %v1146_v62 = vshll.u32 %v1145_v54, 16  ;;  %v4561_v55 = vadd.s32 %v1116_v10, %v1114_v21 }
 0xbfd   :  { %v4565_v14 = vsel %vm6499_vm1, %v4556_v43, 2147483648  ;;  %v4572_v33 = vsel %vm1152_vm14, %v4095_v37, %v4371_v1  ;;  %vm1183_vm4 = vcmp.lt.s32.totalorder %v1175_v31, 0  ;;  %v1191_v25 = vxor.u32 2147483647, %v1175_v31 }
 0xbfe   :  { %6524 = vst [vmem:[#allocation24_spill] sm:$0xff] %v4572_v33  ;;  %v1176_v59 = vmul.u32 64, %v1168_v15  ;;  %v4574_v50 = vadd.s32 %v1131_v19, %v1129_v28  ;;  %vm995_vm13 = vcmp.lt.s32.totalorder %v4516_v47, 0  ;;  %vm6488_vm12 = vcmp.eq.s32.totalorder %v4388_v2, %v4561_v55 }
 0xbff   :  { %v1169_v54 = vshra.s32 %v4561_v55, 6  ;;  %v1144_v10 = vcvt.f32.s32 %v1143_v36  ;;  %v1267_v21 = vshra.s32 %v4565_v14, 16  ;;  %v1199_v44 = vsel %vm1183_vm4, %v1191_v25, %v1175_v31 }
 0xc00   :  { %6525 = vst [vmem:[#allocation25_spill] sm:$0xff] %v4574_v50  ;;  %vm1184_vm11 = vcmp.lt.s32.totalorder %v1176_v59, 0  ;;  %v1192_v46 = vxor.u32 2147483647, %v1176_v59  ;;  %vm1154_vm10 = vcmp.eq.s32.totalorder %v4397_v22, %v4574_v50  ;;  %v4585_v19 = vsel %vm3288_vm5, %v4473_v49, %v1199_v44 }
 0xc01   :  { %6526 = vst [vmem:[#allocation26_spill] sm:$0xff] %v4585_v19  ;;  %v1177_v15 = vmul.u32 64, %v1169_v54  ;;  %v1170_v28 = vshra.s32 %v4574_v50, 6  ;;  %v4588_v45 = vadd.s32 %v1146_v62, %v1144_v10  ;;  %v4590_v40 = vcvt.s32.f32 %v1267_v21 }
 0xc02   :  { %v1200_v42 = vsel %vm1184_vm11, %v1192_v46, %v1176_v59  ;;  %v4594_v31 = vsel %vm6499_vm1, %v4572_v33, 2147483648  ;;  %v4601_v36 = vsel %vm6488_vm12, %v4095_v37, %v4388_v2 }
 0xc03   :  { %6527 = vst [vmem:[#allocation27_spill] sm:$0xff] %v4588_v45  ;;  %v4605_v49 = vsel %vm3288_vm5, %v4488_v7, %v1200_v42  ;;  %vm1185_vm4 = vcmp.lt.s32.totalorder %v1177_v15, 0  ;;  %v1193_v62 = vxor.u32 2147483647, %v1177_v15  ;;  %v1178_v46 = vmul.u32 64, %v1170_v28  ;;  %1270 = vmax.xlane.f32.xlu0 %v4590_v40 }
 0xc04   :  { %6528 = vst [vmem:[#allocation28_spill] sm:$0xff] %v4605_v49  ;;  %vm6498_vm11 = vcmp.eq.s32.totalorder %v4408_v38, %v4588_v45  ;;  %v1171_v25 = vshra.s32 %v4588_v45, 6  ;;  %v1282_v59 = vshra.s32 %v4594_v31, 16  ;;  %v1295_v54 = vsel %vm6499_vm1, %v4601_v36, 2147483648 }
 0xc05   :  { %v1201_v10 = vsel %vm1185_vm4, %v1193_v62, %v1177_v15  ;;  %vm1186_vm12 = vcmp.lt.s32.totalorder %v1178_v46, 0  ;;  %v1194_v21 = vxor.u32 2147483647, %v1178_v46  ;;  %v1297_v42 = vshra.s32 %v1295_v54, 16  ;;  %v6545_v1 = vld [vmem:[#allocation24_spill] sm:$0xff] }
 0xc06   :  { %v4616_v7 = vsel %vm3288_vm5, %v4527_v23, %v1201_v10  ;;  %v1179_v44 = vmul.u32 64, %v1171_v25  ;;  %v1284_v28 = vcvt.s32.f32 %v1282_v59  ;;  %v4623_v49 = vsel %vm1154_vm10, %v4095_v37, %v4397_v22 }
 0xc07   :  { %6529 = vst [vmem:[#allocation29_spill] sm:$0xff] %v4616_v7  ;;  %6530 = vst [vmem:[#allocation30_spill] sm:$0xff] %v4623_v49  ;;  %v1202_v19 = vsel %vm1186_vm12, %v1194_v21, %v1178_v46  ;;  %v1299_v33 = vcvt.s32.f32 %v1297_v42  ;;  %v1310_v15 = vsel %vm6499_vm1, %v4623_v49, 2147483648  ;;  %v4632_v23 = vsel %vm6498_vm11, %v4095_v37, %v4408_v38 }
 0xc08   :  { %6531 = vst [vmem:[#allocation31_spill] sm:$0xff] %v4632_v23  ;;  %v4636_v62 = vsel %vm3288_vm5, %v4537_v52, %v1202_v19  ;;  %vm1187_vm4 = vcmp.lt.s32.totalorder %v1179_v44, 0  ;;  %v1195_v25 = vxor.u32 2147483647, %v1179_v44  ;;  %1285 = vmax.xlane.f32.xlu1 %v1284_v28  ;;  %v1312_v59 = vshra.s32 %v1310_v15, 16 }
 0xc09   :  { %6532 = vst [vmem:[#allocation32_spill] sm:$0xff] %v4636_v62  ;;  %1300 = vmax.xlane.f32.xlu0 %v1299_v33  ;;  %v1325_v46 = vsel %vm6499_vm1, %v4632_v23, 2147483648  ;;  %v6533_v10 = vxor.u32 2147483647, %v4516_v47  ;;  %v1236_v62 = vand.u32 65535, %v4467_v53  ;;  %v1221_v23 = vand.u32 65535, %v4496_v5 }
 0xc0a   :  { %v1203_v42 = vsel %vm1187_vm4, %v1195_v25, %v1179_v44  ;;  %v1314_v7 = vcvt.s32.f32 %v1312_v59  ;;  %v1327_v49 = vshra.s32 %v1325_v46, 16  ;;  %v1251_v25 = vand.u32 65535, %v4524_v34 }
 0xc0b   :  { %v1011_v21 = vsel %vm995_vm13, %v6533_v10, %v4516_v47  ;;  %v1238_v38 = vcvt.s32.f32 %v1236_v62  ;;  %v1223_v44 = vcvt.s32.f32 %v1221_v23  ;;  %v1281_v5 = vand.u32 65535, %v4594_v31 }
 0xc0c   :  { %v4646_v52 = vsel %vm3288_vm5, %v1011_v21, %v1203_v42  ;;  %1315 = vmax.xlane.f32.xlu1 %v1314_v7  ;;  %v1329_v19 = vcvt.s32.f32 %v1327_v49  ;;  %v1253_v10 = vcvt.s32.f32 %v1251_v25  ;;  %v1311_v21 = vand.u32 65535, %v1310_v15 }
 0xc0d   :  { %v1283_v23 = vcvt.s32.f32 %v1281_v5 }
 0xc0e   :  { %1330 = vmax.xlane.f32.xlu0 %v1329_v19 }
 0xc7f   :  { %v1241_v45 = vpop.xlane.xlu0 %1240 }
 0xc80   :  { %vm1242_vm12 = vcmp.eq.f32.partialorder %v4478_v41, %v1241_v45  ;;  %v1266_v41 = vand.u32 65535, %v4565_v14 }
 0xc81   :  { %v1243_v50 = vsel %vm1242_vm12, %v1238_v38, -inf }
 0xc82   :  { %1244 = vmax.xlane.f32.xlu0 %v1243_v50  ;;  %v1268_v38 = vcvt.s32.f32 %v1266_v41 }
 0xc83   :  { %v1226_v47 = vpop.xlane.xlu1 %1225 }
 0xc84   :  { %vm1227_vm13 = vcmp.eq.f32.partialorder %v4506_v60, %v1226_v47  ;;  %v1296_v60 = vand.u32 65535, %v1295_v54  ;;  %v1232_v41 = vcvt.f32.s32 %v1226_v47 }
 0xc85   :  { %v1228_v59 = vsel %vm1227_vm13, %v1223_v44, -inf  ;;  %v1326_v44 = vand.u32 65535, %v1325_v46 }
 0xc86   :  { %1229 = vmax.xlane.f32.xlu1 %v1228_v59  ;;  %v1298_v14 = vcvt.s32.f32 %v1296_v60 }
 0xc87   :  { %v1328_v15 = vcvt.s32.f32 %v1326_v44 }
 0xc88   :  { %v1256_v49 = vpop.xlane.xlu1 %1255 }
 0xc89   :  { %vm1257_vm5 = vcmp.eq.f32.partialorder %v4534_v17, %v1256_v49 }
 0xc8a   :  { %v1258_v53 = vsel %vm1257_vm5, %v1253_v10, -inf  ;;  %v1247_v10 = vcvt.f32.s32 %v1241_v45 }
 0xc8b   :  { %1259 = vmax.xlane.f32.xlu1 %v1258_v53 }
 0xc8c   :  { %v1248_v46 = vshll.u32 %v1247_v10, 16 }
 0xc90   :  { %v4655_v62 = vpop.xlane.xlu0 %1270 }
 0xc91   :  { %vm1272_vm4 = vcmp.eq.f32.partialorder %v4590_v40, %v4655_v62  ;;  %v1313_v40 = vcvt.s32.f32 %v1311_v21  ;;  %v1277_v35 = vcvt.f32.s32 %v4655_v62 }
 0xc92   :  { %v1273_v34 = vsel %vm1272_vm4, %v1268_v38, -inf }
 0xc93   :  { %1274 = vmax.xlane.f32.xlu0 %v1273_v34  ;;  %v1262_v34 = vcvt.f32.s32 %v1256_v49 }
 0xc95   :  { %v4660_v50 = vpop.xlane.xlu1 %1285 }
 0xc96   :  { %vm1287_vm12 = vcmp.eq.f32.partialorder %v1284_v28, %v4660_v50  ;;  %v4663_v17 = vpop.xlane.xlu0 %1300  ;;  %v1292_v62 = vcvt.f32.s32 %v4660_v50 }
 0xc97   :  { %v1288_v42 = vsel %vm1287_vm12, %v1283_v23, -inf  ;;  %vm1302_vm13 = vcmp.eq.f32.partialorder %v1299_v33, %v4663_v17  ;;  %vm1157_vm12 = vmor %vm965_vm6, %vm1149_vm3  ;;  %vm3297_vm6 = vcmask 15360  }
 0xc98   :  { %1289 = vmax.xlane.f32.xlu1 %v1288_v42  ;;  %v1303_v31 = vsel %vm1302_vm13, %v1298_v14, -inf  ;;  %v1263_v14 = vshll.u32 %v1262_v34, 16  ;;  %v1293_v50 = vshll.u32 %v1292_v62, 16 }
 0xc99   :  { %v4666_v25 = vpop.xlane.xlu1 %1315  ;;  %1304 = vmax.xlane.f32.xlu0 %v1303_v31 }
 0xc9a   :  { %vm1317_vm5 = vcmp.eq.f32.partialorder %v1314_v7, %v4666_v25  ;;  %v1322_v34 = vcvt.f32.s32 %v4666_v25 }
 0xc9b   :  { %v1318_v54 = vsel %vm1317_vm5, %v1313_v40, -inf  ;;  %v4669_v59 = vpop.xlane.xlu0 %1330 }
 0xc9c   :  { %1319 = vmax.xlane.f32.xlu1 %v1318_v54  ;;  %vm1332_vm4 = vcmp.eq.f32.partialorder %v1329_v19, %v4669_v59  ;;  %v1233_v19 = vshll.u32 %v1232_v41, 16  ;;  %v1323_v27 = vshll.u32 %v1322_v34, 16  ;;  %v6558_v34 = vld [vmem:[#allocation20_spill] sm:$0xff] }
 0xc9d   :  { %v1333_v28 = vsel %vm1332_vm4, %v1328_v15, -inf  ;;  %vm1156_vm4 = vmor %vm964_vm7, %vm1148_vm2 }
 0xc9e   :  { %1334 = vmax.xlane.f32.xlu0 %v1333_v28  ;;  %vm1158_vm7 = vmor %vm966_vm8, %vm1150_vm0 }
 0xc9f   :  { %vm1159_vm8 = vmor %vm967_vm9, %vm1151_vm15  ;;  %vm6542_vm9 = vcmp.eq.s32.totalorder %v4265_v29, %v4346_v20 }
 0xca0   :  { %vm1160_vm15 = vmor %vm6542_vm9, %vm1152_vm14 }
 0xd0f   :  { %v1245_v33 = vpop.xlane.xlu0 %1244 }
 0xd10   :  { %v1246_v53 = vcvt.f32.s32 %v1245_v33 }
 0xd12   :  { %v1249_v38 = vadd.s32 %v1248_v46, %v1246_v53 }
 0xd13   :  { %v1230_v5 = vpop.xlane.xlu1 %1229 }
 0xd14   :  { %vm1341_vm13 = vcmp.eq.s32.totalorder %v4462_v39, %v1249_v38  ;;  %v1357_v7 = vshra.s32 %v1249_v38, 6  ;;  %v1231_v45 = vcvt.f32.s32 %v1230_v5  ;;  %v1278_v38 = vshll.u32 %v1277_v35, 16 }
 0xd15   :  { %vm4679_vm5 = vmor %vm1157_vm12, %vm1341_vm13  ;;  %v4685_v47 = vsel %vm1341_vm13, %v4095_v37, %v4462_v39  ;;  %v1307_v5 = vcvt.f32.s32 %v4663_v17 }
 0xd16   :  { %v1365_v18 = vmul.u32 64, %v1357_v7  ;;  %v4689_v48 = vsel %vm6499_vm1, %v4685_v47, 2147483648  ;;  %v1234_v58 = vadd.s32 %v1233_v19, %v1231_v45 }
 0xd17   :  { %v1429_v51 = vshra.s32 %v4689_v48, 16 }
 0xd18   :  { %vm1373_vm3 = vcmp.lt.s32.totalorder %v1365_v18, 0  ;;  %v1381_v23 = vxor.u32 2147483647, %v1365_v18  ;;  %vm1340_vm12 = vcmp.eq.s32.totalorder %v4485_v32, %v1234_v58  ;;  %v1356_v39 = vshra.s32 %v1234_v58, 6  ;;  %v1260_v49 = vpop.xlane.xlu1 %1259 }
 0xd19   :  { %v4699_v21 = vcvt.s32.f32 %v1429_v51  ;;  %vm4701_vm13 = vmor %vm1156_vm4, %vm1340_vm12  ;;  %v1261_v31 = vcvt.f32.s32 %v1260_v49  ;;  %v4707_v11 = vsel %vm1340_vm12, %v4095_v37, %v4485_v32 }
 0xd1a   :  { %v1389_v42 = vsel %vm1373_vm3, %v1381_v23, %v1365_v18  ;;  %v1364_v63 = vmul.u32 64, %v1356_v39  ;;  %v4716_v57 = vsel %vm6499_vm1, %v4707_v11, 2147483648  ;;  %v1337_v18 = vcvt.f32.s32 %v4669_v59 }
 0xd1b   :  { %v4711_v3 = vsel %vm3297_vm6, %v4491_v4, %v1389_v42  ;;  %1432 = vmax.xlane.f32.xlu0 %v4699_v21  ;;  %v1264_v40 = vadd.s32 %v1263_v14, %v1261_v31  ;;  %v1414_v54 = vshra.s32 %v4716_v57, 16  ;;  %v1308_v23 = vshll.u32 %v1307_v5, 16  ;;  %v6555_v5 = vld [vmem:[#allocation23_spill] sm:$0xff] }
 0xd1c   :  { %vm1372_vm2 = vcmp.lt.s32.totalorder %v1364_v63, 0  ;;  %v1380_v15 = vxor.u32 2147483647, %v1364_v63  ;;  %v1338_v49 = vshll.u32 %v1337_v18, 16  ;;  %v6559_v18 = vld [vmem:[#allocation22_spill] sm:$0xff] }
 0xd1d   :  { %vm1342_vm3 = vcmp.eq.s32.totalorder %v4514_v8, %v1264_v40  ;;  %v1358_v32 = vshra.s32 %v1264_v40, 6  ;;  %v4726_v4 = vcvt.s32.f32 %v1414_v54 }
 0xd1e   :  { %v1388_v28 = vsel %vm1372_vm2, %v1380_v15, %v1364_v63  ;;  %vm4728_vm4 = vmor %vm1158_vm7, %vm1342_vm3  ;;  %v4734_v33 = vsel %vm1342_vm3, %v4095_v37, %v4514_v8  ;;  %vm6543_vm7 = vcmp.eq.s32.totalorder %v4388_v2, %v4561_v55  ;;  %vm6544_vm3 = vcmp.eq.s32.totalorder %v4268_v30, %v4354_v56 }
 0xd1f   :  { %v4739_v13 = vsel %vm3297_vm6, %v4519_v61, %v1388_v28  ;;  %v1366_v12 = vmul.u32 64, %v1358_v32  ;;  %1417 = vmax.xlane.f32.xlu1 %v4726_v4  ;;  %v4744_v24 = vsel %vm6499_vm1, %v4734_v33, 2147483648  ;;  %v6550_v32 = vld [vmem:[#allocation26_spill] sm:$0xff] }
 0xd20   :  { %v1444_v46 = vshra.s32 %v4744_v24, 16  ;;  %v1275_v41 = vpop.xlane.xlu0 %1274 }
 0xd21   :  { %vm1374_vm0 = vcmp.lt.s32.totalorder %v1366_v12, 0  ;;  %v1382_v53 = vxor.u32 2147483647, %v1366_v12  ;;  %v1276_v61 = vcvt.f32.s32 %v1275_v41  ;;  %v6552_v41 = vld [vmem:[#allocation19_spill] sm:$0xff] }
 0xd22   :  { %v4747_v8 = vcvt.s32.f32 %v1444_v46 }
 0xd23   :  { %v1390_v7 = vsel %vm1374_vm0, %v1382_v53, %v1366_v12  ;;  %v1279_v45 = vadd.s32 %v1278_v38, %v1276_v61  ;;  %vm1161_vm0 = vmor %vm6544_vm3, %vm6543_vm7  ;;  %v6553_v38 = vld [vmem:[#allocation21_spill] sm:$0xff]  ;;  %v6573_v53 = vld [vmem:[#allocation32_spill] sm:$0xff] }
 0xd24   :  { %v4753_v19 = vsel %vm3297_vm6, %v4543_v9, %v1390_v7  ;;  %1447 = vmax.xlane.f32.xlu1 %v4747_v8 }
 0xd25   :  { %v1290_v58 = vpop.xlane.xlu1 %1289  ;;  %vm1343_vm12 = vcmp.eq.s32.totalorder %v4556_v43, %v1279_v45  ;;  %v1359_v9 = vshra.s32 %v1279_v45, 6  ;;  %v6556_v45 = vld [vmem:[#allocation27_spill] sm:$0xff] }
 0xd26   :  { %v1291_v17 = vcvt.f32.s32 %v1290_v58  ;;  %v1305_v51 = vpop.xlane.xlu0 %1304  ;;  %vm4765_vm2 = vmor %vm1159_vm8, %vm1343_vm12  ;;  %v4771_v59 = vsel %vm1343_vm12, %v4095_v37, %v4556_v43 }
 0xd27   :  { %v1306_v25 = vcvt.f32.s32 %v1305_v51  ;;  %v1367_v16 = vmul.u32 64, %v1359_v9  ;;  %v4775_v6 = vsel %vm6499_vm1, %v4771_v59, 2147483648  ;;  %v6564_v51 = vld [vmem:[#allocation31_spill] sm:$0xff] }
 0xd28   :  { %v1294_v0 = vadd.s32 %v1293_v50, %v1291_v17  ;;  %v1459_v43 = vshra.s32 %v4775_v6, 16  ;;  %v6561_v50 = vld [vmem:[#allocation30_spill] sm:$0xff] }
 0xd29   :  { %v1309_v14 = vadd.s32 %v1308_v23, %v1306_v25  ;;  %v1320_v42 = vpop.xlane.xlu1 %1319  ;;  %vm1375_vm8 = vcmp.lt.s32.totalorder %v1367_v16, 0  ;;  %v1383_v31 = vxor.u32 2147483647, %v1367_v16 }
 0xd2a   :  { %vm1344_vm12 = vcmp.eq.s32.totalorder %v6545_v1, %v1294_v0  ;;  %v1360_v26 = vshra.s32 %v1294_v0, 6  ;;  %v1321_v63 = vcvt.f32.s32 %v1320_v42  ;;  %v4796_v54 = vcvt.s32.f32 %v1459_v43 }
 0xd2b   :  { %vm4791_vm11 = vmor %vm1160_vm15, %vm1344_vm12  ;;  %vm6500_vm14 = vcmp.eq.s32.totalorder %v4601_v36, %v1309_v14  ;;  %v1361_v20 = vshra.s32 %v1309_v14, 6  ;;  %v1335_v40 = vpop.xlane.xlu0 %1334  ;;  %v1391_v2 = vsel %vm1375_vm8, %v1383_v31, %v1367_v16  ;;  %v4806_v15 = vsel %vm1344_vm12, %v4095_v37, %v6545_v1  ;;  %v6565_v16 = vld [vmem:[#allocation28_spill] sm:$0xff]  ;;  %v6569_v31 = vld [vmem:[#allocation29_spill] sm:$0xff] }
 0xd2c   :  { %v1368_v55 = vmul.u32 64, %v1360_v26  ;;  %vm4800_vm9 = vmor %vm1161_vm0, %vm6500_vm14  ;;  %v1336_v56 = vcvt.f32.s32 %v1335_v40  ;;  %v4810_v28 = vsel %vm3297_vm6, %v6550_v32, %v1391_v2  ;;  %v1324_v12 = vadd.s32 %v1323_v27, %v1321_v63  ;;  %1462 = vmax.xlane.f32.xlu0 %v4796_v54 }
 0xd2d   :  { %v1369_v35 = vmul.u32 64, %v1361_v20  ;;  %v4815_v46 = vsel %vm6499_vm1, %v4806_v15, 2147483648  ;;  %vm6554_vm15 = vcmp.eq.s32.totalorder %v6552_v41, %v6553_v38  ;;  %vm6557_vm0 = vcmp.eq.s32.totalorder %v6555_v5, %v6556_v45 }
 0xd2e   :  { %vm1162_vm7 = vmor %vm6554_vm15, %vm1154_vm10  ;;  %vm1376_vm3 = vcmp.lt.s32.totalorder %v1368_v55, 0  ;;  %v1384_v62 = vxor.u32 2147483647, %v1368_v55  ;;  %v1339_v7 = vadd.s32 %v1338_v49, %v1336_v56  ;;  %v1474_v61 = vshra.s32 %v4815_v46, 16 }
 0xd2f   :  { %vm6560_vm8 = vcmp.eq.s32.totalorder %v6558_v34, %v6559_v18  ;;  %vm1377_vm1 = vcmp.lt.s32.totalorder %v1369_v35, 0  ;;  %v1385_v58 = vxor.u32 2147483647, %v1369_v35  ;;  %vm1346_vm14 = vcmp.eq.s32.totalorder %v6561_v50, %v1324_v12 }
 0xd30   :  { %vm1163_vm12 = vmor %vm6560_vm8, %vm6557_vm0  ;;  %v1362_v22 = vshra.s32 %v1324_v12, 6  ;;  %v1392_v9 = vsel %vm1376_vm3, %v1384_v62, %v1368_v55  ;;  %vm1347_vm15 = vcmp.eq.s32.totalorder %v6564_v51, %v1339_v7  ;;  %v1363_v23 = vshra.s32 %v1339_v7, 6 }
 0xd31   :  { %vm4833_vm10 = vmor %vm1162_vm7, %vm1346_vm14  ;;  %v1476_v25 = vcvt.s32.f32 %v1474_v61  ;;  %v4840_v0 = vsel %vm3297_vm6, %v6565_v16, %v1392_v9  ;;  %v1393_v27 = vsel %vm1377_vm1, %v1385_v58, %v1369_v35  ;;  %vm6568_vm7 = vcmp.eq.s32.totalorder %v4601_v36, %v1309_v14 }
 0xd32   :  { %v1370_v49 = vmul.u32 64, %v1362_v22  ;;  %vm4844_vm0 = vmor %vm1163_vm12, %vm1347_vm15  ;;  %v4852_v43 = vsel %vm6568_vm7, %v4095_v37, %v4601_v36  ;;  %v4856_v1 = vsel %vm3297_vm6, %v6569_v31, %v1393_v27  ;;  %v1371_v26 = vmul.u32 64, %v1363_v23 }
 0xd33   :  { %1477 = vmax.xlane.f32.xlu1 %v1476_v25  ;;  %vm6570_vm1 = vcmask 523264   ;;  %v4864_v63 = vsel %vm1346_vm14, %v4095_v37, %v6561_v50  ;;  %v4872_v56 = vsel %vm1347_vm15, %v4095_v37, %v6564_v51  ;;  %v1428_v45 = vand.u32 65535, %v4689_v48 }
 0xd34   :  { %v1487_v20 = vsel %vm6570_vm1, %v4852_v43, 2147483648  ;;  %vm1378_vm3 = vcmp.lt.s32.totalorder %v1370_v49, 0  ;;  %v1386_v40 = vxor.u32 2147483647, %v1370_v49  ;;  %vm6571_vm8 = vmmov %vm6570_vm1  ;;  %vm1379_vm12 = vcmp.lt.s32.totalorder %v1371_v26, 0 }
 0xd35   :  { %v1489_v14 = vshra.s32 %v1487_v20, 16  ;;  %v1502_v36 = vsel %vm6571_vm8, %v4864_v63, 2147483648  ;;  %v1387_v2 = vxor.u32 2147483647, %v1371_v26  ;;  %vm6572_vm14 = vmmov %vm6570_vm1  ;;  %v1430_v18 = vcvt.s32.f32 %v1428_v45 }
 0xd36   :  { %v1504_v55 = vshra.s32 %v1502_v36, 16  ;;  %v1394_v32 = vsel %vm1378_vm3, %v1386_v40, %v1370_v49  ;;  %v1517_v12 = vsel %vm6572_vm14, %v4872_v56, 2147483648  ;;  %v1413_v58 = vand.u32 65535, %v4716_v57 }
 0xd37   :  { %v1491_v35 = vcvt.s32.f32 %v1489_v14  ;;  %v4878_v41 = vsel %vm3297_vm6, %v6573_v53, %v1394_v32  ;;  %v1395_v38 = vsel %vm1379_vm12, %v1387_v2, %v1371_v26  ;;  %v1519_v61 = vshra.s32 %v1517_v12, 16 }
 0xd38   :  { %v1506_v62 = vcvt.s32.f32 %v1504_v55  ;;  %v4882_v5 = vsel %vm3297_vm6, %v4646_v52, %v1395_v38  ;;  %v1415_v9 = vcvt.s32.f32 %v1413_v58  ;;  %v1443_v52 = vand.u32 65535, %v4744_v24 }
 0xd39   :  { %1492 = vmax.xlane.f32.xlu0 %v1491_v35  ;;  %v1521_v7 = vcvt.s32.f32 %v1519_v61  ;;  %v1503_v40 = vand.u32 65535, %v1502_v36  ;;  %v1518_v2 = vand.u32 65535, %v1517_v12 }
 0xd3a   :  { %1507 = vmax.xlane.f32.xlu1 %v1506_v62  ;;  %v1445_v16 = vcvt.s32.f32 %v1443_v52 }
 0xd3d   :  { %1522 = vmax.xlane.f32.xlu0 %v1521_v7 }
 0xda8   :  { %v1433_v34 = vpop.xlane.xlu0 %1432 }
 0xda9   :  { %vm1434_vm15 = vcmp.eq.f32.partialorder %v4699_v21, %v1433_v34  ;;  %v1458_v21 = vand.u32 65535, %v4775_v6  ;;  %v1439_v53 = vcvt.f32.s32 %v1433_v34 }
 0xdaa   :  { %v1435_v50 = vsel %vm1434_vm15, %v1430_v18, -inf }
 0xdab   :  { %1436 = vmax.xlane.f32.xlu0 %v1435_v50  ;;  %v1460_v57 = vcvt.s32.f32 %v1458_v21  ;;  %v1440_v38 = vshll.u32 %v1439_v53, 16 }
 0xdac   :  { %v1418_v22 = vpop.xlane.xlu1 %1417 }
 0xdad   :  { %vm1419_vm7 = vcmp.eq.f32.partialorder %v4726_v4, %v1418_v22  ;;  %v1473_v4 = vand.u32 65535, %v4815_v46  ;;  %v1424_v45 = vcvt.f32.s32 %v1418_v22 }
 0xdae   :  { %v1420_v51 = vsel %vm1419_vm7, %v1415_v9, -inf }
 0xdaf   :  { %1421 = vmax.xlane.f32.xlu1 %v1420_v51  ;;  %v1475_v31 = vcvt.s32.f32 %v1473_v4  ;;  %v1425_v58 = vshll.u32 %v1424_v45, 16 }
 0xdb1   :  { %v1448_v23 = vpop.xlane.xlu1 %1447 }
 0xdb2   :  { %vm1449_vm6 = vcmp.eq.f32.partialorder %v4747_v8, %v1448_v23  ;;  %v1488_v8 = vand.u32 65535, %v1487_v20  ;;  %v1520_v20 = vcvt.s32.f32 %v1518_v2  ;;  %v1454_v9 = vcvt.f32.s32 %v1448_v23 }
 0xdb3   :  { %v1450_v48 = vsel %vm1449_vm6, %v1445_v16, -inf  ;;  %vm6576_vm6 = vcmask 523264  }
 0xdb4   :  { %1451 = vmax.xlane.f32.xlu1 %v1450_v48  ;;  %v1490_v14 = vcvt.s32.f32 %v1488_v8 }
 0xdb9   :  { %v4891_v27 = vpop.xlane.xlu0 %1462 }
 0xdba   :  { %vm1464_vm1 = vcmp.eq.f32.partialorder %v4796_v54, %v4891_v27  ;;  %v1505_v54 = vcvt.s32.f32 %v1503_v40 }
 0xdbb   :  { %v1465_v49 = vsel %vm1464_vm1, %v1460_v57, -inf  ;;  %vm3306_vm1 = vcmask 23552  }
 0xdbc   :  { %1466 = vmax.xlane.f32.xlu0 %v1465_v49 }
 0xdc0   :  { %v4896_v24 = vpop.xlane.xlu1 %1477 }
 0xdc1   :  { %vm1479_vm3 = vcmp.eq.f32.partialorder %v1476_v25, %v4896_v24 }
 0xdc2   :  { %v1480_v26 = vsel %vm1479_vm3, %v1475_v31, -inf }
 0xdc3   :  { %1481 = vmax.xlane.f32.xlu1 %v1480_v26 }
 0xdc6   :  { %v4899_v6 = vpop.xlane.xlu0 %1492 }
 0xdc7   :  { %v4901_v55 = vpop.xlane.xlu1 %1507  ;;  %vm1494_vm8 = vcmp.eq.f32.partialorder %v1491_v35, %v4899_v6 }
 0xdc8   :  { %v1495_v46 = vsel %vm1494_vm8, %v1490_v14, -inf  ;;  %vm1509_vm12 = vcmp.eq.f32.partialorder %v1506_v62, %v4901_v55 }
 0xdc9   :  { %1496 = vmax.xlane.f32.xlu0 %v1495_v46  ;;  %v1510_v32 = vsel %vm1509_vm12, %v1505_v54, -inf  ;;  %vm6579_vm12 = vmmov %vm6576_vm6 }
 0xdca   :  { %1511 = vmax.xlane.f32.xlu1 %v1510_v32  ;;  %v4905_v25 = vpop.xlane.xlu0 %1522 }
 0xdcb   :  { %vm1524_vm14 = vcmp.eq.f32.partialorder %v1521_v7, %v4905_v25 }
 0xdcc   :  { %v1525_v36 = vsel %vm1524_vm14, %v1520_v20, -inf  ;;  %v1469_v20 = vcvt.f32.s32 %v4891_v27 }
 0xdcd   :  { %1526 = vmax.xlane.f32.xlu0 %v1525_v36 }
 0xdce   :  { %v1470_v45 = vshll.u32 %v1469_v20, 16 }
 0xe38   :  { %v1437_v12 = vpop.xlane.xlu0 %1436 }
 0xe39   :  { %v1438_v61 = vcvt.f32.s32 %v1437_v12 }
 0xe3b   :  { %v1441_v35 = vadd.s32 %v1440_v38, %v1438_v61 }
 0xe3c   :  { %v1422_v62 = vpop.xlane.xlu1 %1421 }
 0xe3d   :  { %vm1533_vm15 = vcmp.eq.s32.totalorder %v4685_v47, %v1441_v35  ;;  %v1549_v18 = vshra.s32 %v1441_v35, 6  ;;  %v1423_v7 = vcvt.f32.s32 %v1422_v62 }
 0xe3e   :  { %vm4911_vm7 = vmor %vm4679_vm5, %vm1533_vm15  ;;  %v4917_v34 = vsel %vm1533_vm15, %v4095_v37, %v4685_v47  ;;  %v1455_v47 = vshll.u32 %v1454_v9, 16 }
 0xe3f   :  { %v1557_v52 = vmul.u32 64, %v1549_v18  ;;  %v4921_v22 = vsel %vm6576_vm6, %v4917_v34, 2147483648  ;;  %v1426_v51 = vadd.s32 %v1425_v58, %v1423_v7  ;;  %v1499_v58 = vcvt.f32.s32 %v4899_v6 }
 0xe40   :  { %v1621_v16 = vshra.s32 %v4921_v22, 16 }
 0xe41   :  { %vm1565_vm3 = vcmp.lt.s32.totalorder %v1557_v52, 0  ;;  %v1573_v60 = vxor.u32 2147483647, %v1557_v52  ;;  %vm1532_vm5 = vcmp.eq.s32.totalorder %v4707_v11, %v1426_v51  ;;  %v1548_v48 = vshra.s32 %v1426_v51, 6  ;;  %v1452_v21 = vpop.xlane.xlu1 %1451 }
 0xe42   :  { %v4925_v57 = vcvt.s32.f32 %v1621_v16  ;;  %vm4929_vm8 = vmor %vm4701_vm13, %vm1532_vm5  ;;  %v1453_v49 = vcvt.f32.s32 %v1452_v21  ;;  %v4935_v31 = vsel %vm1532_vm5, %v4095_v37, %v4707_v11  ;;  %v1514_v16 = vcvt.f32.s32 %v4901_v55 }
 0xe43   :  { %v1581_v4 = vsel %vm1565_vm3, %v1573_v60, %v1557_v52  ;;  %v1556_v26 = vmul.u32 64, %v1548_v48  ;;  %v4944_v40 = vsel %vm6579_vm12, %v4935_v31, 2147483648  ;;  %vm6584_vm12 = vmmov %vm6576_vm6  ;;  %v1500_v39 = vshll.u32 %v1499_v58, 16 }
 0xe44   :  { %v4939_v8 = vsel %vm3306_vm1, %v4711_v3, %v1581_v4  ;;  %1624 = vmax.xlane.f32.xlu0 %v4925_v57  ;;  %v1456_v44 = vadd.s32 %v1455_v47, %v1453_v49  ;;  %v1606_v14 = vshra.s32 %v4944_v40, 16  ;;  %v1529_v4 = vcvt.f32.s32 %v4905_v25 }
 0xe45   :  { %vm1564_vm13 = vcmp.lt.s32.totalorder %v1556_v26, 0  ;;  %v1572_v2 = vxor.u32 2147483647, %v1556_v26  ;;  %v1515_v55 = vshll.u32 %v1514_v16, 16 }
 0xe46   :  { %vm1534_vm14 = vcmp.eq.s32.totalorder %v4734_v33, %v1456_v44  ;;  %v1550_v11 = vshra.s32 %v1456_v44, 6  ;;  %v4948_v54 = vcvt.s32.f32 %v1606_v14 }
 0xe47   :  { %v1580_v46 = vsel %vm1564_vm13, %v1572_v2, %v1556_v26  ;;  %vm4952_vm15 = vmor %vm4728_vm4, %vm1534_vm14  ;;  %v4958_v32 = vsel %vm1534_vm14, %v4095_v37, %v4734_v33 }
 0xe48   :  { %v4963_v36 = vsel %vm3306_vm1, %v4739_v13, %v1580_v46  ;;  %v1558_v53 = vmul.u32 64, %v1550_v11  ;;  %1609 = vmax.xlane.f32.xlu1 %v4948_v54  ;;  %v4968_v10 = vsel %vm6576_vm6, %v4958_v32, 2147483648  ;;  %v1484_v13 = vcvt.f32.s32 %v4896_v24 }
 0xe49   :  { %v1636_v12 = vshra.s32 %v4968_v10, 16  ;;  %v1467_v61 = vpop.xlane.xlu0 %1466 }
 0xe4a   :  { %vm1566_vm4 = vcmp.lt.s32.totalorder %v1558_v53, 0  ;;  %v1574_v38 = vxor.u32 2147483647, %v1558_v53  ;;  %v1468_v35 = vcvt.f32.s32 %v1467_v61  ;;  %v1485_v52 = vshll.u32 %v1484_v13, 16 }
 0xe4b   :  { %v4971_v33 = vcvt.s32.f32 %v1636_v12  ;;  %v1530_v61 = vshll.u32 %v1529_v4, 16 }
 0xe4c   :  { %v1582_v27 = vsel %vm1566_vm4, %v1574_v38, %v1558_v53  ;;  %v1471_v62 = vadd.s32 %v1470_v45, %v1468_v35 }
 0xe4d   :  { %v4976_v18 = vsel %vm3306_vm1, %v4753_v19, %v1582_v27  ;;  %1639 = vmax.xlane.f32.xlu1 %v4971_v33 }
 0xe4e   :  { %vm1535_vm3 = vcmp.eq.s32.totalorder %v4771_v59, %v1471_v62  ;;  %v1551_v7 = vshra.s32 %v1471_v62, 6 }
 0xe4f   :  { %vm4983_vm5 = vmor %vm4765_vm2, %vm1535_vm3  ;;  %v4989_v19 = vsel %vm1535_vm3, %v4095_v37, %v4771_v59 }
 0xe50   :  { %v1482_v9 = vpop.xlane.xlu1 %1481  ;;  %v1559_v60 = vmul.u32 64, %v1551_v7  ;;  %v4994_v6 = vsel %vm6584_vm12, %v4989_v19, 2147483648 }
 0xe51   :  { %v1483_v24 = vcvt.f32.s32 %v1482_v9  ;;  %v1651_v21 = vshra.s32 %v4994_v6, 16 }
 0xe52   :  { %vm1567_vm2 = vcmp.lt.s32.totalorder %v1559_v60, 0  ;;  %v1575_v47 = vxor.u32 2147483647, %v1559_v60 }
 0xe53   :  { %v1486_v48 = vadd.s32 %v1485_v52, %v1483_v24  ;;  %v4999_v26 = vcvt.s32.f32 %v1651_v21 }
 0xe54   :  { %v1583_v44 = vsel %vm1567_vm2, %v1575_v47, %v1559_v60 }
 0xe55   :  { %vm1536_vm13 = vcmp.eq.s32.totalorder %v4806_v15, %v1486_v48  ;;  %v1552_v49 = vshra.s32 %v1486_v48, 6  ;;  %v5013_v25 = vsel %vm3306_vm1, %v4810_v28, %v1583_v44  ;;  %1654 = vmax.xlane.f32.xlu0 %v4999_v26 }
 0xe56   :  { %v1497_v59 = vpop.xlane.xlu0 %1496  ;;  %vm5003_vm14 = vmor %vm4791_vm11, %vm1536_vm13  ;;  %v5009_v46 = vsel %vm1536_vm13, %v4095_v37, %v4806_v15 }
 0xe57   :  { %v1498_v2 = vcvt.f32.s32 %v1497_v59  ;;  %v1512_v11 = vpop.xlane.xlu1 %1511  ;;  %v1560_v20 = vmul.u32 64, %v1552_v49  ;;  %v5018_v29 = vsel %vm6576_vm6, %v5009_v46, 2147483648 }
 0xe58   :  { %v1513_v53 = vcvt.f32.s32 %v1512_v11  ;;  %v1666_v38 = vshra.s32 %v5018_v29, 16 }
 0xe59   :  { %v1501_v12 = vadd.s32 %v1500_v39, %v1498_v2  ;;  %vm1568_vm11 = vcmp.lt.s32.totalorder %v1560_v20, 0  ;;  %v1576_v45 = vxor.u32 2147483647, %v1560_v20 }
 0xe5a   :  { %v1516_v15 = vadd.s32 %v1515_v55, %v1513_v53  ;;  %v1527_v27 = vpop.xlane.xlu0 %1526  ;;  %v5022_v13 = vcvt.s32.f32 %v1666_v38 }
 0xe5b   :  { %vm1537_vm4 = vcmp.eq.s32.totalorder %v4852_v43, %v1501_v12  ;;  %v1553_v28 = vshra.s32 %v1501_v12, 6  ;;  %v1528_v35 = vcvt.f32.s32 %v1527_v27  ;;  %v1584_v62 = vsel %vm1568_vm11, %v1576_v45, %v1560_v20 }
 0xe5c   :  { %vm5026_vm3 = vmor %vm4800_vm9, %vm1537_vm4  ;;  %vm1538_vm12 = vcmp.eq.s32.totalorder %v4864_v63, %v1516_v15  ;;  %v1554_v7 = vshra.s32 %v1516_v15, 6  ;;  %v5033_v9 = vsel %vm1537_vm4, %v4095_v37, %v4852_v43  ;;  %v5037_v52 = vsel %vm3306_vm1, %v4840_v0, %v1584_v62  ;;  %1669 = vmax.xlane.f32.xlu1 %v5022_v13 }
 0xe5d   :  { %v1561_v24 = vmul.u32 64, %v1553_v28  ;;  %vm5041_vm2 = vmor %vm4833_vm10, %vm1538_vm12  ;;  %v1531_v16 = vadd.s32 %v1530_v61, %v1528_v35  ;;  %v5053_v0 = vsel %vm1538_vm12, %v4095_v37, %v4864_v63  ;;  %v1620_v45 = vand.u32 65535, %v4921_v22 }
 0xe5e   :  { %vm6591_vm9 = vmmov %vm6576_vm6  ;;  %v1562_v43 = vmul.u32 64, %v1554_v7  ;;  %v1635_v7 = vand.u32 65535, %v4968_v10 }
 0xe5f   :  { %v5048_v60 = vsel %vm6591_vm9, %v5033_v9, 2147483648  ;;  %vm1569_vm13 = vcmp.lt.s32.totalorder %v1561_v24, 0  ;;  %v1577_v17 = vxor.u32 2147483647, %v1561_v24  ;;  %vm1539_vm10 = vcmp.eq.s32.totalorder %v4872_v56, %v1531_v16  ;;  %vm6594_vm4 = vmmov %vm6591_vm9 }
 0xe60   :  { %v1681_v48 = vshra.s32 %v5048_v60, 16  ;;  %v1555_v21 = vshra.s32 %v1531_v16, 6  ;;  %vm1570_vm6 = vcmp.lt.s32.totalorder %v1562_v43, 0  ;;  %v1578_v39 = vxor.u32 2147483647, %v1562_v43  ;;  %vm5058_vm11 = vmor %vm4844_vm0, %vm1539_vm10 }
 0xe61   :  { %v1694_v49 = vsel %vm6594_vm4, %v5053_v0, 2147483648  ;;  %v1585_v59 = vsel %vm1569_vm13, %v1577_v17, %v1561_v24  ;;  %v5066_v44 = vsel %vm1539_vm10, %v4095_v37, %v4872_v56  ;;  %vm6595_vm0 = vmmov %vm6594_vm4  ;;  %v1622_v27 = vcvt.s32.f32 %v1620_v45 }
 0xe62   :  { %v1683_v4 = vcvt.s32.f32 %v1681_v48  ;;  %v1563_v63 = vmul.u32 64, %v1555_v21  ;;  %v1696_v55 = vshra.s32 %v1694_v49, 16  ;;  %v5070_v2 = vsel %vm3306_vm1, %v4856_v1, %v1585_v59 }
 0xe63   :  { %v1586_v42 = vsel %vm1570_vm6, %v1578_v39, %v1562_v43  ;;  %v1709_v11 = vsel %vm6595_vm0, %v5066_v44, 2147483648  ;;  %v1637_v16 = vcvt.s32.f32 %v1635_v7 }
 0xe64   :  { %1684 = vmax.xlane.f32.xlu0 %v1683_v4  ;;  %v5076_v20 = vsel %vm3306_vm1, %v4878_v41, %v1586_v42  ;;  %vm1571_vm12 = vcmp.lt.s32.totalorder %v1563_v63, 0  ;;  %v1579_v53 = vxor.u32 2147483647, %v1563_v63  ;;  %v1698_v12 = vcvt.s32.f32 %v1696_v55 }
 0xe65   :  { %v1711_v38 = vshra.s32 %v1709_v11, 16  ;;  %v1605_v41 = vand.u32 65535, %v4944_v40 }
 0xe66   :  { %v1587_v61 = vsel %vm1571_vm12, %v1579_v53, %v1563_v63  ;;  %1699 = vmax.xlane.f32.xlu1 %v1698_v12 }
 0xe67   :  { %v5080_v56 = vsel %vm3306_vm1, %v4882_v5, %v1587_v61  ;;  %v1713_v1 = vcvt.s32.f32 %v1711_v38  ;;  %v1607_v62 = vcvt.s32.f32 %v1605_v41 }
 0xe69   :  { %1714 = vmax.xlane.f32.xlu0 %v1713_v1 }
 0xed1   :  { %v1625_v15 = vpop.xlane.xlu0 %1624 }
 0xed2   :  { %vm1626_vm9 = vcmp.eq.f32.partialorder %v4925_v57, %v1625_v15  ;;  %v1650_v57 = vand.u32 65535, %v4994_v6  ;;  %v1695_v6 = vand.u32 65535, %v1694_v49  ;;  %v1631_v53 = vcvt.f32.s32 %v1625_v15 }
 0xed3   :  { %v1627_v28 = vsel %vm1626_vm9, %v1622_v27, -inf }
 0xed4   :  { %1628 = vmax.xlane.f32.xlu0 %v1627_v28  ;;  %v1652_v40 = vcvt.s32.f32 %v1650_v57  ;;  %v1697_v55 = vcvt.s32.f32 %v1695_v6 }
 0xed5   :  { %v1610_v35 = vpop.xlane.xlu1 %1609 }
 0xed6   :  { %vm1611_vm13 = vcmp.eq.f32.partialorder %v4948_v54, %v1610_v35  ;;  %v1665_v54 = vand.u32 65535, %v5018_v29  ;;  %v1710_v29 = vand.u32 65535, %v1709_v11  ;;  %v1616_v11 = vcvt.f32.s32 %v1610_v35 }
 0xed7   :  { %v1612_v5 = vsel %vm1611_vm13, %v1607_v62, -inf }
 0xed8   :  { %1613 = vmax.xlane.f32.xlu1 %v1612_v5  ;;  %v1667_v17 = vcvt.s32.f32 %v1665_v54 }
 0xeda   :  { %v1640_v24 = vpop.xlane.xlu1 %1639 }
 0xedb   :  { %vm1641_vm1 = vcmp.eq.f32.partialorder %v4971_v33, %v1640_v24  ;;  %v1680_v33 = vand.u32 65535, %v5048_v60  ;;  %v1712_v60 = vcvt.s32.f32 %v1710_v29  ;;  %v1646_v15 = vcvt.f32.s32 %v1640_v24 }
 0xedc   :  { %v1642_v22 = vsel %vm1641_vm1, %v1637_v16, -inf  ;;  %vm6598_vm1 = vcmask 523264  }
 0xedd   :  { %1643 = vmax.xlane.f32.xlu1 %v1642_v22  ;;  %v1682_v59 = vcvt.s32.f32 %v1680_v33 }
 0xee2   :  { %v5089_v43 = vpop.xlane.xlu0 %1654 }
 0xee3   :  { %vm1656_vm10 = vcmp.eq.f32.partialorder %v4999_v26, %v5089_v43 }
 0xee4   :  { %v1657_v48 = vsel %vm1656_vm10, %v1652_v40, -inf  ;;  %vm3315_vm10 = vcmask 31744   ;;  %v1647_v40 = vshll.u32 %v1646_v15, 16 }
 0xee5   :  { %1658 = vmax.xlane.f32.xlu0 %v1657_v48 }
 0xee9   :  { %v5094_v10 = vpop.xlane.xlu1 %1669 }
 0xeea   :  { %vm1671_vm6 = vcmp.eq.f32.partialorder %v5022_v13, %v5094_v10 }
 0xeeb   :  { %v1672_v21 = vsel %vm1671_vm6, %v1667_v17, -inf }
 0xeec   :  { %1673 = vmax.xlane.f32.xlu1 %v1672_v21 }
 0xef1   :  { %v5099_v39 = vpop.xlane.xlu0 %1684 }
 0xef2   :  { %vm1686_vm4 = vcmp.eq.f32.partialorder %v1683_v4, %v5099_v39  ;;  %v1632_v4 = vshll.u32 %v1631_v53, 16 }
 0xef3   :  { %v1687_v26 = vsel %vm1686_vm4, %v1682_v59, -inf  ;;  %v5102_v63 = vpop.xlane.xlu1 %1699 }
 0xef4   :  { %1688 = vmax.xlane.f32.xlu0 %v1687_v26  ;;  %vm1701_vm0 = vcmp.eq.f32.partialorder %v1698_v12, %v5102_v63  ;;  %v1617_v12 = vshll.u32 %v1616_v11, 16 }
 0xef5   :  { %v1702_v42 = vsel %vm1701_vm0, %v1697_v55, -inf  ;;  %vm6601_vm0 = vmmov %vm6598_vm1 }
 0xef6   :  { %1703 = vmax.xlane.f32.xlu1 %v1702_v42  ;;  %v5105_v13 = vpop.xlane.xlu0 %1714 }
 0xef7   :  { %vm1716_vm12 = vcmp.eq.f32.partialorder %v1713_v1, %v5105_v13 }
 0xef8   :  { %v1717_v49 = vsel %vm1716_vm12, %v1712_v60, -inf  ;;  %v1661_v60 = vcvt.f32.s32 %v5089_v43 }
 0xef9   :  { %1718 = vmax.xlane.f32.xlu0 %v1717_v49 }
 0xefa   :  { %v1662_v11 = vshll.u32 %v1661_v60, 16 }
 0xf61   :  { %v1629_v38 = vpop.xlane.xlu0 %1628 }
 0xf62   :  { %v1630_v61 = vcvt.f32.s32 %v1629_v38 }
 0xf64   :  { %v1633_v45 = vadd.s32 %v1632_v4, %v1630_v61 }
 0xf65   :  { %v1614_v41 = vpop.xlane.xlu1 %1613 }
 0xf66   :  { %vm1725_vm9 = vcmp.eq.s32.totalorder %v4917_v34, %v1633_v45  ;;  %v1741_v27 = vshra.s32 %v1633_v45, 6  ;;  %v1615_v28 = vcvt.f32.s32 %v1614_v41 }
 0xf67   :  { %v5111_v62 = vsel %vm1725_vm9, %v4095_v37, %v4917_v34  ;;  %vm5115_vm13 = vmor %vm4911_vm7, %vm1725_vm9 }
 0xf68   :  { %v1749_v7 = vmul.u32 64, %v1741_v27  ;;  %v5121_v35 = vsel %vm6598_vm1, %v5111_v62, 2147483648  ;;  %v1618_v5 = vadd.s32 %v1617_v12, %v1615_v28  ;;  %vm6604_vm1 = vmmov %vm6601_vm0 }
 0xf69   :  { %v1813_v16 = vshra.s32 %v5121_v35, 16 }
 0xf6a   :  { %vm1757_vm6 = vcmp.lt.s32.totalorder %v1749_v7, 0  ;;  %v1765_v22 = vxor.u32 2147483647, %v1749_v7  ;;  %vm1724_vm4 = vcmp.eq.s32.totalorder %v4935_v31, %v1618_v5  ;;  %v1740_v34 = vshra.s32 %v1618_v5, 6  ;;  %v1644_v50 = vpop.xlane.xlu1 %1643 }
 0xf6b   :  { %v5125_v57 = vcvt.s32.f32 %v1813_v16  ;;  %v1645_v24 = vcvt.f32.s32 %v1644_v50  ;;  %v5129_v48 = vsel %vm1724_vm4, %v4095_v37, %v4935_v31  ;;  %vm5133_vm7 = vmor %vm4929_vm8, %vm1724_vm4 }
 0xf6c   :  { %v1773_v54 = vsel %vm1757_vm6, %v1765_v22, %v1749_v7  ;;  %v1748_v21 = vmul.u32 64, %v1740_v34  ;;  %v5144_v6 = vsel %vm6601_vm0, %v5129_v48, 2147483648 }
 0xf6d   :  { %v5139_v33 = vsel %vm3315_vm10, %v4939_v8, %v1773_v54  ;;  %1816 = vmax.xlane.f32.xlu0 %v5125_v57  ;;  %v1648_v59 = vadd.s32 %v1647_v40, %v1645_v24  ;;  %v1798_v31 = vshra.s32 %v5144_v6, 16 }
 0xf6e   :  { %vm1756_vm12 = vcmp.lt.s32.totalorder %v1748_v21, 0  ;;  %v1764_v23 = vxor.u32 2147483647, %v1748_v21 }
 0xf6f   :  { %vm1726_vm8 = vcmp.eq.s32.totalorder %v4958_v32, %v1648_v59  ;;  %v1742_v26 = vshra.s32 %v1648_v59, 6  ;;  %v5148_v29 = vcvt.s32.f32 %v1798_v31 }
 0xf70   :  { %v1772_v55 = vsel %vm1756_vm12, %v1764_v23, %v1748_v21  ;;  %v5152_v8 = vsel %vm1726_vm8, %v4095_v37, %v4958_v32  ;;  %vm5156_vm9 = vmor %vm4952_vm15, %vm1726_vm8 }
 0xf71   :  { %v5163_v49 = vsel %vm3315_vm10, %v4963_v36, %v1772_v55  ;;  %v1750_v53 = vmul.u32 64, %v1742_v26  ;;  %1801 = vmax.xlane.f32.xlu1 %v5148_v29  ;;  %v5168_v38 = vsel %vm6604_vm1, %v5152_v8, 2147483648  ;;  %v1676_v36 = vcvt.f32.s32 %v5094_v10  ;;  %vm6609_vm1 = vmmov %vm6601_vm0 }
 0xf72   :  { %v1828_v32 = vshra.s32 %v5168_v38, 16  ;;  %v1659_v4 = vpop.xlane.xlu0 %1658 }
 0xf73   :  { %vm1758_vm6 = vcmp.lt.s32.totalorder %v1750_v53, 0  ;;  %v1766_v3 = vxor.u32 2147483647, %v1750_v53  ;;  %v1660_v45 = vcvt.f32.s32 %v1659_v4  ;;  %v1677_v15 = vshll.u32 %v1676_v36, 16 }
 0xf74   :  { %v5171_v61 = vcvt.s32.f32 %v1828_v32 }
 0xf75   :  { %v1774_v43 = vsel %vm1758_vm6, %v1766_v3, %v1750_v53  ;;  %v1663_v41 = vadd.s32 %v1662_v11, %v1660_v45 }
 0xf76   :  { %v5176_v27 = vsel %vm3315_vm10, %v4976_v18, %v1774_v43  ;;  %1831 = vmax.xlane.f32.xlu1 %v5171_v61  ;;  %v1691_v18 = vcvt.f32.s32 %v5099_v39 }
 0xf77   :  { %vm1727_vm15 = vcmp.eq.s32.totalorder %v4989_v19, %v1663_v41  ;;  %v1743_v12 = vshra.s32 %v1663_v41, 6 }
 0xf78   :  { %v5182_v5 = vsel %vm1727_vm15, %v4095_v37, %v4989_v19  ;;  %vm5186_vm4 = vmor %vm4983_vm5, %vm1727_vm15  ;;  %v1706_v19 = vcvt.f32.s32 %v5102_v63  ;;  %v1692_v21 = vshll.u32 %v1691_v18, 16  ;;  %v1721_v63 = vcvt.f32.s32 %v5105_v13 }
 0xf79   :  { %v1674_v28 = vpop.xlane.xlu1 %1673  ;;  %v1751_v16 = vmul.u32 64, %v1743_v12  ;;  %v5193_v22 = vsel %vm6601_vm0, %v5182_v5, 2147483648 }
 0xf7a   :  { %v1675_v7 = vcvt.f32.s32 %v1674_v28  ;;  %v1843_v50 = vshra.s32 %v5193_v22, 16  ;;  %v1707_v32 = vshll.u32 %v1706_v19, 16  ;;  %v1722_v11 = vshll.u32 %v1721_v63, 16 }
 0xf7b   :  { %vm1759_vm12 = vcmp.lt.s32.totalorder %v1751_v16, 0  ;;  %v1767_v40 = vxor.u32 2147483647, %v1751_v16 }
 0xf7c   :  { %v1678_v34 = vadd.s32 %v1677_v15, %v1675_v7  ;;  %v5198_v24 = vcvt.s32.f32 %v1843_v50 }
 0xf7d   :  { %v1775_v39 = vsel %vm1759_vm12, %v1767_v40, %v1751_v16 }
 0xf7e   :  { %vm1728_vm8 = vcmp.eq.s32.totalorder %v5009_v46, %v1678_v34  ;;  %v1744_v51 = vshra.s32 %v1678_v34, 6  ;;  %v5213_v26 = vsel %vm3315_vm10, %v5013_v25, %v1775_v39  ;;  %1846 = vmax.xlane.f32.xlu0 %v5198_v24 }
 0xf7f   :  { %v5202_v31 = vsel %vm1728_vm8, %v4095_v37, %v5009_v46  ;;  %vm5206_vm5 = vmor %vm5003_vm14, %vm1728_vm8 }
 0xf80   :  { %v1752_v55 = vmul.u32 64, %v1744_v51  ;;  %v5218_v60 = vsel %vm6609_vm1, %v5202_v31, 2147483648  ;;  %vm6614_vm1 = vmmov %vm6601_vm0 }
 0xf81   :  { %v1689_v54 = vpop.xlane.xlu0 %1688  ;;  %v1858_v14 = vshra.s32 %v5218_v60, 16 }
 0xf82   :  { %v1690_v59 = vcvt.f32.s32 %v1689_v54  ;;  %vm1760_vm14 = vcmp.lt.s32.totalorder %v1752_v55, 0  ;;  %v1768_v3 = vxor.u32 2147483647, %v1752_v55 }
 0xf83   :  { %v1704_v53 = vpop.xlane.xlu1 %1703  ;;  %v5222_v25 = vcvt.s32.f32 %v1858_v14 }
 0xf84   :  { %v1693_v46 = vadd.s32 %v1692_v21, %v1690_v59  ;;  %v1705_v4 = vcvt.f32.s32 %v1704_v53  ;;  %v1776_v43 = vsel %vm1760_vm14, %v1768_v3, %v1752_v55 }
 0xf85   :  { %v5236_v28 = vsel %vm3315_vm10, %v5037_v52, %v1776_v43  ;;  %1861 = vmax.xlane.f32.xlu1 %v5222_v25 }
 0xf86   :  { %vm1729_vm6 = vcmp.eq.s32.totalorder %v5033_v9, %v1693_v46  ;;  %v1745_v13 = vshra.s32 %v1693_v46, 6  ;;  %v1708_v45 = vadd.s32 %v1707_v32, %v1705_v4  ;;  %v1719_v36 = vpop.xlane.xlu0 %1718 }
 0xf87   :  { %v5226_v41 = vsel %vm1729_vm6, %v4095_v37, %v5033_v9  ;;  %vm5230_vm15 = vmor %vm5026_vm3, %vm1729_vm6  ;;  %v1720_v7 = vcvt.f32.s32 %v1719_v36 }
 0xf88   :  { %v1753_v15 = vmul.u32 64, %v1745_v13  ;;  %v5241_v18 = vsel %vm6601_vm0, %v5226_v41, 2147483648  ;;  %vm1730_vm12 = vcmp.eq.s32.totalorder %v5053_v0, %v1708_v45  ;;  %v1746_v9 = vshra.s32 %v1708_v45, 6 }
 0xf89   :  { %v1873_v58 = vshra.s32 %v5241_v18, 16  ;;  %v1723_v34 = vadd.s32 %v1722_v11, %v1720_v7  ;;  %v5247_v52 = vsel %vm1730_vm12, %v4095_v37, %v5053_v0  ;;  %vm5251_vm8 = vmor %vm5041_vm2, %vm1730_vm12  ;;  %v1812_v13 = vand.u32 65535, %v5121_v35 }
 0xf8a   :  { %vm1761_vm3 = vcmp.lt.s32.totalorder %v1753_v15, 0  ;;  %v1769_v16 = vxor.u32 2147483647, %v1753_v15  ;;  %v1754_v40 = vmul.u32 64, %v1746_v9  ;;  %v5257_v51 = vsel %vm6614_vm1, %v5247_v52, 2147483648 }
 0xf8b   :  { %v1875_v19 = vcvt.s32.f32 %v1873_v58  ;;  %vm1731_vm14 = vcmp.eq.s32.totalorder %v5066_v44, %v1723_v34  ;;  %v1747_v21 = vshra.s32 %v1723_v34, 6  ;;  %v1888_v39 = vshra.s32 %v5257_v51, 16 }
 0xf8c   :  { %v1777_v54 = vsel %vm1761_vm3, %v1769_v16, %v1753_v15  ;;  %vm1762_vm2 = vcmp.lt.s32.totalorder %v1754_v40, 0  ;;  %v1770_v30 = vxor.u32 2147483647, %v1754_v40  ;;  %v5267_v59 = vsel %vm1731_vm14, %v4095_v37, %v5066_v44  ;;  %vm5271_vm6 = vmor %vm5058_vm11, %vm1731_vm14 }
 0xf8d   :  { %v5263_v0 = vsel %vm3315_vm10, %v5070_v2, %v1777_v54  ;;  %1876 = vmax.xlane.f32.xlu0 %v1875_v19  ;;  %v1755_v55 = vmul.u32 64, %v1747_v21  ;;  %v1890_v46 = vcvt.s32.f32 %v1888_v39  ;;  %v1901_v53 = vsel %vm6601_vm0, %v5267_v59, 2147483648 }
 0xf8e   :  { %v1778_v2 = vsel %vm1762_vm2, %v1770_v30, %v1754_v40  ;;  %v1903_v14 = vshra.s32 %v1901_v53, 16  ;;  %v1814_v43 = vcvt.s32.f32 %v1812_v13  ;;  %v1797_v45 = vand.u32 65535, %v5144_v6 }
 0xf8f   :  { %v5279_v32 = vsel %vm3315_vm10, %v5076_v20, %v1778_v2  ;;  %vm1763_vm12 = vcmp.lt.s32.totalorder %v1755_v55, 0  ;;  %v1771_v44 = vxor.u32 2147483647, %v1755_v55  ;;  %1891 = vmax.xlane.f32.xlu1 %v1890_v46  ;;  %v1827_v7 = vand.u32 65535, %v5168_v38 }
 0xf90   :  { %v1905_v3 = vcvt.s32.f32 %v1903_v14  ;;  %v1799_v15 = vcvt.s32.f32 %v1797_v45  ;;  %v1842_v6 = vand.u32 65535, %v5193_v22  ;;  %v1857_v38 = vand.u32 65535, %v5218_v60 }
 0xf91   :  { %v1779_v47 = vsel %vm1763_vm12, %v1771_v44, %v1755_v55  ;;  %v1829_v58 = vcvt.s32.f32 %v1827_v7  ;;  %v1887_v22 = vand.u32 65535, %v5257_v51  ;;  %v1902_v60 = vand.u32 65535, %v1901_v53 }
 0xf92   :  { %v5283_v4 = vsel %vm3315_vm10, %v5080_v56, %v1779_v47  ;;  %1906 = vmax.xlane.f32.xlu0 %v1905_v3  ;;  %v1859_v40 = vcvt.s32.f32 %v1857_v38 }
 0xf93   :  { %v1889_v55 = vcvt.s32.f32 %v1887_v22  ;;  %v1904_v2 = vcvt.s32.f32 %v1902_v60 }
 0xffa   :  { %v1817_v11 = vpop.xlane.xlu0 %1816 }
 0xffb   :  { %vm1818_vm11 = vcmp.eq.f32.partialorder %v5125_v57, %v1817_v11  ;;  %v1844_v57 = vcvt.s32.f32 %v1842_v6  ;;  %v1823_v14 = vcvt.f32.s32 %v1817_v11 }
 0xffc   :  { %v1819_v20 = vsel %vm1818_vm11, %v1814_v43, -inf }
 0xffd   :  { %1820 = vmax.xlane.f32.xlu0 %v1819_v20 }
 0xffe   :  { %v1802_v36 = vpop.xlane.xlu1 %1801 }
 0xfff   :  { %vm1803_vm3 = vcmp.eq.f32.partialorder %v5148_v29, %v1802_v36  ;;  %v1808_v53 = vcvt.f32.s32 %v1802_v36 }
0x1000   :  { %v1804_v9 = vsel %vm1803_vm3, %v1799_v15, -inf }
0x1001   :  { %1805 = vmax.xlane.f32.xlu1 %v1804_v9 }
0x1003   :  { %v1832_v56 = vpop.xlane.xlu1 %1831 }
0x1004   :  { %vm1833_vm10 = vcmp.eq.f32.partialorder %v5171_v61, %v1832_v56  ;;  %v1872_v61 = vand.u32 65535, %v5241_v18  ;;  %v1838_v15 = vcvt.f32.s32 %v1832_v56 }
0x1005   :  { %v1834_v35 = vsel %vm1833_vm10, %v1829_v58, -inf  ;;  %vm6619_vm10 = vcmask 523264  }
0x1006   :  { %1835 = vmax.xlane.f32.xlu1 %v1834_v35  ;;  %v1874_v39 = vcvt.s32.f32 %v1872_v61 }
0x100b   :  { %v5292_v16 = vpop.xlane.xlu0 %1846 }
0x100c   :  { %vm1848_vm1 = vcmp.eq.f32.partialorder %v5198_v24, %v5292_v16 }
0x100d   :  { %v1849_v34 = vsel %vm1848_vm1, %v1844_v57, -inf  ;;  %vm3324_vm1 = vcmask 39936  }
0x100e   :  { %1850 = vmax.xlane.f32.xlu0 %v1849_v34 }
0x1012   :  { %v5297_v29 = vpop.xlane.xlu1 %1861 }
0x1013   :  { %vm1863_vm14 = vcmp.eq.f32.partialorder %v5222_v25, %v5297_v29 }
0x1014   :  { %v1864_v54 = vsel %vm1863_vm14, %v1859_v40, -inf }
0x1015   :  { %1865 = vmax.xlane.f32.xlu1 %v1864_v54 }
0x101a   :  { %v5303_v21 = vpop.xlane.xlu0 %1876 }
0x101b   :  { %vm1878_vm2 = vcmp.eq.f32.partialorder %v1875_v19, %v5303_v21  ;;  %v1824_v19 = vshll.u32 %v1823_v14, 16 }
0x101c   :  { %v1879_v24 = vsel %vm1878_vm2, %v1874_v39, -inf  ;;  %v5306_v30 = vpop.xlane.xlu1 %1891 }
0x101d   :  { %1880 = vmax.xlane.f32.xlu0 %v1879_v24  ;;  %vm1893_vm0 = vcmp.eq.f32.partialorder %v1890_v46, %v5306_v30  ;;  %v1809_v46 = vshll.u32 %v1808_v53, 16 }
0x101e   :  { %v1894_v25 = vsel %vm1893_vm0, %v1889_v55, -inf  ;;  %vm6622_vm0 = vmmov %vm6619_vm10 }
0x101f   :  { %1895 = vmax.xlane.f32.xlu1 %v1894_v25  ;;  %v5309_v18 = vpop.xlane.xlu0 %1906 }
0x1020   :  { %vm1908_vm12 = vcmp.eq.f32.partialorder %v1905_v3, %v5309_v18 }
0x1021   :  { %v1909_v51 = vsel %vm1908_vm12, %v1904_v2, -inf  ;;  %v1853_v2 = vcvt.f32.s32 %v5292_v16 }
0x1022   :  { %1910 = vmax.xlane.f32.xlu0 %v1909_v51 }
0x1023   :  { %v1854_v53 = vshll.u32 %v1853_v2, 16 }
0x108a   :  { %v1821_v44 = vpop.xlane.xlu0 %1820 }
0x108b   :  { %v1822_v47 = vcvt.f32.s32 %v1821_v44 }
0x108d   :  { %v1825_v13 = vadd.s32 %v1824_v19, %v1822_v47 }
0x108e   :  { %v1806_v45 = vpop.xlane.xlu1 %1805 }
0x108f   :  { %vm1917_vm11 = vcmp.eq.s32.totalorder %v5111_v62, %v1825_v13  ;;  %v1933_v43 = vshra.s32 %v1825_v13, 6  ;;  %v1807_v11 = vcvt.f32.s32 %v1806_v45 }
0x1090   :  { %vm5315_vm3 = vmor %vm5115_vm13, %vm1917_vm11  ;;  %v5321_v3 = vsel %vm1917_vm11, %v4095_v37, %v5111_v62  ;;  %v1839_v62 = vshll.u32 %v1838_v15, 16 }
0x1091   :  { %v1941_v7 = vmul.u32 64, %v1933_v43  ;;  %v5325_v36 = vsel %vm6619_vm10, %v5321_v3, 2147483648  ;;  %v1810_v9 = vadd.s32 %v1809_v46, %v1807_v11  ;;  %vm6625_vm10 = vmmov %vm6622_vm0 }
0x1092   :  { %v2005_v58 = vshra.s32 %v5325_v36, 16 }
0x1093   :  { %vm1949_vm14 = vcmp.lt.s32.totalorder %v1941_v7, 0  ;;  %v1957_v1 = vxor.u32 2147483647, %v1941_v7  ;;  %vm1916_vm13 = vcmp.eq.s32.totalorder %v5129_v48, %v1810_v9  ;;  %v1932_v35 = vshra.s32 %v1810_v9, 6  ;;  %v1836_v6 = vpop.xlane.xlu1 %1835 }
0x1094   :  { %v5329_v57 = vcvt.s32.f32 %v2005_v58  ;;  %vm5333_vm2 = vmor %vm5133_vm7, %vm1916_vm13  ;;  %v5339_v34 = vsel %vm1916_vm13, %v4095_v37, %v5129_v48  ;;  %v1837_v40 = vcvt.f32.s32 %v1836_v6  ;;  %v1883_v9 = vcvt.f32.s32 %v5303_v21 }
0x1095   :  { %v1965_v38 = vsel %vm1949_vm14, %v1957_v1, %v1941_v7  ;;  %v1940_v54 = vmul.u32 64, %v1932_v35  ;;  %v5348_v22 = vsel %vm6622_vm0, %v5339_v34, 2147483648 }
0x1096   :  { %v5343_v61 = vsel %vm3324_vm1, %v5139_v33, %v1965_v38  ;;  %2008 = vmax.xlane.f32.xlu0 %v5329_v57  ;;  %v1840_v17 = vadd.s32 %v1839_v62, %v1837_v40  ;;  %v1990_v39 = vshra.s32 %v5348_v22, 16  ;;  %v1898_v62 = vcvt.f32.s32 %v5306_v30 }
0x1097   :  { %vm1948_vm7 = vcmp.lt.s32.totalorder %v1940_v54, 0  ;;  %v1956_v24 = vxor.u32 2147483647, %v1940_v54  ;;  %v1913_v30 = vcvt.f32.s32 %v5309_v18 }
0x1098   :  { %vm1918_vm12 = vcmp.eq.s32.totalorder %v5152_v8, %v1840_v17  ;;  %v1934_v48 = vshra.s32 %v1840_v17, 6  ;;  %v5352_v60 = vcvt.s32.f32 %v1990_v39 }
0x1099   :  { %v1964_v55 = vsel %vm1948_vm7, %v1956_v24, %v1940_v54  ;;  %vm5356_vm11 = vmor %vm5156_vm9, %vm1918_vm12  ;;  %v5362_v25 = vsel %vm1918_vm12, %v4095_v37, %v5152_v8  ;;  %v1884_v54 = vshll.u32 %v1883_v9, 16 }
0x109a   :  { %v5367_v51 = vsel %vm3324_vm1, %v5163_v49, %v1964_v55  ;;  %v1942_v14 = vmul.u32 64, %v1934_v48  ;;  %1993 = vmax.xlane.f32.xlu1 %v5352_v60  ;;  %v5372_v42 = vsel %vm6625_vm10, %v5362_v25, 2147483648  ;;  %v1868_v49 = vcvt.f32.s32 %v5297_v29  ;;  %vm6630_vm10 = vmmov %vm6622_vm0 }
0x109b   :  { %v2020_v44 = vshra.s32 %v5372_v42, 16  ;;  %v1851_v47 = vpop.xlane.xlu0 %1850 }
0x109c   :  { %vm1950_vm9 = vcmp.lt.s32.totalorder %v1942_v14, 0  ;;  %v1958_v19 = vxor.u32 2147483647, %v1942_v14  ;;  %v1852_v13 = vcvt.f32.s32 %v1851_v47  ;;  %v1869_v15 = vshll.u32 %v1868_v49, 16 }
0x109d   :  { %v5375_v8 = vcvt.s32.f32 %v2020_v44 }
0x109e   :  { %v1966_v16 = vsel %vm1950_vm9, %v1958_v19, %v1942_v14  ;;  %v1855_v45 = vadd.s32 %v1854_v53, %v1852_v13  ;;  %v1914_v53 = vshll.u32 %v1913_v30, 16 }
0x109f   :  { %v5380_v43 = vsel %vm3324_vm1, %v5176_v27, %v1966_v16  ;;  %2023 = vmax.xlane.f32.xlu1 %v5375_v8 }
0x10a0   :  { %vm1919_vm14 = vcmp.eq.s32.totalorder %v5182_v5, %v1855_v45  ;;  %v1935_v46 = vshra.s32 %v1855_v45, 6 }
0x10a1   :  { %vm5386_vm13 = vmor %vm5186_vm4, %vm1919_vm14  ;;  %v5392_v29 = vsel %vm1919_vm14, %v4095_v37, %v5182_v5 }
0x10a2   :  { %v1866_v11 = vpop.xlane.xlu1 %1865  ;;  %v1943_v58 = vmul.u32 64, %v1935_v46  ;;  %v5397_v1 = vsel %vm6622_vm0, %v5392_v29, 2147483648 }
0x10a3   :  { %v1867_v27 = vcvt.f32.s32 %v1866_v11  ;;  %v2035_v6 = vshra.s32 %v5397_v1, 16 }
0x10a4   :  { %vm1951_vm7 = vcmp.lt.s32.totalorder %v1943_v58, 0  ;;  %v1959_v10 = vxor.u32 2147483647, %v1943_v58 }
0x10a5   :  { %v1870_v35 = vadd.s32 %v1869_v15, %v1867_v27  ;;  %v5402_v40 = vcvt.s32.f32 %v2035_v6 }
0x10a6   :  { %v1967_v21 = vsel %vm1951_vm7, %v1959_v10, %v1943_v58 }
0x10a7   :  { %vm1920_vm4 = vcmp.eq.s32.totalorder %v5202_v31, %v1870_v35  ;;  %v1936_v38 = vshra.s32 %v1870_v35, 6  ;;  %v5417_v48 = vsel %vm3324_vm1, %v5213_v26, %v1967_v21  ;;  %2038 = vmax.xlane.f32.xlu0 %v5402_v40 }
0x10a8   :  { %vm5406_vm12 = vmor %vm5206_vm5, %vm1920_vm4  ;;  %v5412_v39 = vsel %vm1920_vm4, %v4095_v37, %v5202_v31  ;;  %v1899_v31 = vshll.u32 %v1898_v62, 16 }
0x10a9   :  { %v1944_v55 = vmul.u32 64, %v1936_v38  ;;  %v5422_v23 = vsel %vm6630_vm10, %v5412_v39, 2147483648  ;;  %vm6635_vm10 = vmmov %vm6622_vm0 }
0x10aa   :  { %v1881_v5 = vpop.xlane.xlu0 %1880  ;;  %v2050_v44 = vshra.s32 %v5422_v23, 16 }
0x10ab   :  { %v1882_v24 = vcvt.f32.s32 %v1881_v5  ;;  %vm1952_vm5 = vcmp.lt.s32.totalorder %v1944_v55, 0  ;;  %v1960_v19 = vxor.u32 2147483647, %v1944_v55 }
0x10ac   :  { %v1896_v14 = vpop.xlane.xlu1 %1895  ;;  %v5426_v26 = vcvt.s32.f32 %v2050_v44 }
0x10ad   :  { %v1885_v2 = vadd.s32 %v1884_v54, %v1882_v24  ;;  %v1897_v47 = vcvt.f32.s32 %v1896_v14  ;;  %v1968_v16 = vsel %vm1952_vm5, %v1960_v19, %v1944_v55 }
0x10ae   :  { %v5440_v11 = vsel %vm3324_vm1, %v5236_v28, %v1968_v16  ;;  %2053 = vmax.xlane.f32.xlu1 %v5426_v26 }
0x10af   :  { %vm1921_vm9 = vcmp.eq.s32.totalorder %v5226_v41, %v1885_v2  ;;  %v1937_v18 = vshra.s32 %v1885_v2, 6  ;;  %v1900_v45 = vadd.s32 %v1899_v31, %v1897_v47  ;;  %v1911_v46 = vpop.xlane.xlu0 %1910 }
0x10b0   :  { %vm5430_vm14 = vmor %vm5230_vm15, %vm1921_vm9  ;;  %v5436_v49 = vsel %vm1921_vm9, %v4095_v37, %v5226_v41  ;;  %v1912_v27 = vcvt.f32.s32 %v1911_v46 }
0x10b1   :  { %v1945_v15 = vmul.u32 64, %v1937_v18  ;;  %v5445_v12 = vsel %vm6622_vm0, %v5436_v49, 2147483648  ;;  %vm1922_vm15 = vcmp.eq.s32.totalorder %v5247_v52, %v1900_v45  ;;  %v1938_v9 = vshra.s32 %v1900_v45, 6 }
0x10b2   :  { %v2065_v41 = vshra.s32 %v5445_v12, 16  ;;  %vm5451_vm4 = vmor %vm5251_vm8, %vm1922_vm15  ;;  %v5457_v35 = vsel %vm1922_vm15, %v4095_v37, %v5247_v52  ;;  %v1915_v6 = vadd.s32 %v1914_v53, %v1912_v27  ;;  %v2004_v18 = vand.u32 65535, %v5325_v36 }
0x10b3   :  { %vm1953_vm7 = vcmp.lt.s32.totalorder %v1945_v15, 0  ;;  %v1961_v58 = vxor.u32 2147483647, %v1945_v15  ;;  %v1946_v10 = vmul.u32 64, %v1938_v9  ;;  %v5461_v38 = vsel %vm6635_vm10, %v5457_v35, 2147483648 }
0x10b4   :  { %v2067_v62 = vcvt.s32.f32 %v2065_v41  ;;  %vm1923_vm5 = vcmp.eq.s32.totalorder %v5267_v59, %v1915_v6  ;;  %v1939_v54 = vshra.s32 %v1915_v6, 6  ;;  %v2080_v50 = vshra.s32 %v5461_v38, 16 }
0x10b5   :  { %v1969_v5 = vsel %vm1953_vm7, %v1961_v58, %v1945_v15  ;;  %vm1954_vm8 = vcmp.lt.s32.totalorder %v1946_v10, 0  ;;  %v1962_v52 = vxor.u32 2147483647, %v1946_v10  ;;  %vm5471_vm9 = vmor %vm5271_vm6, %vm1923_vm5  ;;  %v5477_v30 = vsel %vm1923_vm5, %v4095_v37, %v5267_v59 }
0x10b6   :  { %v5467_v21 = vsel %vm3324_vm1, %v5263_v0, %v1969_v5  ;;  %2068 = vmax.xlane.f32.xlu0 %v2067_v62  ;;  %v1947_v55 = vmul.u32 64, %v1939_v54  ;;  %v2082_v2 = vcvt.s32.f32 %v2080_v50  ;;  %v2093_v14 = vsel %vm6622_vm0, %v5477_v30, 2147483648 }
0x10b7   :  { %v1970_v0 = vsel %vm1954_vm8, %v1962_v52, %v1946_v10  ;;  %v2095_v44 = vshra.s32 %v2093_v14, 16  ;;  %v2006_v16 = vcvt.s32.f32 %v2004_v18  ;;  %v1989_v45 = vand.u32 65535, %v5348_v22 }
0x10b8   :  { %v5483_v31 = vsel %vm3324_vm1, %v5279_v32, %v1970_v0  ;;  %vm1955_vm6 = vcmp.lt.s32.totalorder %v1947_v55, 0  ;;  %v1963_v63 = vxor.u32 2147483647, %v1947_v55  ;;  %2083 = vmax.xlane.f32.xlu1 %v2082_v2  ;;  %v2019_v27 = vand.u32 65535, %v5372_v42 }
0x10b9   :  { %v2097_v19 = vcvt.s32.f32 %v2095_v44  ;;  %v1991_v15 = vcvt.s32.f32 %v1989_v45 }
0x10ba   :  { %v1971_v47 = vsel %vm1955_vm6, %v1963_v63, %v1947_v55  ;;  %v2021_v41 = vcvt.s32.f32 %v2019_v27 }
0x10bb   :  { %v5487_v59 = vsel %vm3324_vm1, %v5283_v4, %v1971_v47  ;;  %2098 = vmax.xlane.f32.xlu0 %v2097_v19 }
0x1123   :  { %v2009_v53 = vpop.xlane.xlu0 %2008 }
0x1124   :  { %vm2010_vm15 = vcmp.eq.f32.partialorder %v5329_v57, %v2009_v53  ;;  %v2034_v57 = vand.u32 65535, %v5397_v1  ;;  %v2079_v1 = vand.u32 65535, %v5461_v38  ;;  %v2015_v44 = vcvt.f32.s32 %v2009_v53 }
0x1125   :  { %v2011_v32 = vsel %vm2010_vm15, %v2006_v16, -inf }
0x1126   :  { %2012 = vmax.xlane.f32.xlu0 %v2011_v32  ;;  %v2036_v22 = vcvt.s32.f32 %v2034_v57  ;;  %v2081_v55 = vcvt.s32.f32 %v2079_v1 }
0x1127   :  { %v1994_v46 = vpop.xlane.xlu1 %1993 }
0x1128   :  { %vm1995_vm7 = vcmp.eq.f32.partialorder %v5352_v60, %v1994_v46  ;;  %v2049_v60 = vand.u32 65535, %v5422_v23  ;;  %v2094_v23 = vand.u32 65535, %v2093_v14  ;;  %v2000_v14 = vcvt.f32.s32 %v1994_v46 }
0x1129   :  { %v1996_v9 = vsel %vm1995_vm7, %v1991_v15, -inf }
0x112a   :  { %1997 = vmax.xlane.f32.xlu1 %v1996_v9  ;;  %v2051_v10 = vcvt.s32.f32 %v2049_v60  ;;  %v2096_v0 = vcvt.s32.f32 %v2094_v23 }
0x112c   :  { %v2024_v4 = vpop.xlane.xlu1 %2023 }
0x112d   :  { %vm2025_vm1 = vcmp.eq.f32.partialorder %v5375_v8, %v2024_v4  ;;  %v2064_v8 = vand.u32 65535, %v5445_v12  ;;  %v2030_v15 = vcvt.f32.s32 %v2024_v4 }
0x112e   :  { %v2026_v36 = vsel %vm2025_vm1, %v2021_v41, -inf  ;;  %vm6640_vm1 = vcmask 523264  }
0x112f   :  { %2027 = vmax.xlane.f32.xlu1 %v2026_v36  ;;  %v2066_v50 = vcvt.s32.f32 %v2064_v8 }
0x1134   :  { %v5496_v58 = vpop.xlane.xlu0 %2038 }
0x1135   :  { %vm2040_vm10 = vcmp.eq.f32.partialorder %v5402_v40, %v5496_v58 }
0x1136   :  { %v2041_v6 = vsel %vm2040_vm10, %v2036_v22, -inf  ;;  %vm3333_vm10 = vcmask 48128  }
0x1137   :  { %2042 = vmax.xlane.f32.xlu0 %v2041_v6 }
0x113b   :  { %v5501_v42 = vpop.xlane.xlu1 %2053 }
0x113c   :  { %vm2055_vm5 = vcmp.eq.f32.partialorder %v5426_v26, %v5501_v42 }
0x113d   :  { %v2056_v5 = vsel %vm2055_vm5, %v2051_v10, -inf }
0x113e   :  { %2057 = vmax.xlane.f32.xlu1 %v2056_v5 }
0x1143   :  { %v5507_v54 = vpop.xlane.xlu0 %2068 }
0x1144   :  { %vm2070_vm8 = vcmp.eq.f32.partialorder %v2067_v62, %v5507_v54  ;;  %v2016_v62 = vshll.u32 %v2015_v44, 16 }
0x1145   :  { %v2071_v40 = vsel %vm2070_vm8, %v2066_v50, -inf  ;;  %v5510_v52 = vpop.xlane.xlu1 %2083 }
0x1146   :  { %2072 = vmax.xlane.f32.xlu0 %v2071_v40  ;;  %vm2085_vm0 = vcmp.eq.f32.partialorder %v2082_v2, %v5510_v52  ;;  %v2001_v2 = vshll.u32 %v2000_v14, 16 }
0x1147   :  { %v2086_v26 = vsel %vm2085_vm0, %v2081_v55, -inf  ;;  %vm6643_vm0 = vmmov %vm6640_vm1 }
0x1148   :  { %2087 = vmax.xlane.f32.xlu1 %v2086_v26  ;;  %v5513_v12 = vpop.xlane.xlu0 %2098 }
0x1149   :  { %vm2100_vm6 = vcmp.eq.f32.partialorder %v2097_v19, %v5513_v12 }
0x114a   :  { %v2101_v38 = vsel %vm2100_vm6, %v2096_v0, -inf  ;;  %v2045_v0 = vcvt.f32.s32 %v5496_v58 }
0x114b   :  { %2102 = vmax.xlane.f32.xlu0 %v2101_v38 }
0x114c   :  { %v2046_v14 = vshll.u32 %v2045_v0, 16 }
0x11b3   :  { %v2013_v63 = vpop.xlane.xlu0 %2012 }
0x11b4   :  { %v2014_v47 = vcvt.f32.s32 %v2013_v63 }
0x11b6   :  { %v2017_v18 = vadd.s32 %v2016_v62, %v2014_v47 }
0x11b7   :  { %v1998_v45 = vpop.xlane.xlu1 %1997 }
0x11b8   :  { %vm2109_vm15 = vcmp.eq.s32.totalorder %v5321_v3, %v2017_v18  ;;  %v2125_v16 = vshra.s32 %v2017_v18, 6  ;;  %v1999_v53 = vcvt.f32.s32 %v1998_v45 }
0x11b9   :  { %vm5519_vm7 = vmor %vm5315_vm3, %vm2109_vm15  ;;  %v5525_v19 = vsel %vm2109_vm15, %v4095_v37, %v5321_v3  ;;  %v2031_v3 = vshll.u32 %v2030_v15, 16 }
0x11ba   :  { %v2133_v27 = vmul.u32 64, %v2125_v16  ;;  %v5529_v46 = vsel %vm6640_vm1, %v5525_v19, 2147483648  ;;  %v2002_v9 = vadd.s32 %v2001_v2, %v1999_v53  ;;  %vm6646_vm1 = vmmov %vm6643_vm0 }
0x11bb   :  { %v2197_v41 = vshra.s32 %v5529_v46, 16 }
0x11bc   :  { %vm2141_vm5 = vcmp.lt.s32.totalorder %v2133_v27, 0  ;;  %v2149_v20 = vxor.u32 2147483647, %v2133_v27  ;;  %vm2108_vm3 = vcmp.eq.s32.totalorder %v5339_v34, %v2002_v9  ;;  %v2124_v36 = vshra.s32 %v2002_v9, 6  ;;  %v2028_v57 = vpop.xlane.xlu1 %2027 }
0x11bd   :  { %v5533_v22 = vcvt.s32.f32 %v2197_v41  ;;  %vm5537_vm8 = vmor %vm5333_vm2, %vm2108_vm3  ;;  %v5543_v6 = vsel %vm2108_vm3, %v4095_v37, %v5339_v34  ;;  %v2029_v10 = vcvt.f32.s32 %v2028_v57  ;;  %v2075_v9 = vcvt.f32.s32 %v5507_v54 }
0x11be   :  { %v2157_v60 = vsel %vm2141_vm5, %v2149_v20, %v2133_v27  ;;  %v2132_v5 = vmul.u32 64, %v2124_v36  ;;  %v5552_v1 = vsel %vm6643_vm0, %v5543_v6, 2147483648 }
0x11bf   :  { %v5547_v8 = vsel %vm3333_vm10, %v5343_v61, %v2157_v60  ;;  %2200 = vmax.xlane.f32.xlu0 %v5533_v22  ;;  %v2032_v56 = vadd.s32 %v2031_v3, %v2029_v10  ;;  %v2182_v50 = vshra.s32 %v5552_v1, 16  ;;  %v2090_v3 = vcvt.f32.s32 %v5510_v52 }
0x11c0   :  { %vm2140_vm2 = vcmp.lt.s32.totalorder %v2132_v5, 0  ;;  %v2148_v40 = vxor.u32 2147483647, %v2132_v5  ;;  %v2105_v52 = vcvt.f32.s32 %v5513_v12 }
0x11c1   :  { %vm2110_vm6 = vcmp.eq.s32.totalorder %v5362_v25, %v2032_v56  ;;  %v2126_v34 = vshra.s32 %v2032_v56, 6  ;;  %v5556_v23 = vcvt.s32.f32 %v2182_v50 }
0x11c2   :  { %v2156_v55 = vsel %vm2140_vm2, %v2148_v40, %v2132_v5  ;;  %vm5560_vm15 = vmor %vm5356_vm11, %vm2110_vm6  ;;  %v5566_v26 = vsel %vm2110_vm6, %v4095_v37, %v5362_v25  ;;  %v2076_v5 = vshll.u32 %v2075_v9, 16 }
0x11c3   :  { %v5571_v38 = vsel %vm3333_vm10, %v5367_v51, %v2156_v55  ;;  %v2134_v44 = vmul.u32 64, %v2126_v34  ;;  %2185 = vmax.xlane.f32.xlu1 %v5556_v23  ;;  %v5576_v33 = vsel %vm6646_vm1, %v5566_v26, 2147483648  ;;  %v2060_v51 = vcvt.f32.s32 %v5501_v42  ;;  %vm6651_vm1 = vmmov %vm6643_vm0 }
0x11c4   :  { %v2212_v63 = vshra.s32 %v5576_v33, 16  ;;  %v2043_v47 = vpop.xlane.xlu0 %2042 }
0x11c5   :  { %vm2142_vm11 = vcmp.lt.s32.totalorder %v2134_v44, 0  ;;  %v2150_v62 = vxor.u32 2147483647, %v2134_v44  ;;  %v2044_v18 = vcvt.f32.s32 %v2043_v47  ;;  %v2061_v15 = vshll.u32 %v2060_v51, 16 }
0x11c6   :  { %v5579_v25 = vcvt.s32.f32 %v2212_v63 }
0x11c7   :  { %v2158_v58 = vsel %vm2142_vm11, %v2150_v62, %v2134_v44  ;;  %v2047_v45 = vadd.s32 %v2046_v14, %v2044_v18  ;;  %v2106_v14 = vshll.u32 %v2105_v52, 16 }
0x11c8   :  { %v5584_v16 = vsel %vm3333_vm10, %v5380_v43, %v2158_v58  ;;  %2215 = vmax.xlane.f32.xlu1 %v5579_v25 }
0x11c9   :  { %vm2111_vm5 = vcmp.eq.s32.totalorder %v5392_v29, %v2047_v45  ;;  %v2127_v2 = vshra.s32 %v2047_v45, 6 }
0x11ca   :  { %vm5590_vm3 = vmor %vm5386_vm13, %vm2111_vm5  ;;  %v5596_v42 = vsel %vm2111_vm5, %v4095_v37, %v5392_v29 }
0x11cb   :  { %v2058_v53 = vpop.xlane.xlu1 %2057  ;;  %v2135_v41 = vmul.u32 64, %v2127_v2  ;;  %v5601_v20 = vsel %vm6643_vm0, %v5596_v42, 2147483648 }
0x11cc   :  { %v2059_v43 = vcvt.f32.s32 %v2058_v53  ;;  %v2227_v57 = vshra.s32 %v5601_v20, 16 }
0x11cd   :  { %vm2143_vm2 = vcmp.lt.s32.totalorder %v2135_v41, 0  ;;  %v2151_v7 = vxor.u32 2147483647, %v2135_v41 }
0x11ce   :  { %v2062_v36 = vadd.s32 %v2061_v15, %v2059_v43  ;;  %v5606_v10 = vcvt.s32.f32 %v2227_v57 }
0x11cf   :  { %v2159_v54 = vsel %vm2143_vm2, %v2151_v7, %v2135_v41 }
0x11d0   :  { %vm2112_vm13 = vcmp.eq.s32.totalorder %v5412_v39, %v2062_v36  ;;  %v2128_v60 = vshra.s32 %v2062_v36, 6  ;;  %v5621_v34 = vsel %vm3333_vm10, %v5417_v48, %v2159_v54  ;;  %2230 = vmax.xlane.f32.xlu0 %v5606_v10 }
0x11d1   :  { %vm5610_vm6 = vmor %vm5406_vm12, %vm2112_vm13  ;;  %v5616_v50 = vsel %vm2112_vm13, %v4095_v37, %v5412_v39  ;;  %v2091_v39 = vshll.u32 %v2090_v3, 16 }
0x11d2   :  { %v2136_v55 = vmul.u32 64, %v2128_v60  ;;  %v5626_v17 = vsel %vm6651_vm1, %v5616_v50, 2147483648  ;;  %vm6656_vm1 = vmmov %vm6643_vm0 }
0x11d3   :  { %v2073_v29 = vpop.xlane.xlu0 %2072  ;;  %v2242_v63 = vshra.s32 %v5626_v17, 16 }
0x11d4   :  { %v2074_v40 = vcvt.f32.s32 %v2073_v29  ;;  %vm2144_vm12 = vcmp.lt.s32.totalorder %v2136_v55, 0  ;;  %v2152_v62 = vxor.u32 2147483647, %v2136_v55 }
0x11d5   :  { %v2088_v44 = vpop.xlane.xlu1 %2087  ;;  %v5630_v48 = vcvt.s32.f32 %v2242_v63 }
0x11d6   :  { %v2077_v0 = vadd.s32 %v2076_v5, %v2074_v40  ;;  %v2089_v47 = vcvt.f32.s32 %v2088_v44  ;;  %v2160_v58 = vsel %vm2144_vm12, %v2152_v62, %v2136_v55 }
0x11d7   :  { %v5644_v53 = vsel %vm3333_vm10, %v5440_v11, %v2160_v58  ;;  %2245 = vmax.xlane.f32.xlu1 %v5630_v48 }
0x11d8   :  { %vm2113_vm11 = vcmp.eq.s32.totalorder %v5436_v49, %v2077_v0  ;;  %v2129_v12 = vshra.s32 %v2077_v0, 6  ;;  %v2092_v45 = vadd.s32 %v2091_v39, %v2089_v47  ;;  %v2103_v2 = vpop.xlane.xlu0 %2102 }
0x11d9   :  { %vm5634_vm5 = vmor %vm5430_vm14, %vm2113_vm11  ;;  %v5640_v51 = vsel %vm2113_vm11, %v4095_v37, %v5436_v49  ;;  %v2104_v43 = vcvt.f32.s32 %v2103_v2 }
0x11da   :  { %v2137_v15 = vmul.u32 64, %v2129_v12  ;;  %v5649_v13 = vsel %vm6643_vm0, %v5640_v51, 2147483648  ;;  %vm2114_vm14 = vcmp.eq.s32.totalorder %v5457_v35, %v2092_v45  ;;  %v2130_v9 = vshra.s32 %v2092_v45, 6 }
0x11db   :  { %v2257_v49 = vshra.s32 %v5649_v13, 16  ;;  %vm5655_vm13 = vmor %vm5451_vm4, %vm2114_vm14  ;;  %v5661_v36 = vsel %vm2114_vm14, %v4095_v37, %v5457_v35  ;;  %v2107_v57 = vadd.s32 %v2106_v14, %v2104_v43  ;;  %v2196_v12 = vand.u32 65535, %v5529_v46 }
0x11dc   :  { %vm2145_vm2 = vcmp.lt.s32.totalorder %v2137_v15, 0  ;;  %v2153_v41 = vxor.u32 2147483647, %v2137_v15  ;;  %v2138_v7 = vmul.u32 64, %v2130_v9  ;;  %v5665_v60 = vsel %vm6656_vm1, %v5661_v36, 2147483648 }
0x11dd   :  { %v2259_v3 = vcvt.s32.f32 %v2257_v49  ;;  %vm2115_vm12 = vcmp.eq.s32.totalorder %v5477_v30, %v2107_v57  ;;  %v2131_v5 = vshra.s32 %v2107_v57, 6  ;;  %v2272_v28 = vshra.s32 %v5665_v60, 16 }
0x11de   :  { %v2161_v29 = vsel %vm2145_vm2, %v2153_v41, %v2137_v15  ;;  %vm2146_vm4 = vcmp.lt.s32.totalorder %v2138_v7, 0  ;;  %v2154_v35 = vxor.u32 2147483647, %v2138_v7  ;;  %vm5675_vm11 = vmor %vm5471_vm9, %vm2115_vm12  ;;  %v5681_v52 = vsel %vm2115_vm12, %v4095_v37, %v5477_v30 }
0x11df   :  { %v5671_v54 = vsel %vm3333_vm10, %v5467_v21, %v2161_v29  ;;  %2260 = vmax.xlane.f32.xlu0 %v2259_v3  ;;  %v2139_v55 = vmul.u32 64, %v2131_v5  ;;  %v2274_v0 = vcvt.s32.f32 %v2272_v28  ;;  %v2285_v44 = vsel %vm6643_vm0, %v5681_v52, 2147483648 }
0x11e0   :  { %v2162_v21 = vsel %vm2146_vm4, %v2154_v35, %v2138_v7  ;;  %v2287_v63 = vshra.s32 %v2285_v44, 16  ;;  %v2198_v58 = vcvt.s32.f32 %v2196_v12  ;;  %v2181_v45 = vand.u32 65535, %v5552_v1 }
0x11e1   :  { %v5687_v39 = vsel %vm3333_vm10, %v5483_v31, %v2162_v21  ;;  %vm2147_vm9 = vcmp.lt.s32.totalorder %v2139_v55, 0  ;;  %v2155_v24 = vxor.u32 2147483647, %v2139_v55  ;;  %2275 = vmax.xlane.f32.xlu1 %v2274_v0  ;;  %v2211_v43 = vand.u32 65535, %v5576_v33 }
0x11e2   :  { %v2289_v62 = vcvt.s32.f32 %v2287_v63  ;;  %v2183_v15 = vcvt.s32.f32 %v2181_v45 }
0x11e3   :  { %v2163_v47 = vsel %vm2147_vm9, %v2155_v24, %v2139_v55  ;;  %v2213_v49 = vcvt.s32.f32 %v2211_v43 }
0x11e4   :  { %v5691_v30 = vsel %vm3333_vm10, %v5487_v59, %v2163_v47  ;;  %2290 = vmax.xlane.f32.xlu0 %v2289_v62 }
0x124c   :  { %v2201_v14 = vpop.xlane.xlu0 %2200 }
0x124d   :  { %vm2202_vm14 = vcmp.eq.f32.partialorder %v5533_v22, %v2201_v14  ;;  %v2226_v22 = vand.u32 65535, %v5601_v20  ;;  %v2271_v20 = vand.u32 65535, %v5665_v60  ;;  %v2207_v63 = vcvt.f32.s32 %v2201_v14 }
0x124e   :  { %v2203_v31 = vsel %vm2202_vm14, %v2198_v58, -inf }
0x124f   :  { %2204 = vmax.xlane.f32.xlu0 %v2203_v31  ;;  %v2228_v1 = vcvt.s32.f32 %v2226_v22  ;;  %v2273_v55 = vcvt.s32.f32 %v2271_v20 }
0x1250   :  { %v2186_v2 = vpop.xlane.xlu1 %2185 }
0x1251   :  { %vm2187_vm2 = vcmp.eq.f32.partialorder %v5556_v23, %v2186_v2  ;;  %v2241_v23 = vand.u32 65535, %v5626_v17  ;;  %v2286_v17 = vand.u32 65535, %v2285_v44  ;;  %v2192_v44 = vcvt.f32.s32 %v2186_v2 }
0x1252   :  { %v2188_v9 = vsel %vm2187_vm2, %v2183_v15, -inf }
0x1253   :  { %2189 = vmax.xlane.f32.xlu1 %v2188_v9  ;;  %v2243_v7 = vcvt.s32.f32 %v2241_v23  ;;  %v2288_v21 = vcvt.s32.f32 %v2286_v17 }
0x1255   :  { %v2216_v59 = vpop.xlane.xlu1 %2215 }
0x1256   :  { %vm2217_vm10 = vcmp.eq.f32.partialorder %v5579_v25, %v2216_v59  ;;  %v2256_v25 = vand.u32 65535, %v5649_v13  ;;  %v2222_v15 = vcvt.f32.s32 %v2216_v59 }
0x1257   :  { %v2218_v46 = vsel %vm2217_vm10, %v2213_v49, -inf  ;;  %vm6661_vm10 = vcmask 523264  }
0x1258   :  { %2219 = vmax.xlane.f32.xlu1 %v2218_v46  ;;  %v2258_v28 = vcvt.s32.f32 %v2256_v25 }
0x125d   :  { %v5700_v41 = vpop.xlane.xlu0 %2230 }
0x125e   :  { %vm2232_vm1 = vcmp.eq.f32.partialorder %v5606_v10, %v5700_v41 }
0x125f   :  { %v2233_v57 = vsel %vm2232_vm1, %v2228_v1, -inf  ;;  %vm3342_vm1 = vcmask 56320  }
0x1260   :  { %2234 = vmax.xlane.f32.xlu0 %v2233_v57 }
0x1264   :  { %v5705_v33 = vpop.xlane.xlu1 %2245 }
0x1265   :  { %vm2247_vm12 = vcmp.eq.f32.partialorder %v5630_v48, %v5705_v33 }
0x1266   :  { %v2248_v29 = vsel %vm2247_vm12, %v2243_v7, -inf }
0x1267   :  { %2249 = vmax.xlane.f32.xlu1 %v2248_v29 }
0x126c   :  { %v5711_v5 = vpop.xlane.xlu0 %2260 }
0x126d   :  { %vm2262_vm4 = vcmp.eq.f32.partialorder %v2259_v3, %v5711_v5  ;;  %v2208_v3 = vshll.u32 %v2207_v63, 16 }
0x126e   :  { %v2263_v10 = vsel %vm2262_vm4, %v2258_v28, -inf  ;;  %v5714_v35 = vpop.xlane.xlu1 %2275 }
0x126f   :  { %2264 = vmax.xlane.f32.xlu0 %v2263_v10  ;;  %vm2277_vm0 = vcmp.eq.f32.partialorder %v2274_v0, %v5714_v35  ;;  %v2193_v0 = vshll.u32 %v2192_v44, 16 }
0x1270   :  { %v2278_v48 = vsel %vm2277_vm0, %v2273_v55, -inf  ;;  %vm6664_vm0 = vmmov %vm6661_vm10 }
0x1271   :  { %2279 = vmax.xlane.f32.xlu1 %v2278_v48  ;;  %v5717_v13 = vpop.xlane.xlu0 %2290 }
0x1272   :  { %vm2292_vm9 = vcmp.eq.f32.partialorder %v2289_v62, %v5717_v13 }
0x1273   :  { %v2293_v60 = vsel %vm2292_vm9, %v2288_v21, -inf  ;;  %v2237_v21 = vcvt.f32.s32 %v5700_v41 }
0x1274   :  { %2294 = vmax.xlane.f32.xlu0 %v2293_v60 }
0x1275   :  { %v2238_v44 = vshll.u32 %v2237_v21, 16 }
0x12dc   :  { %v2205_v24 = vpop.xlane.xlu0 %2204 }
0x12dd   :  { %v2206_v47 = vcvt.f32.s32 %v2205_v24 }
0x12df   :  { %v2209_v12 = vadd.s32 %v2208_v3, %v2206_v47 }
0x12e0   :  { %v2190_v45 = vpop.xlane.xlu1 %2189 }
0x12e1   :  { %vm2301_vm14 = vcmp.eq.s32.totalorder %v5525_v19, %v2209_v12  ;;  %v2317_v58 = vshra.s32 %v2209_v12, 6  ;;  %v2191_v14 = vcvt.f32.s32 %v2190_v45 }
0x12e2   :  { %vm5723_vm2 = vmor %vm5519_vm7, %vm2301_vm14  ;;  %v5729_v62 = vsel %vm2301_vm14, %v4095_v37, %v5525_v19  ;;  %v2223_v19 = vshll.u32 %v2222_v15, 16 }
0x12e3   :  { %v2325_v43 = vmul.u32 64, %v2317_v58  ;;  %v5733_v2 = vsel %vm6661_vm10, %v5729_v62, 2147483648  ;;  %v2194_v9 = vadd.s32 %v2193_v0, %v2191_v14  ;;  %vm6667_vm10 = vmmov %vm6664_vm0 }
0x12e4   :  { %v2389_v49 = vshra.s32 %v5733_v2, 16 }
0x12e5   :  { %vm2333_vm12 = vcmp.lt.s32.totalorder %v2325_v43, 0  ;;  %v2341_v32 = vxor.u32 2147483647, %v2325_v43  ;;  %vm2300_vm7 = vcmp.eq.s32.totalorder %v5543_v6, %v2194_v9  ;;  %v2316_v46 = vshra.s32 %v2194_v9, 6  ;;  %v2220_v22 = vpop.xlane.xlu1 %2219 }
0x12e6   :  { %v5737_v1 = vcvt.s32.f32 %v2389_v49  ;;  %vm5741_vm4 = vmor %vm5537_vm8, %vm2300_vm7  ;;  %v5747_v57 = vsel %vm2300_vm7, %v4095_v37, %v5543_v6  ;;  %v2221_v7 = vcvt.f32.s32 %v2220_v22  ;;  %v2267_v9 = vcvt.f32.s32 %v5711_v5 }
0x12e7   :  { %v2349_v23 = vsel %vm2333_vm12, %v2341_v32, %v2325_v43  ;;  %v2324_v29 = vmul.u32 64, %v2316_v46  ;;  %v5756_v20 = vsel %vm6664_vm0, %v5747_v57, 2147483648 }
0x12e8   :  { %v5751_v25 = vsel %vm3342_vm1, %v5547_v8, %v2349_v23  ;;  %2392 = vmax.xlane.f32.xlu0 %v5737_v1  ;;  %v2224_v4 = vadd.s32 %v2223_v19, %v2221_v7  ;;  %v2374_v28 = vshra.s32 %v5756_v20, 16  ;;  %v2282_v19 = vcvt.f32.s32 %v5714_v35 }
0x12e9   :  { %vm2332_vm8 = vcmp.lt.s32.totalorder %v2324_v29, 0  ;;  %v2340_v10 = vxor.u32 2147483647, %v2324_v29  ;;  %v2297_v35 = vcvt.f32.s32 %v5717_v13 }
0x12ea   :  { %vm2302_vm9 = vcmp.eq.s32.totalorder %v5566_v26, %v2224_v4  ;;  %v2318_v6 = vshra.s32 %v2224_v4, 6  ;;  %v5760_v17 = vcvt.s32.f32 %v2374_v28 }
0x12eb   :  { %v2348_v55 = vsel %vm2332_vm8, %v2340_v10, %v2324_v29  ;;  %vm5764_vm14 = vmor %vm5560_vm15, %vm2302_vm9  ;;  %v5770_v48 = vsel %vm2302_vm9, %v4095_v37, %v5566_v26  ;;  %v2268_v29 = vshll.u32 %v2267_v9, 16 }
0x12ec   :  { %v5775_v60 = vsel %vm3342_vm1, %v5571_v38, %v2348_v55  ;;  %v2326_v63 = vmul.u32 64, %v2318_v6  ;;  %2377 = vmax.xlane.f32.xlu1 %v5760_v17  ;;  %v5780_v61 = vsel %vm6667_vm10, %v5770_v48, 2147483648  ;;  %v2252_v38 = vcvt.f32.s32 %v5705_v33  ;;  %vm6672_vm10 = vmmov %vm6664_vm0 }
0x12ed   :  { %v2404_v24 = vshra.s32 %v5780_v61, 16  ;;  %v2235_v47 = vpop.xlane.xlu0 %2234 }
0x12ee   :  { %vm2334_vm15 = vcmp.lt.s32.totalorder %v2326_v63, 0  ;;  %v2342_v3 = vxor.u32 2147483647, %v2326_v63  ;;  %v2236_v12 = vcvt.f32.s32 %v2235_v47  ;;  %v2253_v15 = vshll.u32 %v2252_v38, 16 }
0x12ef   :  { %v5783_v26 = vcvt.s32.f32 %v2404_v24 }
0x12f0   :  { %v2350_v41 = vsel %vm2334_vm15, %v2342_v3, %v2326_v63  ;;  %v2239_v45 = vadd.s32 %v2238_v44, %v2236_v12  ;;  %v2298_v44 = vshll.u32 %v2297_v35, 16 }
0x12f1   :  { %v5788_v58 = vsel %vm3342_vm1, %v5584_v16, %v2350_v41  ;;  %2407 = vmax.xlane.f32.xlu1 %v5783_v26 }
0x12f2   :  { %vm2303_vm12 = vcmp.eq.s32.totalorder %v5596_v42, %v2239_v45  ;;  %v2319_v0 = vshra.s32 %v2239_v45, 6 }
0x12f3   :  { %vm5794_vm7 = vmor %vm5590_vm3, %vm2303_vm12  ;;  %v5800_v33 = vsel %vm2303_vm12, %v4095_v37, %v5596_v42 }
0x12f4   :  { %v2250_v14 = vpop.xlane.xlu1 %2249  ;;  %v2327_v49 = vmul.u32 64, %v2319_v0  ;;  %v5805_v32 = vsel %vm6664_vm0, %v5800_v33, 2147483648 }
0x12f5   :  { %v2251_v16 = vcvt.f32.s32 %v2250_v14  ;;  %v2419_v22 = vshra.s32 %v5805_v32, 16 }
0x12f6   :  { %vm2335_vm8 = vcmp.lt.s32.totalorder %v2327_v49, 0  ;;  %v2343_v27 = vxor.u32 2147483647, %v2327_v49 }
0x12f7   :  { %v2254_v46 = vadd.s32 %v2253_v15, %v2251_v16  ;;  %v5810_v7 = vcvt.s32.f32 %v2419_v22 }
0x12f8   :  { %v2351_v5 = vsel %vm2335_vm8, %v2343_v27, %v2327_v49 }
0x12f9   :  { %vm2304_vm3 = vcmp.eq.s32.totalorder %v5616_v50, %v2254_v46  ;;  %v2320_v23 = vshra.s32 %v2254_v46, 6  ;;  %v5825_v6 = vsel %vm3342_vm1, %v5621_v34, %v2351_v5  ;;  %2422 = vmax.xlane.f32.xlu0 %v5810_v7 }
0x12fa   :  { %vm5814_vm9 = vmor %vm5610_vm6, %vm2304_vm3  ;;  %v5820_v28 = vsel %vm2304_vm3, %v4095_v37, %v5616_v50  ;;  %v2283_v50 = vshll.u32 %v2282_v19, 16 }
0x12fb   :  { %v2328_v55 = vmul.u32 64, %v2320_v23  ;;  %v5830_v56 = vsel %vm6672_vm10, %v5820_v28, 2147483648  ;;  %vm6677_vm10 = vmmov %vm6664_vm0 }
0x12fc   :  { %v2265_v42 = vpop.xlane.xlu0 %2264  ;;  %v2434_v24 = vshra.s32 %v5830_v56, 16 }
0x12fd   :  { %v2266_v10 = vcvt.f32.s32 %v2265_v42  ;;  %vm2336_vm6 = vcmp.lt.s32.totalorder %v2328_v55, 0  ;;  %v2344_v3 = vxor.u32 2147483647, %v2328_v55 }
0x12fe   :  { %v2280_v63 = vpop.xlane.xlu1 %2279  ;;  %v5834_v34 = vcvt.s32.f32 %v2434_v24 }
0x12ff   :  { %v2269_v21 = vadd.s32 %v2268_v29, %v2266_v10  ;;  %v2281_v47 = vcvt.f32.s32 %v2280_v63  ;;  %v2352_v41 = vsel %vm2336_vm6, %v2344_v3, %v2328_v55 }
0x1300   :  { %v5848_v14 = vsel %vm3342_vm1, %v5644_v53, %v2352_v41  ;;  %2437 = vmax.xlane.f32.xlu1 %v5834_v34 }
0x1301   :  { %vm2305_vm15 = vcmp.eq.s32.totalorder %v5640_v51, %v2269_v21  ;;  %v2321_v13 = vshra.s32 %v2269_v21, 6  ;;  %v2284_v45 = vadd.s32 %v2283_v50, %v2281_v47  ;;  %v2295_v0 = vpop.xlane.xlu0 %2294 }
0x1302   :  { %vm5838_vm12 = vmor %vm5634_vm5, %vm2305_vm15  ;;  %v5844_v38 = vsel %vm2305_vm15, %v4095_v37, %v5640_v51  ;;  %v2296_v16 = vcvt.f32.s32 %v2295_v0 }
0x1303   :  { %v2329_v15 = vmul.u32 64, %v2321_v13  ;;  %v5853_v18 = vsel %vm6664_vm0, %v5844_v38, 2147483648  ;;  %vm2306_vm5 = vcmp.eq.s32.totalorder %v5661_v36, %v2284_v45  ;;  %v2322_v9 = vshra.s32 %v2284_v45, 6 }
0x1304   :  { %v2449_v51 = vshra.s32 %v5853_v18, 16  ;;  %vm5859_vm3 = vmor %vm5655_vm13, %vm2306_vm5  ;;  %v5865_v46 = vsel %vm2306_vm5, %v4095_v37, %v5661_v36  ;;  %v2299_v22 = vadd.s32 %v2298_v44, %v2296_v16  ;;  %v2388_v13 = vand.u32 65535, %v5733_v2 }
0x1305   :  { %vm2337_vm8 = vcmp.lt.s32.totalorder %v2329_v15, 0  ;;  %v2345_v49 = vxor.u32 2147483647, %v2329_v15  ;;  %v2330_v27 = vmul.u32 64, %v2322_v9  ;;  %v5869_v23 = vsel %vm6677_vm10, %v5865_v46, 2147483648 }
0x1306   :  { %v2451_v19 = vcvt.s32.f32 %v2449_v51  ;;  %vm2307_vm6 = vcmp.eq.s32.totalorder %v5681_v52, %v2299_v22  ;;  %v2323_v29 = vshra.s32 %v2299_v22, 6  ;;  %v2464_v11 = vshra.s32 %v5869_v23, 16 }
0x1307   :  { %v2353_v42 = vsel %vm2337_vm8, %v2345_v49, %v2329_v15  ;;  %vm2338_vm13 = vcmp.lt.s32.totalorder %v2330_v27, 0  ;;  %v2346_v36 = vxor.u32 2147483647, %v2330_v27  ;;  %vm5879_vm15 = vmor %vm5675_vm11, %vm2307_vm6  ;;  %v5885_v35 = vsel %vm2307_vm6, %v4095_v37, %v5681_v52 }
0x1308   :  { %v5875_v5 = vsel %vm3342_vm1, %v5671_v54, %v2353_v42  ;;  %2452 = vmax.xlane.f32.xlu0 %v2451_v19  ;;  %v2331_v55 = vmul.u32 64, %v2323_v29  ;;  %v2466_v21 = vcvt.s32.f32 %v2464_v11  ;;  %v2477_v63 = vsel %vm6664_vm0, %v5885_v35, 2147483648 }
0x1309   :  { %v2354_v54 = vsel %vm2338_vm13, %v2346_v36, %v2330_v27  ;;  %v2479_v24 = vshra.s32 %v2477_v63, 16  ;;  %v2390_v41 = vcvt.s32.f32 %v2388_v13  ;;  %v2373_v45 = vand.u32 65535, %v5756_v20 }
0x130a   :  { %v5891_v50 = vsel %vm3342_vm1, %v5687_v39, %v2354_v54  ;;  %vm2339_vm11 = vcmp.lt.s32.totalorder %v2331_v55, 0  ;;  %v2347_v40 = vxor.u32 2147483647, %v2331_v55  ;;  %2467 = vmax.xlane.f32.xlu1 %v2466_v21  ;;  %v2403_v16 = vand.u32 65535, %v5780_v61 }
0x130b   :  { %v2481_v3 = vcvt.s32.f32 %v2479_v24  ;;  %v2375_v15 = vcvt.s32.f32 %v2373_v45 }
0x130c   :  { %v2355_v47 = vsel %vm2339_vm11, %v2347_v40, %v2331_v55  ;;  %v2405_v51 = vcvt.s32.f32 %v2403_v16 }
0x130d   :  { %v5895_v52 = vsel %vm3342_vm1, %v5691_v30, %v2355_v47  ;;  %2482 = vmax.xlane.f32.xlu0 %v2481_v3 }
0x1375   :  { %v2393_v44 = vpop.xlane.xlu0 %2392 }
0x1376   :  { %vm2394_vm5 = vcmp.eq.f32.partialorder %v5737_v1, %v2393_v44  ;;  %v2418_v1 = vand.u32 65535, %v5805_v32  ;;  %v2463_v32 = vand.u32 65535, %v5869_v23  ;;  %v2399_v24 = vcvt.f32.s32 %v2393_v44 }
0x1377   :  { %v2395_v39 = vsel %vm2394_vm5, %v2390_v41, -inf }
0x1378   :  { %2396 = vmax.xlane.f32.xlu0 %v2395_v39  ;;  %v2420_v20 = vcvt.s32.f32 %v2418_v1  ;;  %v2465_v55 = vcvt.s32.f32 %v2463_v32 }
0x1379   :  { %v2378_v0 = vpop.xlane.xlu1 %2377 }
0x137a   :  { %vm2379_vm8 = vcmp.eq.f32.partialorder %v5760_v17, %v2378_v0  ;;  %v2433_v17 = vand.u32 65535, %v5830_v56  ;;  %v2478_v56 = vand.u32 65535, %v2477_v63  ;;  %v2384_v63 = vcvt.f32.s32 %v2378_v0 }
0x137b   :  { %v2380_v9 = vsel %vm2379_vm8, %v2375_v15, -inf }
0x137c   :  { %2381 = vmax.xlane.f32.xlu1 %v2380_v9  ;;  %v2435_v27 = vcvt.s32.f32 %v2433_v17  ;;  %v2480_v54 = vcvt.s32.f32 %v2478_v56 }
0x137e   :  { %v2408_v30 = vpop.xlane.xlu1 %2407 }
0x137f   :  { %vm2409_vm1 = vcmp.eq.f32.partialorder %v5783_v26, %v2408_v30  ;;  %v2448_v26 = vand.u32 65535, %v5853_v18  ;;  %v2414_v44 = vcvt.f32.s32 %v2408_v30 }
0x1380   :  { %v2410_v2 = vsel %vm2409_vm1, %v2405_v51, -inf  ;;  %vm6682_vm1 = vcmask 523264  }
0x1381   :  { %2411 = vmax.xlane.f32.xlu1 %v2410_v2  ;;  %v2450_v11 = vcvt.s32.f32 %v2448_v26 }
0x1386   :  { %v5904_v49 = vpop.xlane.xlu0 %2422 }
0x1387   :  { %vm2424_vm10 = vcmp.eq.f32.partialorder %v5810_v7, %v5904_v49 }
0x1388   :  { %v2425_v22 = vsel %vm2424_vm10, %v2420_v20, -inf  ;;  %vm3351_vm10 = vcmask 64512   ;;  %v2415_v20 = vshll.u32 %v2414_v44, 16 }
0x1389   :  { %2426 = vmax.xlane.f32.xlu0 %v2425_v22 }
0x138d   :  { %v5909_v61 = vpop.xlane.xlu1 %2437 }
0x138e   :  { %vm2439_vm6 = vcmp.eq.f32.partialorder %v5834_v34, %v5909_v61 }
0x138f   :  { %v2440_v42 = vsel %vm2439_vm6, %v2435_v27, -inf }
0x1390   :  { %2441 = vmax.xlane.f32.xlu1 %v2440_v42 }
0x1395   :  { %v5915_v29 = vpop.xlane.xlu0 %2452 }
0x1396   :  { %vm2454_vm13 = vcmp.eq.f32.partialorder %v2451_v19, %v5915_v29  ;;  %v2400_v19 = vshll.u32 %v2399_v24, 16 }
0x1397   :  { %v2455_v7 = vsel %vm2454_vm13, %v2450_v11, -inf  ;;  %v5918_v36 = vpop.xlane.xlu1 %2467 }
0x1398   :  { %2456 = vmax.xlane.f32.xlu0 %v2455_v7  ;;  %vm2469_vm0 = vcmp.eq.f32.partialorder %v2466_v21, %v5918_v36  ;;  %v2385_v21 = vshll.u32 %v2384_v63, 16 }
0x1399   :  { %v2470_v34 = vsel %vm2469_vm0, %v2465_v55, -inf  ;;  %vm6685_vm0 = vmmov %vm6682_vm1 }
0x139a   :  { %2471 = vmax.xlane.f32.xlu1 %v2470_v34  ;;  %v5921_v18 = vpop.xlane.xlu0 %2482 }
0x139b   :  { %vm2484_vm11 = vcmp.eq.f32.partialorder %v2481_v3, %v5921_v18 }
0x139c   :  { %v2485_v23 = vsel %vm2484_vm11, %v2480_v54, -inf  ;;  %v2429_v54 = vcvt.f32.s32 %v5904_v49 }
0x139d   :  { %2486 = vmax.xlane.f32.xlu0 %v2485_v23 }
0x139e   :  { %v2430_v63 = vshll.u32 %v2429_v54, 16 }
0x1405   :  { %v2397_v40 = vpop.xlane.xlu0 %2396 }
0x1406   :  { %v2398_v47 = vcvt.f32.s32 %v2397_v40 }
0x1408   :  { %v2401_v13 = vadd.s32 %v2400_v19, %v2398_v47 }
0x1409   :  { %v2382_v45 = vpop.xlane.xlu1 %2381 }
0x140a   :  { %vm2493_vm5 = vcmp.eq.s32.totalorder %v5729_v62, %v2401_v13  ;;  %v2509_v41 = vshra.s32 %v2401_v13, 6  ;;  %v2383_v39 = vcvt.f32.s32 %v2382_v45 }
0x140b   :  { %v5927_v15 = vsel %vm2493_vm5, %v4095_v37, %v5729_v62  ;;  %vm5931_vm8 = vmor %vm5723_vm2, %vm2493_vm5 }
0x140c   :  { %v2517_v16 = vmul.u32 64, %v2509_v41  ;;  %v5937_v0 = vsel %vm6682_vm1, %v5927_v15, 2147483648  ;;  %v2386_v9 = vadd.s32 %v2385_v21, %v2383_v39  ;;  %vm6688_vm1 = vmmov %vm6685_vm0 }
0x140d   :  { %v2581_v51 = vshra.s32 %v5937_v0, 16 }
0x140e   :  { %vm2525_vm6 = vcmp.lt.s32.totalorder %v2517_v16, 0  ;;  %v2533_v2 = vxor.u32 2147483647, %v2517_v16  ;;  %vm2492_vm13 = vcmp.eq.s32.totalorder %v5747_v57, %v2386_v9  ;;  %v2508_v62 = vshra.s32 %v2386_v9, 6  ;;  %v2412_v31 = vpop.xlane.xlu1 %2411 }
0x140f   :  { %v5941_v1 = vcvt.s32.f32 %v2581_v51  ;;  %v2413_v30 = vcvt.f32.s32 %v2412_v31  ;;  %v5945_v22 = vsel %vm2492_vm13, %v4095_v37, %v5747_v57  ;;  %vm5949_vm2 = vmor %vm5741_vm4, %vm2492_vm13 }
0x1410   :  { %v2541_v17 = vsel %vm2525_vm6, %v2533_v2, %v2517_v16  ;;  %v2516_v42 = vmul.u32 64, %v2508_v62  ;;  %v5960_v32 = vsel %vm6685_vm0, %v5945_v22, 2147483648 }
0x1411   :  { %v5955_v26 = vsel %vm3351_vm10, %v5751_v25, %v2541_v17  ;;  %2584 = vmax.xlane.f32.xlu0 %v5941_v1  ;;  %v2416_v11 = vadd.s32 %v2415_v20, %v2413_v30  ;;  %v2566_v57 = vshra.s32 %v5960_v32, 16 }
0x1412   :  { %vm2524_vm11 = vcmp.lt.s32.totalorder %v2516_v42, 0  ;;  %v2532_v59 = vxor.u32 2147483647, %v2516_v42 }
0x1413   :  { %vm2494_vm4 = vcmp.eq.s32.totalorder %v5770_v48, %v2416_v11  ;;  %v2510_v7 = vshra.s32 %v2416_v11, 6  ;;  %v5964_v56 = vcvt.s32.f32 %v2566_v57 }
0x1414   :  { %v2540_v55 = vsel %vm2524_vm11, %v2532_v59, %v2516_v42  ;;  %v5968_v25 = vsel %vm2494_vm4, %v4095_v37, %v5770_v48  ;;  %vm5972_vm5 = vmor %vm5764_vm14, %vm2494_vm4 }
0x1415   :  { %v5979_v23 = vsel %vm3351_vm10, %v5775_v60, %v2540_v55  ;;  %v2518_v24 = vmul.u32 64, %v2510_v7  ;;  %2569 = vmax.xlane.f32.xlu1 %v5964_v56  ;;  %v5984_v40 = vsel %vm6688_vm1, %v5968_v25, 2147483648  ;;  %v2444_v60 = vcvt.f32.s32 %v5909_v61  ;;  %vm6693_vm1 = vmmov %vm6685_vm0 }
0x1416   :  { %v2596_v48 = vshra.s32 %v5984_v40, 16  ;;  %v2427_v19 = vpop.xlane.xlu0 %2426 }
0x1417   :  { %vm2526_vm6 = vcmp.lt.s32.totalorder %v2518_v24, 0  ;;  %v2534_v8 = vxor.u32 2147483647, %v2518_v24  ;;  %v2428_v13 = vcvt.f32.s32 %v2427_v19  ;;  %v2445_v44 = vshll.u32 %v2444_v60, 16 }
0x1418   :  { %v5987_v47 = vcvt.s32.f32 %v2596_v48 }
0x1419   :  { %v2542_v49 = vsel %vm2526_vm6, %v2534_v8, %v2518_v24  ;;  %v2431_v45 = vadd.s32 %v2430_v63, %v2428_v13 }
0x141a   :  { %v5992_v41 = vsel %vm3351_vm10, %v5788_v58, %v2542_v49  ;;  %2599 = vmax.xlane.f32.xlu1 %v5987_v47  ;;  %v2459_v58 = vcvt.f32.s32 %v5915_v29 }
0x141b   :  { %vm2495_vm14 = vcmp.eq.s32.totalorder %v5800_v33, %v2431_v45  ;;  %v2511_v21 = vshra.s32 %v2431_v45, 6 }
0x141c   :  { %v5998_v9 = vsel %vm2495_vm14, %v4095_v37, %v5800_v33  ;;  %vm6002_vm13 = vmor %vm5794_vm7, %vm2495_vm14  ;;  %v2474_v33 = vcvt.f32.s32 %v5918_v36  ;;  %v2460_v42 = vshll.u32 %v2459_v58, 16  ;;  %v2489_v36 = vcvt.f32.s32 %v5921_v18 }
0x141d   :  { %v2442_v39 = vpop.xlane.xlu1 %2441  ;;  %v2519_v51 = vmul.u32 64, %v2511_v21  ;;  %v6009_v2 = vsel %vm6685_vm0, %v5998_v9, 2147483648 }
0x141e   :  { %v2443_v16 = vcvt.f32.s32 %v2442_v39  ;;  %v2611_v31 = vshra.s32 %v6009_v2, 16  ;;  %v2475_v48 = vshll.u32 %v2474_v33, 16  ;;  %v2490_v63 = vshll.u32 %v2489_v36, 16 }
0x141f   :  { %vm2527_vm11 = vcmp.lt.s32.totalorder %v2519_v51, 0  ;;  %v2535_v20 = vxor.u32 2147483647, %v2519_v51 }
0x1420   :  { %v2446_v62 = vadd.s32 %v2445_v44, %v2443_v16  ;;  %v6014_v30 = vcvt.s32.f32 %v2611_v31 }
0x1421   :  { %v2543_v29 = vsel %vm2527_vm11, %v2535_v20, %v2519_v51 }
0x1422   :  { %vm2496_vm4 = vcmp.eq.s32.totalorder %v5820_v28, %v2446_v62  ;;  %v2512_v43 = vshra.s32 %v2446_v62, 6  ;;  %v6029_v7 = vsel %vm3351_vm10, %v5825_v6, %v2543_v29  ;;  %2614 = vmax.xlane.f32.xlu0 %v6014_v30 }
0x1423   :  { %v6018_v57 = vsel %vm2496_vm4, %v4095_v37, %v5820_v28  ;;  %vm6022_vm7 = vmor %vm5814_vm9, %vm2496_vm4 }
0x1424   :  { %v2520_v55 = vmul.u32 64, %v2512_v43  ;;  %v6034_v54 = vsel %vm6693_vm1, %v6018_v57, 2147483648  ;;  %vm6698_vm1 = vmmov %vm6685_vm0 }
0x1425   :  { %v2457_v17 = vpop.xlane.xlu0 %2456  ;;  %v2626_v4 = vshra.s32 %v6034_v54, 16 }
0x1426   :  { %v2458_v11 = vcvt.f32.s32 %v2457_v17  ;;  %vm2528_vm9 = vcmp.lt.s32.totalorder %v2520_v55, 0  ;;  %v2536_v8 = vxor.u32 2147483647, %v2520_v55 }
0x1427   :  { %v2472_v24 = vpop.xlane.xlu1 %2471  ;;  %v6038_v6 = vcvt.s32.f32 %v2626_v4 }
0x1428   :  { %v2461_v28 = vadd.s32 %v2460_v42, %v2458_v11  ;;  %v2473_v19 = vcvt.f32.s32 %v2472_v24  ;;  %v2544_v49 = vsel %vm2528_vm9, %v2536_v8, %v2520_v55 }
0x1429   :  { %v6052_v39 = vsel %vm3351_vm10, %v5848_v14, %v2544_v49  ;;  %2629 = vmax.xlane.f32.xlu1 %v6038_v6  ;;  %v2565_v49 = vand.u32 65535, %v5960_v32 }
0x142a   :  { %vm2497_vm6 = vcmp.eq.s32.totalorder %v5844_v38, %v2461_v28  ;;  %v2513_v18 = vshra.s32 %v2461_v28, 6  ;;  %v2476_v13 = vadd.s32 %v2475_v48, %v2473_v19  ;;  %v2487_v60 = vpop.xlane.xlu0 %2486  ;;  %v2580_v19 = vand.u32 65535, %v5937_v0 }
0x142b   :  { %v6042_v45 = vsel %vm2497_vm6, %v4095_v37, %v5844_v38  ;;  %vm6046_vm14 = vmor %vm5838_vm12, %vm2497_vm6  ;;  %v2488_v16 = vcvt.f32.s32 %v2487_v60  ;;  %v2567_v60 = vcvt.s32.f32 %v2565_v49 }
0x142c   :  { %v2521_v44 = vmul.u32 64, %v2513_v18  ;;  %v6057_v58 = vsel %vm6685_vm0, %v6042_v45, 2147483648  ;;  %vm2498_vm11 = vcmp.eq.s32.totalorder %v5865_v46, %v2476_v13  ;;  %v2514_v38 = vshra.s32 %v2476_v13, 6 }
0x142d   :  { %v2641_v12 = vshra.s32 %v6057_v58, 16  ;;  %v2491_v62 = vadd.s32 %v2490_v63, %v2488_v16  ;;  %v6063_v14 = vsel %vm2498_vm11, %v4095_v37, %v5865_v46  ;;  %vm6067_vm4 = vmor %vm5859_vm3, %vm2498_vm11  ;;  %v2582_v63 = vcvt.s32.f32 %v2580_v19 }
0x142e   :  { %vm2529_vm12 = vcmp.lt.s32.totalorder %v2521_v44, 0  ;;  %v2537_v51 = vxor.u32 2147483647, %v2521_v44  ;;  %v2522_v20 = vmul.u32 64, %v2514_v38  ;;  %v6073_v43 = vsel %vm6698_vm1, %v6063_v14, 2147483648 }
0x142f   :  { %v2643_v33 = vcvt.s32.f32 %v2641_v12  ;;  %vm2499_vm9 = vcmp.eq.s32.totalorder %v5885_v35, %v2491_v62  ;;  %v2515_v42 = vshra.s32 %v2491_v62, 6  ;;  %v2656_v29 = vshra.s32 %v6073_v43, 16 }
0x1430   :  { %v2545_v17 = vsel %vm2529_vm12, %v2537_v51, %v2521_v44  ;;  %vm2530_vm3 = vcmp.lt.s32.totalorder %v2522_v20, 0  ;;  %v2538_v53 = vxor.u32 2147483647, %v2522_v20  ;;  %v6083_v11 = vsel %vm2499_vm9, %v4095_v37, %v5885_v35  ;;  %vm6087_vm6 = vmor %vm5879_vm15, %vm2499_vm9 }
0x1431   :  { %v6079_v46 = vsel %vm3351_vm10, %v5875_v5, %v2545_v17  ;;  %2644 = vmax.xlane.f32.xlu0 %v2643_v33  ;;  %v2523_v55 = vmul.u32 64, %v2515_v42  ;;  %v2658_v28 = vcvt.s32.f32 %v2656_v29  ;;  %v2669_v24 = vsel %vm6685_vm0, %v6083_v11, 2147483648 }
0x1432   :  { %v2546_v5 = vsel %vm2530_vm3, %v2538_v53, %v2522_v20  ;;  %v2671_v4 = vshra.s32 %v2669_v24, 16  ;;  %v2595_v44 = vand.u32 65535, %v5984_v40 }
0x1433   :  { %v6095_v48 = vsel %vm3351_vm10, %v5891_v50, %v2546_v5  ;;  %vm2531_vm11 = vcmp.lt.s32.totalorder %v2523_v55, 0  ;;  %v2539_v37 = vxor.u32 2147483647, %v2523_v55  ;;  %2659 = vmax.xlane.f32.xlu1 %v2658_v28 }
0x1434   :  { %v2673_v35 = vcvt.s32.f32 %v2671_v4  ;;  %v2597_v38 = vcvt.s32.f32 %v2595_v44 }
0x1435   :  { %v2547_v10 = vsel %vm2531_vm11, %v2539_v37, %v2523_v55 }
0x1436   :  { %v6099_v8 = vsel %vm3351_vm10, %v5895_v52, %v2547_v10  ;;  %2674 = vmax.xlane.f32.xlu0 %v2673_v35 }
0x149e   :  { %v2585_v18 = vpop.xlane.xlu0 %2584 }
0x149f   :  { %vm2586_vm15 = vcmp.eq.f32.partialorder %v5941_v1, %v2585_v18  ;;  %v2610_v1 = vand.u32 65535, %v6009_v2  ;;  %v2655_v2 = vand.u32 65535, %v6073_v43  ;;  %v2591_v5 = vcvt.f32.s32 %v2585_v18  ;;  %v6703_v18 = vld [vmem:[#allocation11_spill] sm:$0xff] }
0x14a0   :  { %v2587_v50 = vsel %vm2586_vm15, %v2582_v63, -inf }
0x14a1   :  { %2588 = vmax.xlane.f32.xlu0 %v2587_v50  ;;  %v2612_v32 = vcvt.s32.f32 %v2610_v1  ;;  %v2657_v53 = vcvt.s32.f32 %v2655_v2 }
0x14a2   :  { %v2570_v13 = vpop.xlane.xlu1 %2569 }
0x14a3   :  { %vm2571_vm12 = vcmp.eq.f32.partialorder %v5964_v56, %v2570_v13  ;;  %v2625_v56 = vand.u32 65535, %v6034_v54  ;;  %v2670_v54 = vand.u32 65535, %v2669_v24  ;;  %v2576_v24 = vcvt.f32.s32 %v2570_v13 }
0x14a4   :  { %v2572_v16 = vsel %vm2571_vm12, %v2567_v60, -inf }
0x14a5   :  { %2573 = vmax.xlane.f32.xlu1 %v2572_v16  ;;  %v2627_v62 = vcvt.s32.f32 %v2625_v56  ;;  %v2672_v55 = vcvt.s32.f32 %v2670_v54 }
0x14a7   :  { %v2600_v52 = vpop.xlane.xlu1 %2599 }
0x14a8   :  { %vm2601_vm10 = vcmp.eq.f32.partialorder %v5987_v47, %v2600_v52  ;;  %v2640_v47 = vand.u32 65535, %v6057_v58 }
0x14a9   :  { %v2602_v0 = vsel %vm2601_vm10, %v2597_v38, -inf  ;;  %vm6704_vm10 = vcmask 523264  }
0x14aa   :  { %2603 = vmax.xlane.f32.xlu1 %v2602_v0  ;;  %v2642_v42 = vcvt.s32.f32 %v2640_v47 }
0x14af   :  { %v6108_v12 = vpop.xlane.xlu0 %2614 }
0x14b0   :  { %vm2616_vm1 = vcmp.eq.f32.partialorder %v6014_v30, %v6108_v12 }
0x14b1   :  { %v2617_v51 = vsel %vm2616_vm1, %v2612_v32, -inf  ;;  %vm3360_vm1 = vcmask 72704  }
0x14b2   :  { %2618 = vmax.xlane.f32.xlu0 %v2617_v51 }
0x14b6   :  { %v6113_v40 = vpop.xlane.xlu1 %2629 }
0x14b7   :  { %vm2631_vm9 = vcmp.eq.f32.partialorder %v6038_v6, %v6113_v40 }
0x14b8   :  { %v2632_v20 = vsel %vm2631_vm9, %v2627_v62, -inf  ;;  %v6707_v62 = vld [vmem:[#allocation12_spill] sm:$0xff] }
0x14b9   :  { %2633 = vmax.xlane.f32.xlu1 %v2632_v20 }
0x14be   :  { %v6119_v17 = vpop.xlane.xlu0 %2644 }
0x14bf   :  { %vm2646_vm3 = vcmp.eq.f32.partialorder %v2643_v33, %v6119_v17  ;;  %v2592_v33 = vshll.u32 %v2591_v5, 16 }
0x14c0   :  { %v2647_v30 = vsel %vm2646_vm3, %v2642_v42, -inf  ;;  %v6122_v29 = vpop.xlane.xlu1 %2659 }
0x14c1   :  { %2648 = vmax.xlane.f32.xlu0 %v2647_v30  ;;  %vm2661_vm0 = vcmp.eq.f32.partialorder %v2658_v28, %v6122_v29  ;;  %v2577_v28 = vshll.u32 %v2576_v24, 16  ;;  %v2621_v30 = vcvt.f32.s32 %v6108_v12  ;;  %v2636_v12 = vcvt.f32.s32 %v6113_v40 }
0x14c2   :  { %v2662_v6 = vsel %vm2661_vm0, %v2657_v53, -inf  ;;  %vm6708_vm0 = vmmov %vm6704_vm10  ;;  %v2666_v61 = vcvt.f32.s32 %v6122_v29  ;;  %v6718_v29 = vld [vmem:[#allocation16_spill] sm:$0xff] }
0x14c3   :  { %2663 = vmax.xlane.f32.xlu1 %v2662_v6  ;;  %v6125_v58 = vpop.xlane.xlu0 %2674  ;;  %v6711_v6 = vld [vmem:[#allocation14_spill] sm:$0xff]  ;;  %v2622_v5 = vshll.u32 %v2621_v30, 16 }
0x14c4   :  { %vm2676_vm11 = vcmp.eq.f32.partialorder %v2673_v35, %v6125_v58  ;;  %v2606_v35 = vcvt.f32.s32 %v2600_v52 }
0x14c5   :  { %v2677_v43 = vsel %vm2676_vm11, %v2672_v55, -inf }
0x14c6   :  { %2678 = vmax.xlane.f32.xlu0 %v2677_v43  ;;  %v2607_v0 = vshll.u32 %v2606_v35, 16  ;;  %v2651_v35 = vcvt.f32.s32 %v6119_v17 }
0x14c8   :  { %v2652_v17 = vshll.u32 %v2651_v35, 16 }
0x152e   :  { %v2589_v4 = vpop.xlane.xlu0 %2588 }
0x152f   :  { %v2590_v37 = vcvt.f32.s32 %v2589_v4 }
0x1531   :  { %v2593_v10 = vadd.s32 %v2592_v33, %v2590_v37 }
0x1532   :  { %v2574_v63 = vpop.xlane.xlu1 %2573 }
0x1533   :  { %vm2685_vm15 = vcmp.eq.s32.totalorder %v5927_v15, %v2593_v10  ;;  %v2701_v19 = vshra.s32 %v2593_v10, 6  ;;  %v2575_v49 = vcvt.f32.s32 %v2574_v63  ;;  %v2637_v63 = vshll.u32 %v2636_v12, 16 }
0x1534   :  { %vm6131_vm12 = vmor %vm5931_vm8, %vm2685_vm15 }
0x1535   :  { %v2709_v60 = vmul.u32 64, %v2701_v19  ;;  %v6138_v44 = vsel %vm6131_vm12, %v6703_v18, -inf  ;;  %v2578_v13 = vadd.s32 %v2577_v28, %v2575_v49 }
0x1536   :  { %v2759_v15 = vsel %vm6704_vm10, %v6138_v44, -inf  ;;  %vm6712_vm10 = vmmov %vm6708_vm0 }
0x1537   :  { %vm2717_vm9 = vcmp.lt.s32.totalorder %v2709_v60, 0  ;;  %v2725_v16 = vxor.u32 2147483647, %v2709_v60  ;;  %2760 = vmax.xlane.f32.xlu0 %v2759_v15  ;;  %vm2684_vm8 = vcmp.eq.s32.totalorder %v5945_v22, %v2578_v13  ;;  %v2700_v3 = vshra.s32 %v2578_v13, 6  ;;  %v2604_v38 = vpop.xlane.xlu1 %2603 }
0x1538   :  { %v2605_v1 = vcvt.f32.s32 %v2604_v38  ;;  %vm6145_vm3 = vmor %vm5949_vm2, %vm2684_vm8 }
0x1539   :  { %v2733_v52 = vsel %vm2717_vm9, %v2725_v16, %v2709_v60  ;;  %v2708_v51 = vmul.u32 64, %v2700_v3  ;;  %v6154_v47 = vsel %vm6145_vm3, %v6707_v62, -inf  ;;  %v6715_v60 = vld [vmem:[#allocation13_spill] sm:$0xff] }
0x153a   :  { %v3362_v56 = vsel %vm3360_vm1, %v5955_v26, %v2733_v52  ;;  %v2608_v22 = vadd.s32 %v2607_v0, %v2605_v1  ;;  %v2756_v20 = vsel %vm6708_vm0, %v6154_v47, -inf  ;;  %v2681_v52 = vcvt.f32.s32 %v6125_v58 }
0x153b   :  { %vm2716_vm11 = vcmp.lt.s32.totalorder %v2708_v51, 0  ;;  %v2724_v2 = vxor.u32 2147483647, %v2708_v51  ;;  %2757 = vmax.xlane.f32.xlu1 %v2756_v20 }
0x153c   :  { %vm2686_vm2 = vcmp.eq.s32.totalorder %v5968_v25, %v2608_v22  ;;  %v2702_v27 = vshra.s32 %v2608_v22, 6  ;;  %v2682_v58 = vshll.u32 %v2681_v52, 16 }
0x153d   :  { %v2732_v42 = vsel %vm2716_vm11, %v2724_v2, %v2708_v51  ;;  %vm6161_vm15 = vmor %vm5972_vm5, %vm2686_vm2  ;;  %v2667_v2 = vshll.u32 %v2666_v61, 16 }
0x153e   :  { %v3361_v54 = vsel %vm3360_vm1, %v5979_v23, %v2732_v42  ;;  %v2710_v53 = vmul.u32 64, %v2702_v27  ;;  %v6171_v55 = vsel %vm6161_vm15, %v6711_v6, -inf }
0x153f   :  { %v2762_v25 = vsel %vm6712_vm10, %v6171_v55, -inf  ;;  %v2619_v43 = vpop.xlane.xlu0 %2618  ;;  %vm6719_vm10 = vmmov %vm6708_vm0 }
0x1540   :  { %vm2718_vm9 = vcmp.lt.s32.totalorder %v2710_v53, 0  ;;  %v2726_v34 = vxor.u32 2147483647, %v2710_v53  ;;  %2763 = vmax.xlane.f32.xlu1 %v2762_v25  ;;  %v2620_v33 = vcvt.f32.s32 %v2619_v43  ;;  %v6722_v43 = vld [vmem:[#allocation15_spill] sm:$0xff] }
0x1542   :  { %v2734_v4 = vsel %vm2718_vm9, %v2726_v34, %v2710_v53  ;;  %v2623_v24 = vadd.s32 %v2622_v5, %v2620_v33 }
0x1543   :  { %v3363_v23 = vsel %vm3360_vm1, %v5992_v41, %v2734_v4 }
0x1544   :  { %v3369_v37 = vadd.f32 %v3363_v23, %v3361_v54  ;;  %vm2687_vm5 = vcmp.eq.s32.totalorder %v5998_v9, %v2623_v24  ;;  %v2703_v10 = vshra.s32 %v2623_v24, 6  ;;  %v6726_v24 = vld [vmem:[#allocation18_spill] sm:$0xff] }
0x1545   :  { %vm6181_vm8 = vmor %vm6002_vm13, %vm2687_vm5 }
0x1546   :  { %v2634_v19 = vpop.xlane.xlu1 %2633  ;;  %v2711_v40 = vmul.u32 64, %v2703_v10  ;;  %v6189_v41 = vsel %vm6181_vm8, %v6715_v60, -inf  ;;  %v6730_v60 = vld [vmem:[#allocation17_spill] sm:$0xff] }
0x1547   :  { %v2635_v28 = vcvt.f32.s32 %v2634_v19  ;;  %v2765_v9 = vsel %vm6708_vm0, %v6189_v41, -inf }
0x1548   :  { %vm2719_vm11 = vcmp.lt.s32.totalorder %v2711_v40, 0  ;;  %v2727_v13 = vxor.u32 2147483647, %v2711_v40  ;;  %2766 = vmax.xlane.f32.xlu0 %v2765_v9 }
0x1549   :  { %v2638_v18 = vadd.s32 %v2637_v63, %v2635_v28  ;;  %v6743_v28 = vld [vmem:[#allocation6_spill] sm:$0xff] }
0x154a   :  { %v2735_v3 = vsel %vm2719_vm11, %v2727_v13, %v2711_v40  ;;  %vm6723_vm11 = vmmov %vm6719_vm10 }
0x154b   :  { %vm2688_vm13 = vcmp.eq.s32.totalorder %v6018_v57, %v2638_v18  ;;  %v2704_v15 = vshra.s32 %v2638_v18, 6  ;;  %v3364_v1 = vsel %vm3360_vm1, %v6029_v7, %v2735_v3 }
0x154c   :  { %vm6197_vm2 = vmor %vm6022_vm7, %vm2688_vm13  ;;  %v3370_v62 = vadd.f32 %v3364_v1, %v3362_v56  ;;  %v6732_v1 = vld [vmem:[#allocation5_spill] sm:$0xff] }
0x154d   :  { %v2712_v51 = vmul.u32 64, %v2704_v15  ;;  %v6207_v57 = vsel %vm6197_vm2, %v6718_v29, -inf }
0x154e   :  { %v2649_v16 = vpop.xlane.xlu0 %2648  ;;  %v2768_v59 = vsel %vm6719_vm10, %v6207_v57, -inf }
0x154f   :  { %v2650_v38 = vcvt.f32.s32 %v2649_v16  ;;  %vm2720_vm7 = vcmp.lt.s32.totalorder %v2712_v51, 0  ;;  %v2728_v27 = vxor.u32 2147483647, %v2712_v51  ;;  %2769 = vmax.xlane.f32.xlu1 %v2768_v59 }
0x1550   :  { %v2664_v20 = vpop.xlane.xlu1 %2663 }
0x1551   :  { %v2653_v22 = vadd.s32 %v2652_v17, %v2650_v38  ;;  %v2665_v42 = vcvt.f32.s32 %v2664_v20  ;;  %v2736_v30 = vsel %vm2720_vm7, %v2728_v27, %v2712_v51  ;;  %vm6727_vm7 = vmmov %vm6723_vm11 }
0x1552   :  { %v3365_v6 = vsel %vm3360_vm1, %v6052_v39, %v2736_v30 }
0x1553   :  { %vm2689_vm9 = vcmp.eq.s32.totalorder %v6042_v45, %v2653_v22  ;;  %v2705_v7 = vshra.s32 %v2653_v22, 6  ;;  %v2668_v54 = vadd.s32 %v2667_v2, %v2665_v42  ;;  %v2679_v53 = vpop.xlane.xlu0 %2678  ;;  %v3371_v5 = vadd.f32 %v3369_v37, %v3365_v6 }
0x1554   :  { %vm6214_vm5 = vmor %vm6046_vm14, %vm2689_vm9  ;;  %v2680_v34 = vcvt.f32.s32 %v2679_v53 }
0x1555   :  { %v2713_v25 = vmul.u32 64, %v2705_v7  ;;  %v6223_v45 = vsel %vm6214_vm5, %v6722_v43, -inf  ;;  %vm2690_vm0 = vcmp.eq.s32.totalorder %v6063_v14, %v2668_v54  ;;  %v2706_v4 = vshra.s32 %v2668_v54, 6 }
0x1556   :  { %v2771_v21 = vsel %vm6723_vm11, %v6223_v45, -inf  ;;  %v2683_v12 = vadd.s32 %v2682_v58, %v2680_v34  ;;  %vm6230_vm13 = vmor %vm6067_vm4, %vm2690_vm0 }
0x1557   :  { %vm2721_vm14 = vcmp.lt.s32.totalorder %v2713_v25, 0  ;;  %v2729_v33 = vxor.u32 2147483647, %v2713_v25  ;;  %2772 = vmax.xlane.f32.xlu0 %v2771_v21  ;;  %v2714_v23 = vmul.u32 64, %v2706_v4  ;;  %v6237_v37 = vsel %vm6230_vm13, %v6726_v24, -inf  ;;  %vm6731_vm0 = vmmov %vm6727_vm7 }
0x1558   :  { %vm2691_vm10 = vcmp.eq.s32.totalorder %v6083_v11, %v2683_v12  ;;  %v2707_v10 = vshra.s32 %v2683_v12, 6  ;;  %v2774_v19 = vsel %vm6727_vm7, %v6237_v37, -inf  ;;  %vm6748_vm7 = vmmov %vm6731_vm0 }
0x1559   :  { %v2737_v14 = vsel %vm2721_vm14, %v2729_v33, %v2713_v25  ;;  %vm2722_vm4 = vcmp.lt.s32.totalorder %v2714_v23, 0  ;;  %v2730_v63 = vxor.u32 2147483647, %v2714_v23  ;;  %2775 = vmax.xlane.f32.xlu1 %v2774_v19  ;;  %vm6246_vm9 = vmor %vm6087_vm6, %vm2691_vm10  ;;  %vm3377_vm6 = vcmask 80896  }
0x155a   :  { %v3366_v31 = vsel %vm3360_vm1, %v6079_v46, %v2737_v14  ;;  %v2715_v40 = vmul.u32 64, %v2707_v10  ;;  %v6253_v11 = vsel %vm6246_vm9, %v6730_v60, -inf  ;;  %vm6734_vm14 = vmmov %vm6731_vm0 }
0x155b   :  { %v3372_v35 = vadd.f32 %v3370_v62, %v3366_v31  ;;  %v2738_v18 = vsel %vm2722_vm4, %v2730_v63, %v2714_v23  ;;  %v2777_v46 = vsel %vm6731_vm0, %v6253_v11, -inf  ;;  %vm6740_vm10 = vmmov %vm6731_vm0 }
0x155c   :  { %v3367_v9 = vsel %vm3360_vm1, %v6095_v48, %v2738_v18  ;;  %vm2723_vm11 = vcmp.lt.s32.totalorder %v2715_v40, 0  ;;  %v2731_v36 = vxor.u32 2147483647, %v2715_v40  ;;  %2778 = vmax.xlane.f32.xlu0 %v2777_v46  ;;  %vm6749_vm4 = vmmov %vm6731_vm0 }
0x155d   :  { %v3373_v13 = vadd.f32 %v3371_v5, %v3367_v9 }
0x155e   :  { %v2739_v61 = vsel %vm2723_vm11, %v2731_v36, %v2715_v40  ;;  %v6741_v36 = vld [vmem:[#allocation7_spill] sm:$0xff]  ;;  %vm6751_vm11 = vmmov %vm6731_vm0 }
0x155f   :  { %v3368_v15 = vsel %vm3360_vm1, %v6099_v8, %v2739_v61  ;;  %v3375_v16 = vmul.f32 0.25, %v3373_v13  ;;  %vm6733_vm1 = vmmov %vm6731_vm0  ;;  %v6742_v13 = vld [vmem:[#allocation8_spill] sm:$0xff]  ;;  %v6744_v61 = vld [vmem:[#allocation10_spill] sm:$0xff] }
0x1560   :  { %v3374_v17 = vadd.f32 %v3372_v35, %v3368_v15  ;;  %v6745_v15 = vld [vmem:[#allocation9_spill] sm:$0xff] }
0x1561   :  { %v3378_v3 = vsel %vm3377_vm6, %v3375_v16, 0.0 }
0x1562   :  { %v3376_v38 = vmul.f32 0.25, %v3374_v17  ;;  %3380 = vst [vmem:[#allocation2] sm:$0xff] %v3378_v3 }
0x1564   :  { %v3379_v52 = vsel %vm3377_vm6, %v3376_v38, 0.0  ;;  %vm6752_vm6 = vmmov %vm6731_vm0 }
0x1565   :  { %3381 = vst [vmem:[#allocation2 + $0x8] sm:$0xff] %v3379_v52 }
0x156a   :  { %3841 = vrot.lane.b32.xlu1 %v6732_v1, %s3937_s8 }
0x15c4   :  { %v2761_v48 = vpop.xlane.xlu0 %2760 }
0x15c5   :  { %v2781_v51 = vsub.f32 %v6138_v44, %v2761_v48 }
0x15c7   :  { %v2790_v29 = vmul.f32 1.442695, %v2781_v51 }
0x15c8   :  { %v2758_v62 = vpop.xlane.xlu1 %2757 }
0x15c9   :  { %3860 = vpow2.f32 %v2790_v29  ;;  %v2780_v22 = vsub.f32 %v6154_v47, %v2758_v62 }
0x15cb   :  { %v2788_v8 = vmul.f32 1.442695, %v2780_v22 }
0x15cd   :  { %3862 = vpow2.f32 %v2788_v8  ;;  %v2764_v20 = vpop.xlane.xlu1 %2763 }
0x15ce   :  { %v2782_v59 = vsub.f32 %v6171_v55, %v2764_v20 }
0x15d0   :  { %v2792_v2 = vmul.f32 1.442695, %v2782_v59 }
0x15d2   :  { %3864 = vpow2.f32 %v2792_v2 }
0x15d3   :  { %v3861_v27 = vpop.eup %3860 }
0x15d4   :  { %v6268_v42 = vsel %vm6131_vm12, %v3861_v27, 0.0  ;;  %vm6735_vm12 = vmmov %vm6731_vm0 }
0x15d5   :  { %v2815_v44 = vsel %vm6733_vm1, %v6268_v42, 0.0  ;;  %v2767_v58 = vpop.xlane.xlu0 %2766  ;;  %vm6753_vm1 = vcmask 261120  }
0x15d6   :  { %2816 = vadd.xlane.f32.xlu0 %v2815_v44  ;;  %v2783_v47 = vsub.f32 %v6189_v41, %v2767_v58 }
0x15d7   :  { %v3863_v7 = vpop.eup %3862 }
0x15d8   :  { %v2804_v30 = vsel %vm6145_vm3, %v3863_v7, 0.0  ;;  %v2794_v54 = vmul.f32 1.442695, %v2783_v47  ;;  %vm6736_vm3 = vmmov %vm6731_vm0 }
0x15d9   :  { %v2812_v55 = vsel %vm6734_vm14, %v2804_v30, 0.0  ;;  %vm6754_vm14 = vmmov %vm6753_vm1 }
0x15da   :  { %2813 = vadd.xlane.f32.xlu1 %v2812_v55  ;;  %3866 = vpow2.f32 %v2794_v54 }
0x15dc   :  { %v3865_v53 = vpop.eup %3864  ;;  %v2770_v50 = vpop.xlane.xlu1 %2769 }
0x15dd   :  { %v2784_v6 = vsub.f32 %v6207_v57, %v2770_v50  ;;  %v6279_v25 = vsel %vm6161_vm15, %v3865_v53, 0.0  ;;  %vm6737_vm15 = vmmov %vm6731_vm0 }
0x15de   :  { %v2818_v34 = vsel %vm6735_vm12, %v6279_v25, 0.0  ;;  %vm6755_vm12 = vcmask 130048  }
0x15df   :  { %v2796_v41 = vmul.f32 1.442695, %v2784_v6  ;;  %2819 = vadd.xlane.f32.xlu1 %v2818_v34 }
0x15e1   :  { %3868 = vpow2.f32 %v2796_v41 }
0x15e4   :  { %v2773_v32 = vpop.xlane.xlu0 %2772  ;;  %v3867_v33 = vpop.eup %3866 }
0x15e5   :  { %v2785_v43 = vsub.f32 %v6223_v45, %v2773_v32  ;;  %v6287_v26 = vsel %vm6181_vm8, %v3867_v33, 0.0  ;;  %vm6738_vm8 = vmmov %vm6731_vm0  ;;  %v3019_v33 = vld [vmem:[%s6456_s4] sm:$0xff] }
0x15e6   :  { %v2776_v4 = vpop.xlane.xlu1 %2775  ;;  %v2821_v14 = vsel %vm6736_vm3, %v6287_v26, 0.0  ;;  %vm6756_vm3 = vmmov %vm6755_vm12 }
0x15e7   :  { %v2798_v5 = vmul.f32 1.442695, %v2785_v43  ;;  %v2786_v21 = vsub.f32 %v6237_v37, %v2776_v4  ;;  %2822 = vadd.xlane.f32.xlu0 %v2821_v14 }
0x15e9   :  { %3870 = vpow2.f32 %v2798_v5  ;;  %v2800_v57 = vmul.f32 1.442695, %v2786_v21  ;;  %v2779_v12 = vpop.xlane.xlu0 %2778 }
0x15ea   :  { %v2787_v23 = vsub.f32 %v6253_v11, %v2779_v12  ;;  %v3842_v24 = vpop.permute.xlu1 %3841 }
0x15eb   :  { %v3844_v10 = vunpack.i.h.bf16 %v3842_v24  ;;  %v3843_v45 = vunpack.i.l.bf16 %v3842_v24  ;;  %v3869_v31 = vpop.eup %3868  ;;  %3872 = vpow2.f32 %v2800_v57  ;;  %v3020_v57 = vld [vmem:[%s6456_s4 + $0x8] sm:$0xff] }
0x15ec   :  { %v2802_v19 = vmul.f32 1.442695, %v2787_v23  ;;  %v6294_v63 = vsel %vm6197_vm2, %v3869_v31, 0.0  ;;  %vm6739_vm2 = vmmov %vm6731_vm0  ;;  %v3779_v12 = vpack.c.bf16 %v3020_v57, %v3019_v33  ;;  %v3022_v23 = vld [vmem:[%s6456_s4 + $0x18] sm:$0xff] }
0x15ed   :  { %v3763_v37 = vpack.c.bf16 %v3844_v10, %v3843_v45  ;;  %v2824_v49 = vsel %vm6737_vm15, %v6294_v63, 0.0  ;;  %vm6757_vm15 = vmmov %vm6756_vm3 }
0x15ee   :  { %3874 = vpow2.f32 %v2802_v19  ;;  %2825 = vadd.xlane.f32.xlu1 %v2824_v49  ;;  %v3892_v19 = vld [vmem:[%s6461_s9 + $0x8] sm:$0xff] }
0x15ef   :  { %3764 = vmatprep.subr.bf16.mxu0 %v3763_v37 }
0x15f0   :  { %3766 = vmatpush3.bf16.msra.mxu0 %v3763_v37  ;;  %v3893_v37 = vld [vmem:[%s6461_s9 + $0x18] sm:$0xff] }
0x15f3   :  { %v3871_v35 = vpop.eup %3870 }
0x15f4   :  { %v6300_v40 = vsel %vm6214_vm5, %v3871_v35, 0.0  ;;  %vm6746_vm5 = vmmov %vm6731_vm0  ;;  %v3894_v35 = vld [vmem:[%s6461_s9] sm:$0xff] }
0x15f5   :  { %v2827_v60 = vsel %vm6738_vm8, %v6300_v40, 0.0  ;;  %v3873_v11 = vpop.eup %3872  ;;  %vm6758_vm8 = vmmov %vm6756_vm3 }
0x15f6   :  { %2828 = vadd.xlane.f32.xlu0 %v2827_v60  ;;  %v2810_v9 = vsel %vm6230_vm13, %v3873_v11, 0.0  ;;  %vm6747_vm13 = vmmov %vm6731_vm0  ;;  %v3895_v60 = vld [vmem:[%s6461_s9 + $0x10] sm:$0xff] }
0x15f7   :  { %v2830_v56 = vsel %vm6740_vm10, %v2810_v9, 0.0 }
0x15f8   :  { %v3875_v18 = vpop.eup %3874 }
0x15f9   :  { %v6306_v0 = vsel %vm6246_vm9, %v3875_v18, 0.0  ;;  %vm6750_vm9 = vmmov %vm6731_vm0 }
0x15fa   :  { %v2833_v46 = vsel %vm6739_vm2, %v6306_v0, 0.0  ;;  %vm6759_vm2 = vmmov %vm6756_vm3 }
0x15fb   :  { %2834 = vadd.xlane.f32.xlu0 %v2833_v46  ;;  %vm6760_vm10 = vmmov %vm6759_vm2 }
0x15ff   :  { %2831 = vadd.xlane.f32.xlu0 %v2830_v56  ;;  %3851 = vrot.lane.b32.xlu1 %v6741_v36, %s3937_s8 }
0x1603   :  { %3856 = vrot.lane.b32.xlu1 %v6742_v13, %s3937_s8  ;;  %v3897_v13 = vld [vmem:[%s6461_s9 + $0x20] sm:$0xff] }
0x1615   :  { %3846 = vrot.lane.b32.xlu0 %v6743_v28, %s3937_s8 }
0x162c   :  { %3111 = vxpose.xlu1.b32.start [1/2] (short) (narrow) %v6744_v61, 64 }
0x1630   :  { %3112 = vxpose.xlu1.b32.end [2/2] (short) (narrow) %v6745_v15, 64 }
0x1663   :  { %v2817_v3 = vpop.xlane.xlu0 %2816 }
0x1667   :  { %v2814_v16 = vpop.xlane.xlu1 %2813 }
0x1668   :  { %3876 = vrcp.f32 %v2814_v16 }
0x1669   :  { %3878 = vrcp.f32 %v2817_v3 }
0x166c   :  { %v2820_v52 = vpop.xlane.xlu1 %2819 }
0x166d   :  { %3880 = vrcp.f32 %v2820_v52 }
0x1672   :  { %v3877_v39 = vpop.eup %3876 }
0x1673   :  { %v2837_v17 = vmul.f32 %v3877_v39, %v2804_v30  ;;  %v3879_v55 = vpop.eup %3878  ;;  %v3898_v39 = vld [vmem:[%s6461_s9 + $0x38] sm:$0xff] }
0x1674   :  { %v2823_v38 = vpop.xlane.xlu0 %2822  ;;  %v2839_v53 = vmul.f32 %v3879_v55, %v6268_v42 }
0x1675   :  { %3656 = vmatprep.mubr.msk.f32.mxu0 %vm6746_vm5, %v2837_v17  ;;  %3882 = vrcp.f32 %v2823_v38  ;;  %v3899_v38 = vld [vmem:[%s6461_s9 + $0x30] sm:$0xff]  ;;  %vm6761_vm5 = vmmov %vm6759_vm2 }
0x1677   :  { %v3881_v54 = vpop.eup %3880 }
0x1678   :  { %v2841_v6 = vmul.f32 %v3881_v54, %v6279_v25 }
0x167b   :  { %v2826_v48 = vpop.xlane.xlu1 %2825 }
0x167c   :  { %3884 = vrcp.f32 %v2826_v48 }
0x167f   :  { %v3852_v29 = vpop.permute.xlu1 %3851  ;;  %v3883_v50 = vpop.eup %3882 }
0x1680   :  { %v3854_v8 = vunpack.i.h.bf16 %v3852_v29  ;;  %v3853_v20 = vunpack.i.l.bf16 %v3852_v29  ;;  %v2843_v41 = vmul.f32 %v3883_v50, %v6287_v26  ;;  %v3021_v26 = vld [vmem:[%s6456_s4 + $0x10] sm:$0xff] }
0x1681   :  { %v3783_v24 = vpack.c.bf16 %v3022_v23, %v3021_v26 }
0x1682   :  { %v3771_v7 = vpack.c.bf16 %v3854_v8, %v3853_v20  ;;  %v3453_v8 = vld [vmem:[%s6457_s5] ss:$0 sm:$0xff]  ;;  %s3938_s5 = smov [#allocation2]  }
0x1683   :  { %v2829_v1 = vpop.xlane.xlu0 %2828  ;;  %v3857_v27 = vpop.permute.xlu1 %3856 }
0x1684   :  { %v3859_v58 = vunpack.i.h.bf16 %v3857_v27  ;;  %v3858_v47 = vunpack.i.l.bf16 %v3857_v27  ;;  %3886 = vrcp.f32 %v2829_v1 }
0x1686   :  { %v3775_v30 = vpack.c.bf16 %v3859_v58, %v3858_v47  ;;  %v3885_v34 = vpop.eup %3884 }
0x1687   :  { %v2845_v43 = vmul.f32 %v3885_v34, %v6294_v63 }
0x1688   :  { %v2835_v51 = vpop.xlane.xlu0 %2834 }
0x168c   :  { %v2832_v62 = vpop.xlane.xlu0 %2831 }
0x168d   :  { %3888 = vrcp.f32 %v2832_v62 }
0x168e   :  { %3890 = vrcp.f32 %v2835_v51  ;;  %v3887_v32 = vpop.eup %3886 }
0x168f   :  { %v2847_v42 = vmul.f32 %v3887_v32, %v6300_v40 }
0x1690   :  { %v3847_v22 = vpop.permute.xlu0 %3846 }
0x1691   :  { %v3849_v59 = vunpack.i.h.bf16 %v3847_v22  ;;  %v3848_v2 = vunpack.i.l.bf16 %v3847_v22 }
0x1693   :  { %v3767_v44 = vpack.c.bf16 %v3849_v59, %v3848_v2 }
0x1695   :  { %3768 = vmatprep.subr.bf16.mxu0 %v3767_v44 }
0x1696   :  { %3770 = vmatpush3.bf16.msra.mxu0 %v3767_v44 }
0x1697   :  { %3772 = vmatprep.subr.bf16.mxu0 %v3771_v7  ;;  %v3889_v5 = vpop.eup %3888 }
0x1698   :  { %v3891_v4 = vpop.eup %3890  ;;  %v2849_v21 = vmul.f32 %v3889_v5, %v2810_v9  ;;  %v3896_v9 = vld [vmem:[%s6461_s9 + $0x28] sm:$0xff]  ;;  %s3389_s9 = sshll.u32 %s3938_s5, 4  ;;  %s3390_s9 = int_to_ptr.vmem [resolvable:$true] %s3389_s9 }
0x1699   :  { %v2851_v25 = vmul.f32 %v3891_v4, %v6306_v0  ;;  %s3908_s6 = scalar_lea.vmem %s3390_s9, 256  ;;  %p3913_p1 = scmp.lt.s32.totalorder %s3390_s9, %s3390_s9 }
0x169a   :  { %3774 = vmatpush3.bf16.msra.mxu0 %v3771_v7  ;;  %p3909_p0 = scmp.ne.s32.totalorder %s3390_s9, %s3908_s6  ;;  %p3914_p2 = scmp.lt.s32.totalorder %s3908_s6, %s3908_s6 }
0x169b   :  { %3776 = vmatprep.subr.bf16.mxu0 %v3775_v30 }
0x169c   :  { %p3915_p3 = por %p3914_p2, %p3913_p1 }
0x169e   :  { %3778 = vmatpush3.bf16.msra.mxu0 %v3775_v30  ;;  %p3916_p4 = pnand %p3915_p3, %p3909_p0 }
0x169f   :  { %3780 = vmatprep.subr.bf16.mxu0 %v3779_v12 }
0x16a1   :  { %3657 = vmatmul.mubr.msk.f32.vlgmr.msra.gmra.mrb[10].mxu0 %vm6747_vm13, %v2839_v53  ;;  %vm6762_vm13 = vmmov %vm6759_vm2 }
0x16a2   :  { %3659 = vmatprep.mubr.msk.f32.mxu0 %vm6748_vm7, %v2841_v6  ;;  %3782 = vmatpush3.bf16.msra.mxu0 %v3779_v12 }
0x16a3   :  { %3784 = vmatprep.subr.bf16.mxu0 %v3783_v24 }
0x16a5   :  { %3660 = vmatmul.mubr.msk.f32.gmra.mrb[12].mxu0 %vm6749_vm4, %v2843_v41 }
0x16a6   :  { %3662 = vmatprep.mubr.msk.f32.mxu0 %vm6750_vm9, %v2845_v43  ;;  %3786 = vmatpush3.bf16.msra.mxu0 %v3783_v24 }
0x16a9   :  { %3663 = vmatmul.mubr.msk.f32.gmra.mrb[14].mxu0 %vm6731_vm0, %v2847_v42 }
0x16aa   :  { %3665 = vmatprep.mubr.msk.f32.mxu0 %vm6751_vm11, %v2849_v21 }
0x16ac   :  { %v3127_v51 = vpop.trf.xlu1 }
0x16ad   :  { %3666 = vmatmul.mubr.msk.f32.gmra.mrb[16].mxu0 %vm6752_vm6, %v2851_v25 }
0x16b0   :  { %v3128_v29 = vpop.trf.xlu1 }
0x16b4   :  { %v3129_v62 = vpop.trf.xlu1 }
0x16b8   :  { %v3130_v22 = vpop.trf.xlu1 }
0x16bc   :  { %v3131_v27 = vpop.trf.xlu1 }
0x16c0   :  { %v3132_v58 = vpop.trf.xlu1 }
0x16c4   :  { %v3133_v47 = vpop.trf.xlu1 }
0x16c8   :  { %v3134_v30 = vpop.trf.xlu1 }
0x1774   :  { %v3658_v14 = vpop.f32.mrb[10].mxu0 }
0x1775   :  { %v2966_v10 = vpop.f32.mrb[11].mxu0  ;;  %v3006_v31 = vmul.f32 %v3892_v19, %v3658_v14 }
0x1776   :  { %v3005_v40 = vmul.f32 %v3894_v35, %v2966_v10 }
0x1778   :  { %v3661_v45 = vpop.f32.mrb[12].mxu0 }
0x1779   :  { %v3008_v63 = vmul.f32 %v3893_v37, %v3661_v45  ;;  %v2976_v49 = vpop.f32.mrb[13].mxu0 }
0x177a   :  { %v3007_v11 = vmul.f32 %v3895_v60, %v2976_v49 }
0x177b   :  { %v3014_v18 = vadd.f32 %v3008_v63, %v3006_v31 }
0x177c   :  { %v3013_v0 = vadd.f32 %v3007_v11, %v3005_v40  ;;  %v3664_v46 = vpop.f32.mrb[14].mxu0 }
0x177d   :  { %v3010_v56 = vmul.f32 %v3896_v9, %v3664_v46  ;;  %v2986_v36 = vpop.f32.mrb[15].mxu0 }
0x177e   :  { %v3009_v28 = vmul.f32 %v3897_v13, %v2986_v36 }
0x177f   :  { %v3016_v61 = vadd.f32 %v3014_v18, %v3010_v56 }
0x1780   :  { %v3015_v15 = vadd.f32 %v3013_v0, %v3009_v28  ;;  %v3667_v16 = vpop.f32.mrb[16].mxu0 }
0x1781   :  { %v3012_v17 = vmul.f32 %v3898_v39, %v3667_v16  ;;  %v2996_v3 = vpop.f32.mrb[17].mxu0 }
0x1782   :  { %v3011_v52 = vmul.f32 %v3899_v38, %v2996_v3 }
0x1783   :  { %v3018_v1 = vadd.f32 %v3016_v61, %v3012_v17 }
0x1784   :  { %v3017_v48 = vadd.f32 %v3015_v15, %v3011_v52 }
0x1786   :  { %3676 = vmatprep.mubr.msk.f32.mxu0 %vm6753_vm1, %v3017_v48 }
0x1787   :  { %3677 = vmatmul.mubr.msk.f32.vlgmr.msra.gmra.mrb[18].mxu0 %vm6754_vm14, %v3018_v1 }
0x1788   :  { %3683 = vmatprep.mubr.msk.f32.mxu0 %vm6755_vm12, %v3127_v51 }
0x185a   :  { %v3678_v20 = vpop.f32.mrb[18].mxu0 }
0x185b   :  { %v3108_v59 = vadd.f32 %v3678_v20, %v3453_v8  ;;  %v3102_v2 = vpop.f32.mrb[19].mxu0 }
0x185c   :  { %v3103_v44 = vadd.f32 %v3453_v8, %v3102_v2 }
0x185e   :  { %v3787_v7 = vpack.c.bf16 %v3108_v59, %v3103_v44 }
0x1860   :  { %3788 = vmatprep.subr.bf16.mxu0 %v3787_v7 }
0x1861   :  { %3790 = vmatpush3.bf16.msra.mxu0 %v3787_v7 }
0x1864   :  { %3684 = vmatmul.mubr.msk.f32.vlgmr.msra.gmra.mrb[20].mxu0 %vm6756_vm3, %v3128_v29 }
0x1865   :  { %3686 = vmatprep.mubr.msk.f32.mxu0 %vm6757_vm15, %v3129_v62 }
0x1868   :  { %3687 = vmatmul.mubr.msk.f32.gmra.mrb[22].mxu0 %vm6758_vm8, %v3130_v22 }
0x1869   :  { %3689 = vmatprep.mubr.msk.f32.mxu0 %vm6759_vm2, %v3131_v27 }
0x186c   :  { %3690 = vmatmul.mubr.msk.f32.gmra.mrb[24].mxu0 %vm6760_vm10, %v3132_v58 }
0x186d   :  { %3692 = vmatprep.mubr.msk.f32.mxu0 %vm6761_vm5, %v3133_v47 }
0x1870   :  { %3693 = vmatmul.mubr.msk.f32.gmra.mrb[26].mxu0 %vm6762_vm13, %v3134_v30 }
0x1871   :  { %3919 = shalt.err (!%p3916_p4)
}
0x1872   :  { %s3920_s29 = scalar_lea.hbm %s6463_s11, 256 }
0x1873   :  { %p3921_p5 = scmp.ne.s32.totalorder %s6463_s11, %s3920_s29  ;;  %p3924_p6 = scmp.lt.u32.totalorder %s3920_s29, %s6463_s11 }
0x1875   :  { %p3926_p7 = pnand %p3924_p6, %p3921_p5 }
0x1877   :  { %3929 = shalt.err (!%p3926_p7)
}
0x1878   :  { %s3939_s13 = smov 128   ;;  %s3940_s14 = smov 8   ;;  %v3900_v54 = vld [vmem:[%s6452_s0 + $0x8] sm:$0xff]  ;;  %v3901_v6 = vld [vmem:[%s6452_s0] sm:$0xff]  ;;  %vm6763_vm7 = vmmov %vm6753_vm1 }
0x1879   :  { %3395 = dma.vmem_to_hbm [thread:$0]  %s3390_s9, 256, %s6463_s11, [#allocation3], %s3939_s13, %s3939_s13, %s3940_s14   ;;  %vm6764_vm4 = vmmov %vm6753_vm1 }
0x187a   :  { %v3902_v32 = vld [vmem:[%s6452_s0 + $0x18] sm:$0xff]  ;;  %v3903_v42 = vld [vmem:[%s6452_s0 + $0x10] sm:$0xff]  ;;  %vm6765_vm9 = vmmov %vm6753_vm1 }
0x187b   :  { %vm6766_vm0 = vmmov %vm6753_vm1  ;;  %v3904_v25 = vld [vmem:[%s6452_s0 + $0x28] sm:$0xff]  ;;  %v3905_v12 = vld [vmem:[%s6452_s0 + $0x20] sm:$0xff] }
0x187c   :  { %vm6767_vm11 = vmmov %vm6766_vm0  ;;  %v3906_v24 = vld [vmem:[%s6452_s0 + $0x38] sm:$0xff]  ;;  %v3907_v45 = vld [vmem:[%s6452_s0 + $0x30] sm:$0xff] }
0x187d   :  { %vm6768_vm6 = vmmov %vm6766_vm0 }
0x187e   :  { %vm6769_vm1 = vmmov %vm6766_vm0 }
0x187f   :  { %vm6770_vm14 = vmmov %vm6766_vm0 }
0x1937   :  { %v3685_v55 = vpop.f32.mrb[20].mxu0 }
0x1938   :  { %v3273_v53 = vadd.f32 %v3900_v54, %v3685_v55  ;;  %v3233_v50 = vpop.f32.mrb[21].mxu0 }
0x1939   :  { %v3272_v34 = vadd.f32 %v3901_v6, %v3233_v50 }
0x193a   :  { %3281 = vst.msk [vmem:[%s6462_s10 + $0x8] sm:$0xff] %vm6763_vm7, %v3273_v53 }
0x193b   :  { %3280 = vst.msk [vmem:[%s6462_s10] sm:$0xff] %vm6764_vm4, %v3272_v34  ;;  %v3688_v41 = vpop.f32.mrb[22].mxu0 }
0x193c   :  { %v3275_v43 = vadd.f32 %v3902_v32, %v3688_v41  ;;  %v3243_v5 = vpop.f32.mrb[23].mxu0 }
0x193d   :  { %v3274_v4 = vadd.f32 %v3903_v42, %v3243_v5 }
0x193e   :  { %3283 = vst.msk [vmem:[%s6462_s10 + $0x18] sm:$0xff] %vm6765_vm9, %v3275_v43 }
0x193f   :  { %3282 = vst.msk [vmem:[%s6462_s10 + $0x10] sm:$0xff] %vm6766_vm0, %v3274_v4  ;;  %v3691_v21 = vpop.f32.mrb[24].mxu0 }
0x1940   :  { %v3277_v33 = vadd.f32 %v3904_v25, %v3691_v21  ;;  %v3253_v57 = vpop.f32.mrb[25].mxu0 }
0x1941   :  { %v3276_v26 = vadd.f32 %v3905_v12, %v3253_v57 }
0x1942   :  { %3285 = vst.msk [vmem:[%s6462_s10 + $0x28] sm:$0xff] %vm6767_vm11, %v3277_v33 }
0x1943   :  { %3284 = vst.msk [vmem:[%s6462_s10 + $0x20] sm:$0xff] %vm6768_vm6, %v3276_v26  ;;  %v3694_v23 = vpop.f32.mrb[26].mxu0 }
0x1944   :  { %v3279_v14 = vadd.f32 %v3906_v24, %v3694_v23  ;;  %v3263_v10 = vpop.f32.mrb[27].mxu0 }
0x1945   :  { %v3278_v19 = vadd.f32 %v3907_v45, %v3263_v10 }
0x1946   :  { %3287 = vst.msk [vmem:[%s6462_s10 + $0x38] sm:$0xff] %vm6769_vm1, %v3279_v14 }
0x1947   :  { %3286 = vst.msk [vmem:[%s6462_s10 + $0x30] sm:$0xff] %vm6770_vm14, %v3278_v19 }
0x1948   :  { %3930 = dma.done.wait [#allocation3], 256  }
0x1949   :  { %3931 = vsyncadd [#allocation3], 4294967040 }
0x194a   :  { %3401 = vsyncpa [#allocation3], 1 }

</bundles_post_ra>
